<compile_context>
chip_gen: v7x
topology: tpu7x:2x2x1
jax: 0.10.0
libtpu: 0.0.40
codegen_flags: <defaults>
</compile_context>

<pallas_src>
import math
from functools import partial

import jax
import jax.numpy as jnp
from jax.experimental import pallas as pl
from jax.experimental.pallas import tpu as pltpu

_VMEM_LIMIT = 32 * 1024 * 1024    # scoped-VMEM cap, <= physical on v5e/v6e/v7x
_VMEM_BUDGET = 20 * 1024 * 1024   # tile-selection budget (headroom under cap)


# --------------------------------------------------------------------------- #
# Tile helpers
# --------------------------------------------------------------------------- #
def _pick_tile(dim, candidates, max_tile=None):
    """Largest candidate tile that evenly divides `dim` (and is <= max_tile).
    Falls back to the full dim for small/awkward sizes (full-dim blocks are
    always legal).  TODO(synk): pad awkward dims to 128 multiples instead."""
    for c in candidates:
        if max_tile is not None and c > max_tile:
            continue
        if dim % c == 0:
            return c
    return dim


_ROW_CAND = (512, 256, 128, 64, 32, 16, 8)     # sublane (row) tiles
_LANE_CAND = (512, 256, 128)                   # lane tiles (multiples of 128)


# --------------------------------------------------------------------------- #
# Embedding scale + positional-encoding add (pe broadcast across batch rows)
# --------------------------------------------------------------------------- #
def _scale_add_pe_kernel(x_ref, pe_ref, o_ref, *, scale):
    o_ref[0] = (x_ref[0] * scale + pe_ref[...]).astype(o_ref.dtype)


def scale_add_pe(x, pe, scale):
    # x: (N, S, E) f32, pe: (S, E) f32
    N, S, E = x.shape
    return pl.pallas_call(
        partial(_scale_add_pe_kernel, scale=scale),
        out_shape=jax.ShapeDtypeStruct((N, S, E), x.dtype),
        grid=(N,),
        in_specs=[pl.BlockSpec((1, S, E), lambda i: (i, 0, 0)),
                  pl.BlockSpec((S, E), lambda i: (0, 0))],
        out_specs=pl.BlockSpec((1, S, E), lambda i: (i, 0, 0)),
        compiler_params=pltpu.CompilerParams(
            dimension_semantics=("parallel",),
            vmem_limit_bytes=_VMEM_LIMIT),
    )(x, pe)


# --------------------------------------------------------------------------- #
# Fused multi-head-attention sub-layer:
#   Q/KV projection + SDPA + output projection + residual + LayerNorm
# One grid step per (batch row, query tile); all heads handled inside.
# --------------------------------------------------------------------------- #
def _mha_ln_kernel(xq_ref, xkv_ref, wq_ref, bq_ref, wkv_ref, bkv_ref,
                   wo_ref, bo_ref, am_ref, kp_ref, g_ref, bt_ref, o_ref,
                   *, nheads, scale, eps):
    xq = xq_ref[0].astype(jnp.float32)               # (tq, E)  residual (f32)
    xq_b = xq.astype(jnp.bfloat16)
    xkv_b = xkv_ref[0].astype(jnp.bfloat16)          # (Sk, E)

    # projections (bf16 MXU, f32 accumulate)
    q = jnp.dot(xq_b, wq_ref[...],
                preferred_element_type=jnp.float32) + bq_ref[...]     # (tq, E)
    kv = jnp.dot(xkv_b, wkv_ref[...],
                 preferred_element_type=jnp.float32) + bkv_ref[...]   # (Sk, 2E)

    E = q.shape[-1]
    dh = E // nheads
    v_b = kv[:, E:].astype(jnp.bfloat16)             # (Sk, E)
    kT_b = kv[:, :E].T.astype(jnp.bfloat16)          # (E, Sk) single transpose
    mask = am_ref[...] + kp_ref[0]                   # (tq,Sk) + (1,Sk)
    wo = wo_ref[...]                                 # (E, E) bf16

    acc = jnp.zeros_like(xq)                         # (tq, E) f32
    for h in range(nheads):                          # static unrolled
        lo = h * dh
        qh_b = (q[:, lo:lo + dh] * scale).astype(jnp.bfloat16)       # (tq, dh)
        s = jnp.dot(qh_b, kT_b[lo:lo + dh, :],
                    preferred_element_type=jnp.float32) + mask       # (tq, Sk)
        m = jnp.max(s, axis=-1, keepdims=True)
        p = jnp.exp(s - m)
        p = p / jnp.sum(p, axis=-1, keepdims=True)   # exact divide (parity)
        oh = jnp.dot(p.astype(jnp.bfloat16), v_b[:, lo:lo + dh],
                     preferred_element_type=jnp.float32)             # (tq, dh)
        # fold this head directly into the output projection (no concat)
        acc = acc + jnp.dot(oh.astype(jnp.bfloat16), wo[lo:lo + dh, :],
                            preferred_element_type=jnp.float32)      # (tq, E)

    y = acc + bo_ref[...] + xq                       # +bias +residual
    mu = jnp.mean(y, axis=-1, keepdims=True)
    yc = y - mu
    var = jnp.mean(yc * yc, axis=-1, keepdims=True)
    o_ref[0] = (yc * jax.lax.rsqrt(var + eps) * g_ref[...]
                + bt_ref[...]).astype(o_ref.dtype)


def mha_ln(xq, xkv, p, attn_mask, kp, gamma, beta, nheads, eps=1e-5):
    # xq: (N, Sq, E) f32, xkv: (N, Sk, E) f32,
    # attn_mask: (Sq, Sk) additive f32, kp: (N, 1, Sk) additive f32
    N, Sq, E = xq.shape
    Sk = xkv.shape[1]
    tq = _pick_tile(Sq, _ROW_CAND)
    scale = 1.0 / math.sqrt(E // nheads)
    return pl.pallas_call(
        partial(_mha_ln_kernel, nheads=nheads, scale=scale, eps=eps),
        out_shape=jax.ShapeDtypeStruct((N, Sq, E), xq.dtype),
        grid=(N, Sq // tq),
        in_specs=[
            pl.BlockSpec((1, tq, E), lambda n, q: (n, q, 0)),
            pl.BlockSpec((1, Sk, E), lambda n, q: (n, 0, 0)),
            pl.BlockSpec((E, E), lambda n, q: (0, 0)),       # wq (bf16)
            pl.BlockSpec((1, E), lambda n, q: (0, 0)),       # bq
            pl.BlockSpec((E, 2 * E), lambda n, q: (0, 0)),   # wkv (bf16)
            pl.BlockSpec((1, 2 * E), lambda n, q: (0, 0)),   # bkv
            pl.BlockSpec((E, E), lambda n, q: (0, 0)),       # wo (bf16)
            pl.BlockSpec((1, E), lambda n, q: (0, 0)),       # bo
            pl.BlockSpec((tq, Sk), lambda n, q: (q, 0)),     # attn mask
            pl.BlockSpec((1, 1, Sk), lambda n, q: (n, 0, 0)),# key-pad mask
            pl.BlockSpec((1, E), lambda n, q: (0, 0)),       # ln gamma
            pl.BlockSpec((1, E), lambda n, q: (0, 0)),       # ln beta
        ],
        out_specs=pl.BlockSpec((1, tq, E), lambda n, q: (n, q, 0)),
        compiler_params=pltpu.CompilerParams(
            dimension_semantics=("parallel", "parallel"),
            vmem_limit_bytes=_VMEM_LIMIT),
    )(xq, xkv, p["wq"], p["bq"], p["wkv"], p["bkv"], p["wo"], p["bo"],
      attn_mask, kp, gamma, beta)


# --------------------------------------------------------------------------- #
# Fused feed-forward sub-layer: FF1 + ReLU + FF2 + bias + residual + LayerNorm
# (the (tm, FF) intermediate never leaves VMEM)
# --------------------------------------------------------------------------- #
def _ffn_ln_kernel(x_ref, w1_ref, b1_ref, w2_ref, b2_ref, g_ref, bt_ref,
                   o_ref, *, eps):
    x = x_ref[...].astype(jnp.float32)                                 # (tm, E)
    h = jnp.dot(x.astype(jnp.bfloat16), w1_ref[...],
                preferred_element_type=jnp.float32) + b1_ref[...]      # (tm, FF)
    h = jnp.maximum(h, 0.0)
    y = jnp.dot(h.astype(jnp.bfloat16), w2_ref[...],
                preferred_element_type=jnp.float32) + b2_ref[...] + x  # (tm, E)
    mu = jnp.mean(y, axis=-1, keepdims=True)
    yc = y - mu
    var = jnp.mean(yc * yc, axis=-1, keepdims=True)
    o_ref[...] = (yc * jax.lax.rsqrt(var + eps) * g_ref[...]
                  + bt_ref[...]).astype(o_ref.dtype)


def ffn_ln(x, w1, b1, w2, b2, gamma, beta, eps=1e-5):
    # LayerNorm(x + relu(x@w1 + b1) @ w2 + b2);  x: (M, E)
    M, E = x.shape
    FF = w1.shape[1]
    # VMEM-budget-aware row tile: resident bf16 weights (double-buffered) +
    # per-row f32 activations (x in, h live, out).
    resident = 2 * 2 * (E * FF * 2)
    per_row = 4 * (2 * E + FF) + 8 * E
    max_tm = max(8, (_VMEM_BUDGET - resident) // per_row) \
        if resident < _VMEM_BUDGET else 8
    tm = _pick_tile(M, _ROW_CAND, max_tile=max_tm)
    return pl.pallas_call(
        partial(_ffn_ln_kernel, eps=eps),
        out_shape=jax.ShapeDtypeStruct((M, E), x.dtype),
        grid=(M // tm,),
        in_specs=[
            pl.BlockSpec((tm, E), lambda i: (i, 0)),
            pl.BlockSpec((E, FF), lambda i: (0, 0)),   # w1 (bf16)
            pl.BlockSpec((1, FF), lambda i: (0, 0)),
            pl.BlockSpec((FF, E), lambda i: (0, 0)),   # w2 (bf16)
            pl.BlockSpec((1, E), lambda i: (0, 0)),
            pl.BlockSpec((1, E), lambda i: (0, 0)),
            pl.BlockSpec((1, E), lambda i: (0, 0)),
        ],
        out_specs=pl.BlockSpec((tm, E), lambda i: (i, 0)),
        compiler_params=pltpu.CompilerParams(
            dimension_semantics=("parallel",),
            vmem_limit_bytes=_VMEM_LIMIT),
    )(x, w1, b1, w2, b2, gamma, beta)


# --------------------------------------------------------------------------- #
# Standalone LayerNorm (final encoder / decoder norms), row-tiled
# --------------------------------------------------------------------------- #
def _layernorm_kernel(x_ref, g_ref, b_ref, o_ref, *, eps):
    x = x_ref[...].astype(jnp.float32)
    mu = jnp.mean(x, axis=-1, keepdims=True)
    xc = x - mu
    var = jnp.mean(xc * xc, axis=-1, keepdims=True)
    o_ref[...] = (xc * jax.lax.rsqrt(var + eps) * g_ref[...]
                  + b_ref[...]).astype(o_ref.dtype)


def layernorm(x, g, b, eps=1e-5):
    shp = x.shape
    x2 = x.reshape(-1, shp[-1])
    M, E = x2.shape
    tm = _pick_tile(M, _ROW_CAND)
    out = pl.pallas_call(
        partial(_layernorm_kernel, eps=eps),
        out_shape=jax.ShapeDtypeStruct((M, E), x.dtype),
        grid=(M // tm,),
        in_specs=[pl.BlockSpec((tm, E), lambda i: (i, 0)),
                  pl.BlockSpec((1, E), lambda i: (0, 0)),
                  pl.BlockSpec((1, E), lambda i: (0, 0))],
        out_specs=pl.BlockSpec((tm, E), lambda i: (i, 0)),
        compiler_params=pltpu.CompilerParams(
            dimension_semantics=("parallel",),
            vmem_limit_bytes=_VMEM_LIMIT),
    )(x2, g, b)
    return out.reshape(shp)


# --------------------------------------------------------------------------- #
# Tiled linear (+bias) — used for the generator head (bf16 MXU, f32 acc)
# --------------------------------------------------------------------------- #
def _linear_kernel(x_ref, w_ref, b_ref, o_ref, acc_ref):
    k = pl.program_id(2)

    @pl.when(k == 0)
    def _():
        acc_ref[...] = jnp.zeros_like(acc_ref)

    acc_ref[...] += jnp.dot(x_ref[...].astype(jnp.bfloat16), w_ref[...],
                            preferred_element_type=jnp.float32)

    @pl.when(k == pl.num_programs(2) - 1)
    def _():
        o_ref[...] = (acc_ref[...] + b_ref[...]).astype(o_ref.dtype)


def linear(x, w, b):
    # x: (M, K) f32, w: (K, Nout) bf16, b: (1, Nout) f32
    M, K = x.shape
    Nout = w.shape[1]
    tm = _pick_tile(M, (256, 128, 64, 32, 16, 8))
    tn = _pick_tile(Nout, _LANE_CAND)
    tk = _pick_tile(K, _LANE_CAND)
    return pl.pallas_call(
        _linear_kernel,
        out_shape=jax.ShapeDtypeStruct((M, Nout), x.dtype),
        grid=(M // tm, Nout // tn, K // tk),
        in_specs=[
            pl.BlockSpec((tm, tk), lambda i, j, k: (i, k)),
            pl.BlockSpec((tk, tn), lambda i, j, k: (k, j)),
            pl.BlockSpec((1, tn), lambda i, j, k: (0, j)),
        ],
        out_specs=pl.BlockSpec((tm, tn), lambda i, j, k: (i, j)),
        scratch_shapes=[pltpu.VMEM((tm, tn), jnp.float32)],
        compiler_params=pltpu.CompilerParams(
            dimension_semantics=("parallel", "parallel", "arbitrary"),
            vmem_limit_bytes=_VMEM_LIMIT),
    )(x, w, b)


# --------------------------------------------------------------------------- #
# Model glue (layout-only ops in plain JAX; all compute in kernels above)
# --------------------------------------------------------------------------- #
def padding_to_additive(pad_mask, N, Sk):
    if pad_mask is None:
        return jnp.zeros((N, 1, Sk), jnp.float32)
    return jnp.where(pad_mask, jnp.float32(-jnp.inf),
                     jnp.float32(0.0))[:, None, :]


def encoder_layer(x, p, attn_mask, kp, H):
    N, S, E = x.shape
    x = mha_ln(x, x, p["sa"], attn_mask, kp, p["n1g"], p["n1b"], H)
    x2 = ffn_ln(x.reshape(N * S, E), p["w1"], p["b1"], p["w2"], p["b2"],
                p["n2g"], p["n2b"])
    return x2.reshape(N, S, E)


def decoder_layer(y, memory, p, self_am, cross_am, self_kp, mem_kp, H):
    N, S, E = y.shape
    y = mha_ln(y, y, p["sa"], self_am, self_kp, p["n1g"], p["n1b"], H)
    y = mha_ln(y, memory, p["ca"], cross_am, mem_kp, p["n2g"], p["n2b"], H)
    y2 = ffn_ln(y.reshape(N * S, E), p["w1"], p["b1"], p["w2"], p["b2"],
                p["n3g"], p["n3b"])
    return y2.reshape(N, S, E)


def seq2seq_forward(params, src, trg, src_mask, tgt_mask,
                    src_padding_mask, tgt_padding_mask,
                    memory_key_padding_mask, *, H):
    E = params["src_emb"].shape[1]
    S_src, N = src.shape
    S_tgt = trg.shape[0]
    scale = math.sqrt(E)
    pe = params["pos_embedding"]                        # (maxlen, E)

    # TokenEmbedding (*sqrt(E)) + PositionalEncoding, batch-major internally.
    # TODO(synk): dropout (p=0.1) is identity here (inference/eval semantics).
    src_e = jnp.take(params["src_emb"], src.T, axis=0)  # (N, S_src, E)
    src_e = scale_add_pe(src_e, pe[:S_src], scale)
    tgt_e = jnp.take(params["tgt_emb"], trg.T, axis=0)  # (N, S_tgt, E)
    tgt_e = scale_add_pe(tgt_e, pe[:S_tgt], scale)

    # small additive masks, combined in-kernel (no (N*H,Sq,Sk) materialization)
    src_kp = padding_to_additive(src_padding_mask, N, S_src)
    tgt_kp = padding_to_additive(tgt_padding_mask, N, S_tgt)
    mem_kp = padding_to_additive(memory_key_padding_mask, N, S_src)
    src_am = (src_mask if src_mask is not None
              else jnp.zeros((S_src, S_src))).astype(jnp.float32)
    tgt_am = (tgt_mask if tgt_mask is not None
              else jnp.zeros((S_tgt, S_tgt))).astype(jnp.float32)
    cross_am = jnp.zeros((S_tgt, S_src), jnp.float32)

    # Encoder (post-norm layers + final LayerNorm, nn.Transformer defaults)
    x = src_e
    for p in params["enc_layers"]:
        x = encoder_layer(x, p, src_am, src_kp, H)
    memory = layernorm(x, params["enc_norm_g"], params["enc_norm_b"])

    # Decoder
    y = tgt_e
    for p in params["dec_layers"]:
        y = decoder_layer(y, memory, p, tgt_am, cross_am, tgt_kp, mem_kp, H)
    y = layernorm(y, params["dec_norm_g"], params["dec_norm_b"])

    # Generator, then back to torch's (S_tgt, N, V) layout (single tiny transpose)
    V = params["gen_w"].shape[1]
    out = linear(y.reshape(N * S_tgt, E), params["gen_w"], params["gen_b"])
    return out.reshape(N, S_tgt, V).transpose(1, 0, 2)


# --------------------------------------------------------------------------- #
# Deterministic parameter init (synthetic weights; matmul weights stored bf16)
# --------------------------------------------------------------------------- #
def init_params(key, *, E, H, FF, n_enc, n_dec, src_vocab, tgt_vocab, maxlen=64):
    keys = iter(jax.random.split(key, 4096))

    def nrm(shape, s=0.02, dtype=jnp.bfloat16):
        return (s * jax.random.normal(next(keys), shape)).astype(dtype)

    def zeros(shape):
        return jnp.zeros(shape, jnp.float32)

    def attn_p():    # Q proj + fused K/V proj + output proj
        return dict(wq=nrm((E, E)), bq=zeros((1, E)),
                    wkv=nrm((E, 2 * E)), bkv=zeros((1, 2 * E)),
                    wo=nrm((E, E)), bo=zeros((1, E)))

    def norm_p():
        return jnp.ones((1, E), jnp.float32), jnp.zeros((1, E), jnp.float32)

    def enc_p():
        n1g, n1b = norm_p()
        n2g, n2b = norm_p()
        return dict(sa=attn_p(),
                    w1=nrm((E, FF)), b1=zeros((1, FF)),
                    w2=nrm((FF, E)), b2=zeros((1, E)),
                    n1g=n1g, n1b=n1b, n2g=n2g, n2b=n2b)

    def dec_p():
        n1g, n1b = norm_p()
        n2g, n2b = norm_p()
        n3g, n3b = norm_p()
        return dict(sa=attn_p(), ca=attn_p(),
                    w1=nrm((E, FF)), b1=zeros((1, FF)),
                    w2=nrm((FF, E)), b2=zeros((1, E)),
                    n1g=n1g, n1b=n1b, n2g=n2g, n2b=n2b, n3g=n3g, n3b=n3b)

    # sinusoidal positional encoding (matches PositionalEncoding buffer)
    den = jnp.exp(-jnp.arange(0, E, 2, dtype=jnp.float32) * math.log(10000.0) / E)
    pos = jnp.arange(maxlen, dtype=jnp.float32)[:, None]
    pe = jnp.zeros((maxlen, E), jnp.float32)
    pe = pe.at[:, 0::2].set(jnp.sin(pos * den))
    pe = pe.at[:, 1::2].set(jnp.cos(pos * den))

    eng, enb = norm_p()
    dng, dnb = norm_p()
    return dict(
        src_emb=nrm((src_vocab, E), s=1.0, dtype=jnp.float32),
        tgt_emb=nrm((tgt_vocab, E), s=1.0, dtype=jnp.float32),
        pos_embedding=pe,
        enc_layers=[enc_p() for _ in range(n_enc)],
        dec_layers=[dec_p() for _ in range(n_dec)],
        enc_norm_g=eng, enc_norm_b=enb,
        dec_norm_g=dng, dec_norm_b=dnb,
        gen_w=nrm((E, tgt_vocab)), gen_b=zeros((1, tgt_vocab)),
    )


# --------------------------------------------------------------------------- #
if __name__ == "__main__":
    # lane dims (E, FF, 2E, vocab) are multiples of 128 -> lane-dense stores
    NUM_ENC, NUM_DEC = 2, 2
    EMB, NHEAD, FFN = 128, 4, 256
    SRC_VOCAB, TGT_VOCAB = 256, 256
    S_SRC, S_TGT, BATCH = 10, 8, 2

    key = jax.random.PRNGKey(0)
    kp, ks, kt = jax.random.split(key, 3)
    params = init_params(kp, E=EMB, H=NHEAD, FF=FFN, n_enc=NUM_ENC,
                         n_dec=NUM_DEC, src_vocab=SRC_VOCAB,
                         tgt_vocab=TGT_VOCAB)

    src = jax.random.randint(ks, (S_SRC, BATCH), 0, SRC_VOCAB, dtype=jnp.int32)
    trg = jax.random.randint(kt, (S_TGT, BATCH), 0, TGT_VOCAB, dtype=jnp.int32)

    src_mask = jnp.zeros((S_SRC, S_SRC), jnp.float32)
    causal = jnp.triu(jnp.ones((S_TGT, S_TGT), bool), k=1)
    tgt_mask = jnp.where(causal, jnp.float32(-jnp.inf), jnp.float32(0.0))
    src_padding_mask = jnp.zeros((BATCH, S_SRC), bool)
    tgt_padding_mask = jnp.zeros((BATCH, S_TGT), bool)
    memory_key_padding_mask = src_padding_mask

    fwd = jax.jit(partial(seq2seq_forward, H=NHEAD))
    logits = fwd(params, src, trg, src_mask, tgt_mask,
                 src_padding_mask, tgt_padding_mask, memory_key_padding_mask)
    jax.block_until_ready(logits)

    assert logits.shape == (S_TGT, BATCH, TGT_VOCAB), logits.shape
    assert bool(jnp.all(jnp.isfinite(logits)))
    print("KERNEL_OK")
</pallas_src>

<mosaic_0001>
module attributes {stable_mosaic.version = 11 : i64} {
  func.func @_mha_ln_kernel(%arg0: i32, %arg1: i32, %arg2: memref<1x10x128xf32, #tpu.memory_space<vmem>>, %arg3: memref<1x10x128xf32, #tpu.memory_space<vmem>>, %arg4: memref<128x128xbf16, #tpu.memory_space<vmem>>, %arg5: memref<1x128xf32, #tpu.memory_space<vmem>>, %arg6: memref<128x256xbf16, #tpu.memory_space<vmem>>, %arg7: memref<1x256xf32, #tpu.memory_space<vmem>>, %arg8: memref<128x128xbf16, #tpu.memory_space<vmem>>, %arg9: memref<1x128xf32, #tpu.memory_space<vmem>>, %arg10: memref<10x10xf32, #tpu.memory_space<vmem>>, %arg11: memref<1x1x10xf32, #tpu.memory_space<vmem>>, %arg12: memref<1x128xf32, #tpu.memory_space<vmem>>, %arg13: memref<1x128xf32, #tpu.memory_space<vmem>>, %arg14: memref<1x10x128xf32, #tpu.memory_space<vmem>>) attributes {dimension_semantics = [#tpu.dimension_semantics<parallel>, #tpu.dimension_semantics<parallel>], iteration_bounds = array<i64: 2, 1>, scalar_prefetch = 0 : i64, scratch_operands = 0 : i64, tpu.core_type = #tpu.core_type<tc>, window_params = [{transform_indices = @transform_0, window_bounds = array<i64: 1, 10, 128>}, {transform_indices = @transform_1, window_bounds = array<i64: 1, 10, 128>}, {pipeline_mode = #tpu.pipeline_mode<synchronous>, transform_indices = @transform_2, window_bounds = array<i64: 128, 128>}, {pipeline_mode = #tpu.pipeline_mode<synchronous>, transform_indices = @transform_3, window_bounds = array<i64: 1, 128>}, {pipeline_mode = #tpu.pipeline_mode<synchronous>, transform_indices = @transform_4, window_bounds = array<i64: 128, 256>}, {pipeline_mode = #tpu.pipeline_mode<synchronous>, transform_indices = @transform_5, window_bounds = array<i64: 1, 256>}, {pipeline_mode = #tpu.pipeline_mode<synchronous>, transform_indices = @transform_6, window_bounds = array<i64: 128, 128>}, {pipeline_mode = #tpu.pipeline_mode<synchronous>, transform_indices = @transform_7, window_bounds = array<i64: 1, 128>}, {transform_indices = @transform_8, window_bounds = array<i64: 10, 10>}, {transform_indices = @transform_9, window_bounds = array<i64: 1, 1, 10>}, {pipeline_mode = #tpu.pipeline_mode<synchronous>, transform_indices = @transform_10, window_bounds = array<i64: 1, 128>}, {pipeline_mode = #tpu.pipeline_mode<synchronous>, transform_indices = @transform_11, window_bounds = array<i64: 1, 128>}, {transform_indices = @transform_12, window_bounds = array<i64: 1, 10, 128>}]} {
    %c0 = arith.constant 0 : index
    %c0_0 = arith.constant 0 : index
    %c0_1 = arith.constant 0 : index
    %0 = vector.load %arg2[%c0, %c0_0, %c0_1] : memref<1x10x128xf32, #tpu.memory_space<vmem>>, vector<1x10x128xf32>
    %1 = vector.shape_cast %0 : vector<1x10x128xf32> to vector<10x128xf32>
    %2 = arith.truncf %1 : vector<10x128xf32> to vector<10x128xbf16>
    %c0_2 = arith.constant 0 : index
    %c0_3 = arith.constant 0 : index
    %c0_4 = arith.constant 0 : index
    %3 = vector.load %arg3[%c0_2, %c0_3, %c0_4] : memref<1x10x128xf32, #tpu.memory_space<vmem>>, vector<1x10x128xf32>
    %4 = vector.shape_cast %3 : vector<1x10x128xf32> to vector<10x128xf32>
    %5 = arith.truncf %4 : vector<10x128xf32> to vector<10x128xbf16>
    %c0_5 = arith.constant 0 : index
    %c0_6 = arith.constant 0 : index
    %6 = vector.load %arg4[%c0_5, %c0_6] : memref<128x128xbf16, #tpu.memory_space<vmem>>, vector<128x128xbf16>
    %cst = arith.constant dense<0.000000e+00> : vector<10x128xf32>
    %7 = tpu.matmul %2, %6, %cst {dimension_numbers = #tpu.dot_dimension_numbers<[1], [0], [0], [1], [0, 0, 1, 1], [], []>} : vector<10x128xbf16>, vector<128x128xbf16>, vector<10x128xf32> -> vector<10x128xf32>
    %c0_7 = arith.constant 0 : index
    %c0_8 = arith.constant 0 : index
    %8 = vector.load %arg5[%c0_7, %c0_8] : memref<1x128xf32, #tpu.memory_space<vmem>>, vector<1x128xf32>
    %9 = vector.broadcast %8 : vector<1x128xf32> to vector<10x128xf32>
    %10 = arith.addf %7, %9 : vector<10x128xf32>
    %c0_9 = arith.constant 0 : index
    %c0_10 = arith.constant 0 : index
    %11 = vector.load %arg6[%c0_9, %c0_10] : memref<128x256xbf16, #tpu.memory_space<vmem>>, vector<128x256xbf16>
    %cst_11 = arith.constant dense<0.000000e+00> : vector<10x256xf32>
    %12 = tpu.matmul %5, %11, %cst_11 {dimension_numbers = #tpu.dot_dimension_numbers<[1], [0], [0], [1], [0, 0, 1, 1], [], []>} : vector<10x128xbf16>, vector<128x256xbf16>, vector<10x256xf32> -> vector<10x256xf32>
    %c0_12 = arith.constant 0 : index
    %c0_13 = arith.constant 0 : index
    %13 = vector.load %arg7[%c0_12, %c0_13] : memref<1x256xf32, #tpu.memory_space<vmem>>, vector<1x256xf32>
    %14 = vector.broadcast %13 : vector<1x256xf32> to vector<10x256xf32>
    %15 = arith.addf %12, %14 : vector<10x256xf32>
    %16 = vector.extract_strided_slice %15 {offsets = [0, 128], sizes = [10, 128], strides = [1, 1]} : vector<10x256xf32> to vector<10x128xf32>
    %17 = arith.truncf %16 : vector<10x128xf32> to vector<10x128xbf16>
    %18 = vector.extract_strided_slice %15 {offsets = [0, 0], sizes = [10, 128], strides = [1, 1]} : vector<10x256xf32> to vector<10x128xf32>
    %19 = tpu.transpose %18, [1, 0] : vector<10x128xf32> -> vector<128x10xf32>
    %20 = arith.truncf %19 : vector<128x10xf32> to vector<128x10xbf16>
    %c0_14 = arith.constant 0 : index
    %c0_15 = arith.constant 0 : index
    %21 = vector.load %arg10[%c0_14, %c0_15] : memref<10x10xf32, #tpu.memory_space<vmem>>, vector<10x10xf32>
    %c0_16 = arith.constant 0 : index
    %c0_17 = arith.constant 0 : index
    %c0_18 = arith.constant 0 : index
    %22 = vector.load %arg11[%c0_16, %c0_17, %c0_18] : memref<1x1x10xf32, #tpu.memory_space<vmem>>, vector<1x1x10xf32>
    %23 = vector.shape_cast %22 : vector<1x1x10xf32> to vector<1x10xf32>
    %24 = vector.broadcast %23 : vector<1x10xf32> to vector<10x10xf32>
    %25 = arith.addf %21, %24 : vector<10x10xf32>
    %c0_19 = arith.constant 0 : index
    %c0_20 = arith.constant 0 : index
    %26 = vector.load %arg8[%c0_19, %c0_20] : memref<128x128xbf16, #tpu.memory_space<vmem>>, vector<128x128xbf16>
    %cst_21 = arith.constant 0.000000e+00 : f32
    %27 = vector.broadcast %cst_21 : f32 to vector<10x128xf32>
    %28 = vector.extract_strided_slice %10 {offsets = [0, 0], sizes = [10, 32], strides = [1, 1]} : vector<10x128xf32> to vector<10x32xf32>
    %cst_22 = arith.constant 0.176776692 : f32
    %29 = vector.broadcast %cst_22 : f32 to vector<10x32xf32>
    %30 = arith.mulf %28, %29 : vector<10x32xf32>
    %31 = arith.truncf %30 : vector<10x32xf32> to vector<10x32xbf16>
    %32 = vector.extract_strided_slice %20 {offsets = [0, 0], sizes = [32, 10], strides = [1, 1]} : vector<128x10xbf16> to vector<32x10xbf16>
    %cst_23 = arith.constant dense<0.000000e+00> : vector<10x10xf32>
    %33 = tpu.matmul %31, %32, %cst_23 {dimension_numbers = #tpu.dot_dimension_numbers<[1], [0], [0], [1], [0, 0, 1, 1], [], []>} : vector<10x32xbf16>, vector<32x10xbf16>, vector<10x10xf32> -> vector<10x10xf32>
    %34 = arith.addf %33, %25 : vector<10x10xf32>
    %cst_24 = arith.constant dense<0xFF800000> : vector<10xf32>
    %35 = vector.multi_reduction <maximumf>, %34, %cst_24 [1] : vector<10x10xf32> to vector<10xf32>
    %36 = vector.shape_cast %35 : vector<10xf32> to vector<10x1xf32>
    %37 = vector.broadcast %36 : vector<10x1xf32> to vector<10x10xf32>
    %38 = arith.subf %34, %37 : vector<10x10xf32>
    %39 = math.exp %38 : vector<10x10xf32>
    %cst_25 = arith.constant dense<0.000000e+00> : vector<10xf32>
    %40 = vector.multi_reduction <add>, %39, %cst_25 [1] : vector<10x10xf32> to vector<10xf32>
    %41 = vector.shape_cast %40 : vector<10xf32> to vector<10x1xf32>
    %42 = vector.broadcast %41 : vector<10x1xf32> to vector<10x10xf32>
    %43 = arith.divf %39, %42 : vector<10x10xf32>
    %44 = arith.truncf %43 : vector<10x10xf32> to vector<10x10xbf16>
    %45 = vector.extract_strided_slice %17 {offsets = [0, 0], sizes = [10, 32], strides = [1, 1]} : vector<10x128xbf16> to vector<10x32xbf16>
    %cst_26 = arith.constant dense<0.000000e+00> : vector<10x32xf32>
    %46 = tpu.matmul %44, %45, %cst_26 {dimension_numbers = #tpu.dot_dimension_numbers<[1], [0], [0], [1], [0, 0, 1, 1], [], []>} : vector<10x10xbf16>, vector<10x32xbf16>, vector<10x32xf32> -> vector<10x32xf32>
    %47 = arith.truncf %46 : vector<10x32xf32> to vector<10x32xbf16>
    %48 = vector.extract_strided_slice %26 {offsets = [0, 0], sizes = [32, 128], strides = [1, 1]} : vector<128x128xbf16> to vector<32x128xbf16>
    %cst_27 = arith.constant dense<0.000000e+00> : vector<10x128xf32>
    %49 = tpu.matmul %47, %48, %cst_27 {dimension_numbers = #tpu.dot_dimension_numbers<[1], [0], [0], [1], [0, 0, 1, 1], [], []>} : vector<10x32xbf16>, vector<32x128xbf16>, vector<10x128xf32> -> vector<10x128xf32>
    %50 = arith.addf %27, %49 : vector<10x128xf32>
    %51 = vector.extract_strided_slice %10 {offsets = [0, 32], sizes = [10, 32], strides = [1, 1]} : vector<10x128xf32> to vector<10x32xf32>
    %cst_28 = arith.constant 0.176776692 : f32
    %52 = vector.broadcast %cst_28 : f32 to vector<10x32xf32>
    %53 = arith.mulf %51, %52 : vector<10x32xf32>
    %54 = arith.truncf %53 : vector<10x32xf32> to vector<10x32xbf16>
    %55 = vector.extract_strided_slice %20 {offsets = [32, 0], sizes = [32, 10], strides = [1, 1]} : vector<128x10xbf16> to vector<32x10xbf16>
    %cst_29 = arith.constant dense<0.000000e+00> : vector<10x10xf32>
    %56 = tpu.matmul %54, %55, %cst_29 {dimension_numbers = #tpu.dot_dimension_numbers<[1], [0], [0], [1], [0, 0, 1, 1], [], []>} : vector<10x32xbf16>, vector<32x10xbf16>, vector<10x10xf32> -> vector<10x10xf32>
    %57 = arith.addf %56, %25 : vector<10x10xf32>
    %cst_30 = arith.constant dense<0xFF800000> : vector<10xf32>
    %58 = vector.multi_reduction <maximumf>, %57, %cst_30 [1] : vector<10x10xf32> to vector<10xf32>
    %59 = vector.shape_cast %58 : vector<10xf32> to vector<10x1xf32>
    %60 = vector.broadcast %59 : vector<10x1xf32> to vector<10x10xf32>
    %61 = arith.subf %57, %60 : vector<10x10xf32>
    %62 = math.exp %61 : vector<10x10xf32>
    %cst_31 = arith.constant dense<0.000000e+00> : vector<10xf32>
    %63 = vector.multi_reduction <add>, %62, %cst_31 [1] : vector<10x10xf32> to vector<10xf32>
    %64 = vector.shape_cast %63 : vector<10xf32> to vector<10x1xf32>
    %65 = vector.broadcast %64 : vector<10x1xf32> to vector<10x10xf32>
    %66 = arith.divf %62, %65 : vector<10x10xf32>
    %67 = arith.truncf %66 : vector<10x10xf32> to vector<10x10xbf16>
    %68 = vector.extract_strided_slice %17 {offsets = [0, 32], sizes = [10, 32], strides = [1, 1]} : vector<10x128xbf16> to vector<10x32xbf16>
    %cst_32 = arith.constant dense<0.000000e+00> : vector<10x32xf32>
    %69 = tpu.matmul %67, %68, %cst_32 {dimension_numbers = #tpu.dot_dimension_numbers<[1], [0], [0], [1], [0, 0, 1, 1], [], []>} : vector<10x10xbf16>, vector<10x32xbf16>, vector<10x32xf32> -> vector<10x32xf32>
    %70 = arith.truncf %69 : vector<10x32xf32> to vector<10x32xbf16>
    %71 = vector.extract_strided_slice %26 {offsets = [32, 0], sizes = [32, 128], strides = [1, 1]} : vector<128x128xbf16> to vector<32x128xbf16>
    %cst_33 = arith.constant dense<0.000000e+00> : vector<10x128xf32>
    %72 = tpu.matmul %70, %71, %cst_33 {dimension_numbers = #tpu.dot_dimension_numbers<[1], [0], [0], [1], [0, 0, 1, 1], [], []>} : vector<10x32xbf16>, vector<32x128xbf16>, vector<10x128xf32> -> vector<10x128xf32>
    %73 = arith.addf %50, %72 : vector<10x128xf32>
    %74 = vector.extract_strided_slice %10 {offsets = [0, 64], sizes = [10, 32], strides = [1, 1]} : vector<10x128xf32> to vector<10x32xf32>
    %cst_34 = arith.constant 0.176776692 : f32
    %75 = vector.broadcast %cst_34 : f32 to vector<10x32xf32>
    %76 = arith.mulf %74, %75 : vector<10x32xf32>
    %77 = arith.truncf %76 : vector<10x32xf32> to vector<10x32xbf16>
    %78 = vector.extract_strided_slice %20 {offsets = [64, 0], sizes = [32, 10], strides = [1, 1]} : vector<128x10xbf16> to vector<32x10xbf16>
    %cst_35 = arith.constant dense<0.000000e+00> : vector<10x10xf32>
    %79 = tpu.matmul %77, %78, %cst_35 {dimension_numbers = #tpu.dot_dimension_numbers<[1], [0], [0], [1], [0, 0, 1, 1], [], []>} : vector<10x32xbf16>, vector<32x10xbf16>, vector<10x10xf32> -> vector<10x10xf32>
    %80 = arith.addf %79, %25 : vector<10x10xf32>
    %cst_36 = arith.constant dense<0xFF800000> : vector<10xf32>
    %81 = vector.multi_reduction <maximumf>, %80, %cst_36 [1] : vector<10x10xf32> to vector<10xf32>
    %82 = vector.shape_cast %81 : vector<10xf32> to vector<10x1xf32>
    %83 = vector.broadcast %82 : vector<10x1xf32> to vector<10x10xf32>
    %84 = arith.subf %80, %83 : vector<10x10xf32>
    %85 = math.exp %84 : vector<10x10xf32>
    %cst_37 = arith.constant dense<0.000000e+00> : vector<10xf32>
    %86 = vector.multi_reduction <add>, %85, %cst_37 [1] : vector<10x10xf32> to vector<10xf32>
    %87 = vector.shape_cast %86 : vector<10xf32> to vector<10x1xf32>
    %88 = vector.broadcast %87 : vector<10x1xf32> to vector<10x10xf32>
    %89 = arith.divf %85, %88 : vector<10x10xf32>
    %90 = arith.truncf %89 : vector<10x10xf32> to vector<10x10xbf16>
    %91 = vector.extract_strided_slice %17 {offsets = [0, 64], sizes = [10, 32], strides = [1, 1]} : vector<10x128xbf16> to vector<10x32xbf16>
    %cst_38 = arith.constant dense<0.000000e+00> : vector<10x32xf32>
    %92 = tpu.matmul %90, %91, %cst_38 {dimension_numbers = #tpu.dot_dimension_numbers<[1], [0], [0], [1], [0, 0, 1, 1], [], []>} : vector<10x10xbf16>, vector<10x32xbf16>, vector<10x32xf32> -> vector<10x32xf32>
    %93 = arith.truncf %92 : vector<10x32xf32> to vector<10x32xbf16>
    %94 = vector.extract_strided_slice %26 {offsets = [64, 0], sizes = [32, 128], strides = [1, 1]} : vector<128x128xbf16> to vector<32x128xbf16>
    %cst_39 = arith.constant dense<0.000000e+00> : vector<10x128xf32>
    %95 = tpu.matmul %93, %94, %cst_39 {dimension_numbers = #tpu.dot_dimension_numbers<[1], [0], [0], [1], [0, 0, 1, 1], [], []>} : vector<10x32xbf16>, vector<32x128xbf16>, vector<10x128xf32> -> vector<10x128xf32>
    %96 = arith.addf %73, %95 : vector<10x128xf32>
    %97 = vector.extract_strided_slice %10 {offsets = [0, 96], sizes = [10, 32], strides = [1, 1]} : vector<10x128xf32> to vector<10x32xf32>
    %cst_40 = arith.constant 0.176776692 : f32
    %98 = vector.broadcast %cst_40 : f32 to vector<10x32xf32>
    %99 = arith.mulf %97, %98 : vector<10x32xf32>
    %100 = arith.truncf %99 : vector<10x32xf32> to vector<10x32xbf16>
    %101 = vector.extract_strided_slice %20 {offsets = [96, 0], sizes = [32, 10], strides = [1, 1]} : vector<128x10xbf16> to vector<32x10xbf16>
    %cst_41 = arith.constant dense<0.000000e+00> : vector<10x10xf32>
    %102 = tpu.matmul %100, %101, %cst_41 {dimension_numbers = #tpu.dot_dimension_numbers<[1], [0], [0], [1], [0, 0, 1, 1], [], []>} : vector<10x32xbf16>, vector<32x10xbf16>, vector<10x10xf32> -> vector<10x10xf32>
    %103 = arith.addf %102, %25 : vector<10x10xf32>
    %cst_42 = arith.constant dense<0xFF800000> : vector<10xf32>
    %104 = vector.multi_reduction <maximumf>, %103, %cst_42 [1] : vector<10x10xf32> to vector<10xf32>
    %105 = vector.shape_cast %104 : vector<10xf32> to vector<10x1xf32>
    %106 = vector.broadcast %105 : vector<10x1xf32> to vector<10x10xf32>
    %107 = arith.subf %103, %106 : vector<10x10xf32>
    %108 = math.exp %107 : vector<10x10xf32>
    %cst_43 = arith.constant dense<0.000000e+00> : vector<10xf32>
    %109 = vector.multi_reduction <add>, %108, %cst_43 [1] : vector<10x10xf32> to vector<10xf32>
    %110 = vector.shape_cast %109 : vector<10xf32> to vector<10x1xf32>
    %111 = vector.broadcast %110 : vector<10x1xf32> to vector<10x10xf32>
    %112 = arith.divf %108, %111 : vector<10x10xf32>
    %113 = arith.truncf %112 : vector<10x10xf32> to vector<10x10xbf16>
    %114 = vector.extract_strided_slice %17 {offsets = [0, 96], sizes = [10, 32], strides = [1, 1]} : vector<10x128xbf16> to vector<10x32xbf16>
    %cst_44 = arith.constant dense<0.000000e+00> : vector<10x32xf32>
    %115 = tpu.matmul %113, %114, %cst_44 {dimension_numbers = #tpu.dot_dimension_numbers<[1], [0], [0], [1], [0, 0, 1, 1], [], []>} : vector<10x10xbf16>, vector<10x32xbf16>, vector<10x32xf32> -> vector<10x32xf32>
    %116 = arith.truncf %115 : vector<10x32xf32> to vector<10x32xbf16>
    %117 = vector.extract_strided_slice %26 {offsets = [96, 0], sizes = [32, 128], strides = [1, 1]} : vector<128x128xbf16> to vector<32x128xbf16>
    %cst_45 = arith.constant dense<0.000000e+00> : vector<10x128xf32>
    %118 = tpu.matmul %116, %117, %cst_45 {dimension_numbers = #tpu.dot_dimension_numbers<[1], [0], [0], [1], [0, 0, 1, 1], [], []>} : vector<10x32xbf16>, vector<32x128xbf16>, vector<10x128xf32> -> vector<10x128xf32>
    %119 = arith.addf %96, %118 : vector<10x128xf32>
    %c0_46 = arith.constant 0 : index
    %c0_47 = arith.constant 0 : index
    %120 = vector.load %arg9[%c0_46, %c0_47] : memref<1x128xf32, #tpu.memory_space<vmem>>, vector<1x128xf32>
    %121 = vector.broadcast %120 : vector<1x128xf32> to vector<10x128xf32>
    %122 = arith.addf %119, %121 : vector<10x128xf32>
    %123 = arith.addf %122, %1 : vector<10x128xf32>
    %cst_48 = arith.constant dense<0.000000e+00> : vector<10xf32>
    %124 = vector.multi_reduction <add>, %123, %cst_48 [1] : vector<10x128xf32> to vector<10xf32>
    %125 = vector.shape_cast %124 : vector<10xf32> to vector<10x1xf32>
    %cst_49 = arith.constant 1.280000e+02 : f32
    %126 = vector.broadcast %cst_49 : f32 to vector<10x1xf32>
    %127 = arith.divf %125, %126 : vector<10x1xf32>
    %128 = vector.broadcast %127 : vector<10x1xf32> to vector<10x128xf32>
    %129 = arith.subf %123, %128 : vector<10x128xf32>
    %130 = arith.mulf %129, %129 : vector<10x128xf32>
    %cst_50 = arith.constant dense<0.000000e+00> : vector<10xf32>
    %131 = vector.multi_reduction <add>, %130, %cst_50 [1] : vector<10x128xf32> to vector<10xf32>
    %132 = vector.shape_cast %131 : vector<10xf32> to vector<10x1xf32>
    %cst_51 = arith.constant 1.280000e+02 : f32
    %133 = vector.broadcast %cst_51 : f32 to vector<10x1xf32>
    %134 = arith.divf %132, %133 : vector<10x1xf32>
    %cst_52 = arith.constant 9.99999974E-6 : f32
    %135 = vector.broadcast %cst_52 : f32 to vector<10x1xf32>
    %136 = arith.addf %134, %135 : vector<10x1xf32>
    %137 = math.rsqrt %136 : vector<10x1xf32>
    %138 = vector.broadcast %137 : vector<10x1xf32> to vector<10x128xf32>
    %139 = arith.mulf %129, %138 : vector<10x128xf32>
    %c0_53 = arith.constant 0 : index
    %c0_54 = arith.constant 0 : index
    %140 = vector.load %arg12[%c0_53, %c0_54] : memref<1x128xf32, #tpu.memory_space<vmem>>, vector<1x128xf32>
    %141 = vector.broadcast %140 : vector<1x128xf32> to vector<10x128xf32>
    %142 = arith.mulf %139, %141 : vector<10x128xf32>
    %c0_55 = arith.constant 0 : index
    %c0_56 = arith.constant 0 : index
    %143 = vector.load %arg13[%c0_55, %c0_56] : memref<1x128xf32, #tpu.memory_space<vmem>>, vector<1x128xf32>
    %144 = vector.broadcast %143 : vector<1x128xf32> to vector<10x128xf32>
    %145 = arith.addf %142, %144 : vector<10x128xf32>
    %c0_57 = arith.constant 0 : index
    %c0_58 = arith.constant 0 : index
    %c0_59 = arith.constant 0 : index
    %146 = vector.load %arg14[%c0_57, %c0_58, %c0_59] : memref<1x10x128xf32, #tpu.memory_space<vmem>>, vector<1x10x128xf32>
    %147 = vector.shape_cast %146 : vector<1x10x128xf32> to vector<10x128xf32>
    %148 = vector.shape_cast %145 : vector<10x128xf32> to vector<1x10x128xf32>
    tpu.vector_store %arg14[%c0_57, %c0_58, %c0_59], %148 {strides = array<i32>} : memref<1x10x128xf32, #tpu.memory_space<vmem>>, vector<1x10x128xf32>,
    return
  }
  func.func @transform_0(%arg0: i32, %arg1: i32) -> (i32, i32, i32) {
    %c0_i32 = arith.constant 0 : i32
    %c0_i32_0 = arith.constant 0 : i32
    return %arg0, %arg1, %c0_i32 : i32, i32, i32
  }
  func.func @transform_1(%arg0: i32, %arg1: i32) -> (i32, i32, i32) {
    %c0_i32 = arith.constant 0 : i32
    %c0_i32_0 = arith.constant 0 : i32
    %c0_i32_1 = arith.constant 0 : i32
    return %arg0, %c0_i32, %c0_i32_0 : i32, i32, i32
  }
  func.func @transform_2(%arg0: i32, %arg1: i32) -> (i32, i32) {
    %c0_i32 = arith.constant 0 : i32
    %c0_i32_0 = arith.constant 0 : i32
    %c0_i32_1 = arith.constant 0 : i32
    return %c0_i32, %c0_i32_0 : i32, i32
  }
  func.func @transform_3(%arg0: i32, %arg1: i32) -> (i32, i32) {
    %c0_i32 = arith.constant 0 : i32
    %c0_i32_0 = arith.constant 0 : i32
    %c0_i32_1 = arith.constant 0 : i32
    return %c0_i32, %c0_i32_0 : i32, i32
  }
  func.func @transform_4(%arg0: i32, %arg1: i32) -> (i32, i32) {
    %c0_i32 = arith.constant 0 : i32
    %c0_i32_0 = arith.constant 0 : i32
    %c0_i32_1 = arith.constant 0 : i32
    return %c0_i32, %c0_i32_0 : i32, i32
  }
  func.func @transform_5(%arg0: i32, %arg1: i32) -> (i32, i32) {
    %c0_i32 = arith.constant 0 : i32
    %c0_i32_0 = arith.constant 0 : i32
    %c0_i32_1 = arith.constant 0 : i32
    return %c0_i32, %c0_i32_0 : i32, i32
  }
  func.func @transform_6(%arg0: i32, %arg1: i32) -> (i32, i32) {
    %c0_i32 = arith.constant 0 : i32
    %c0_i32_0 = arith.constant 0 : i32
    %c0_i32_1 = arith.constant 0 : i32
    return %c0_i32, %c0_i32_0 : i32, i32
  }
  func.func @transform_7(%arg0: i32, %arg1: i32) -> (i32, i32) {
    %c0_i32 = arith.constant 0 : i32
    %c0_i32_0 = arith.constant 0 : i32
    %c0_i32_1 = arith.constant 0 : i32
    return %c0_i32, %c0_i32_0 : i32, i32
  }
  func.func @transform_8(%arg0: i32, %arg1: i32) -> (i32, i32) {
    %c0_i32 = arith.constant 0 : i32
    %c0_i32_0 = arith.constant 0 : i32
    return %arg1, %c0_i32 : i32, i32
  }
  func.func @transform_9(%arg0: i32, %arg1: i32) -> (i32, i32, i32) {
    %c0_i32 = arith.constant 0 : i32
    %c0_i32_0 = arith.constant 0 : i32
    %c0_i32_1 = arith.constant 0 : i32
    return %arg0, %c0_i32, %c0_i32_0 : i32, i32, i32
  }
  func.func @transform_10(%arg0: i32, %arg1: i32) -> (i32, i32) {
    %c0_i32 = arith.constant 0 : i32
    %c0_i32_0 = arith.constant 0 : i32
    %c0_i32_1 = arith.constant 0 : i32
    return %c0_i32, %c0_i32_0 : i32, i32
  }
  func.func @transform_11(%arg0: i32, %arg1: i32) -> (i32, i32) {
    %c0_i32 = arith.constant 0 : i32
    %c0_i32_0 = arith.constant 0 : i32
    %c0_i32_1 = arith.constant 0 : i32
    return %c0_i32, %c0_i32_0 : i32, i32
  }
  func.func @transform_12(%arg0: i32, %arg1: i32) -> (i32, i32, i32) {
    %c0_i32 = arith.constant 0 : i32
    %c0_i32_0 = arith.constant 0 : i32
    return %arg0, %arg1, %c0_i32 : i32, i32, i32
  }
}

module attributes {stable_mosaic.version = 11 : i64} {
  func.func @_ffn_ln_kernel(%arg0: i32, %arg1: memref<20x128xf32, #tpu.memory_space<vmem>>, %arg2: memref<128x256xbf16, #tpu.memory_space<vmem>>, %arg3: memref<1x256xf32, #tpu.memory_space<vmem>>, %arg4: memref<256x128xbf16, #tpu.memory_space<vmem>>, %arg5: memref<1x128xf32, #tpu.memory_space<vmem>>, %arg6: memref<1x128xf32, #tpu.memory_space<vmem>>, %arg7: memref<1x128xf32, #tpu.memory_space<vmem>>, %arg8: memref<20x128xf32, #tpu.memory_space<vmem>>) attributes {dimension_semantics = [#tpu.dimension_semantics<parallel>], iteration_bounds = array<i64: 1>, scalar_prefetch = 0 : i64, scratch_operands = 0 : i64, tpu.core_type = #tpu.core_type<tc>, window_params = [{transform_indices = @transform_0, window_bounds = array<i64: 20, 128>}, {pipeline_mode = #tpu.pipeline_mode<synchronous>, transform_indices = @transform_1, window_bounds = array<i64: 128, 256>}, {pipeline_mode = #tpu.pipeline_mode<synchronous>, transform_indices = @transform_2, window_bounds = array<i64: 1, 256>}, {pipeline_mode = #tpu.pipeline_mode<synchronous>, transform_indices = @transform_3, window_bounds = array<i64: 256, 128>}, {pipeline_mode = #tpu.pipeline_mode<synchronous>, transform_indices = @transform_4, window_bounds = array<i64: 1, 128>}, {pipeline_mode = #tpu.pipeline_mode<synchronous>, transform_indices = @transform_5, window_bounds = array<i64: 1, 128>}, {pipeline_mode = #tpu.pipeline_mode<synchronous>, transform_indices = @transform_6, window_bounds = array<i64: 1, 128>}, {transform_indices = @transform_7, window_bounds = array<i64: 20, 128>}]} {
    %c0 = arith.constant 0 : index
    %c0_0 = arith.constant 0 : index
    %0 = vector.load %arg1[%c0, %c0_0] : memref<20x128xf32, #tpu.memory_space<vmem>>, vector<20x128xf32>
    %1 = arith.truncf %0 : vector<20x128xf32> to vector<20x128xbf16>
    %c0_1 = arith.constant 0 : index
    %c0_2 = arith.constant 0 : index
    %2 = vector.load %arg2[%c0_1, %c0_2] : memref<128x256xbf16, #tpu.memory_space<vmem>>, vector<128x256xbf16>
    %cst = arith.constant dense<0.000000e+00> : vector<20x256xf32>
    %3 = tpu.matmul %1, %2, %cst {dimension_numbers = #tpu.dot_dimension_numbers<[1], [0], [0], [1], [0, 0, 1, 1], [], []>} : vector<20x128xbf16>, vector<128x256xbf16>, vector<20x256xf32> -> vector<20x256xf32>
    %c0_3 = arith.constant 0 : index
    %c0_4 = arith.constant 0 : index
    %4 = vector.load %arg3[%c0_3, %c0_4] : memref<1x256xf32, #tpu.memory_space<vmem>>, vector<1x256xf32>
    %5 = vector.broadcast %4 : vector<1x256xf32> to vector<20x256xf32>
    %6 = arith.addf %3, %5 : vector<20x256xf32>
    %cst_5 = arith.constant 0.000000e+00 : f32
    %7 = vector.broadcast %cst_5 : f32 to vector<20x256xf32>
    %8 = arith.maximumf %6, %7 : vector<20x256xf32>
    %9 = arith.truncf %8 : vector<20x256xf32> to vector<20x256xbf16>
    %c0_6 = arith.constant 0 : index
    %c0_7 = arith.constant 0 : index
    %10 = vector.load %arg4[%c0_6, %c0_7] : memref<256x128xbf16, #tpu.memory_space<vmem>>, vector<256x128xbf16>
    %cst_8 = arith.constant dense<0.000000e+00> : vector<20x128xf32>
    %11 = tpu.matmul %9, %10, %cst_8 {dimension_numbers = #tpu.dot_dimension_numbers<[1], [0], [0], [1], [0, 0, 1, 1], [], []>} : vector<20x256xbf16>, vector<256x128xbf16>, vector<20x128xf32> -> vector<20x128xf32>
    %c0_9 = arith.constant 0 : index
    %c0_10 = arith.constant 0 : index
    %12 = vector.load %arg5[%c0_9, %c0_10] : memref<1x128xf32, #tpu.memory_space<vmem>>, vector<1x128xf32>
    %13 = vector.broadcast %12 : vector<1x128xf32> to vector<20x128xf32>
    %14 = arith.addf %11, %13 : vector<20x128xf32>
    %15 = arith.addf %14, %0 : vector<20x128xf32>
    %cst_11 = arith.constant dense<0.000000e+00> : vector<20xf32>
    %16 = vector.multi_reduction <add>, %15, %cst_11 [1] : vector<20x128xf32> to vector<20xf32>
    %17 = vector.shape_cast %16 : vector<20xf32> to vector<20x1xf32>
    %cst_12 = arith.constant 1.280000e+02 : f32
    %18 = vector.broadcast %cst_12 : f32 to vector<20x1xf32>
    %19 = arith.divf %17, %18 : vector<20x1xf32>
    %20 = vector.broadcast %19 : vector<20x1xf32> to vector<20x128xf32>
    %21 = arith.subf %15, %20 : vector<20x128xf32>
    %22 = arith.mulf %21, %21 : vector<20x128xf32>
    %cst_13 = arith.constant dense<0.000000e+00> : vector<20xf32>
    %23 = vector.multi_reduction <add>, %22, %cst_13 [1] : vector<20x128xf32> to vector<20xf32>
    %24 = vector.shape_cast %23 : vector<20xf32> to vector<20x1xf32>
    %cst_14 = arith.constant 1.280000e+02 : f32
    %25 = vector.broadcast %cst_14 : f32 to vector<20x1xf32>
    %26 = arith.divf %24, %25 : vector<20x1xf32>
    %cst_15 = arith.constant 9.99999974E-6 : f32
    %27 = vector.broadcast %cst_15 : f32 to vector<20x1xf32>
    %28 = arith.addf %26, %27 : vector<20x1xf32>
    %29 = math.rsqrt %28 : vector<20x1xf32>
    %30 = vector.broadcast %29 : vector<20x1xf32> to vector<20x128xf32>
    %31 = arith.mulf %21, %30 : vector<20x128xf32>
    %c0_16 = arith.constant 0 : index
    %c0_17 = arith.constant 0 : index
    %32 = vector.load %arg6[%c0_16, %c0_17] : memref<1x128xf32, #tpu.memory_space<vmem>>, vector<1x128xf32>
    %33 = vector.broadcast %32 : vector<1x128xf32> to vector<20x128xf32>
    %34 = arith.mulf %31, %33 : vector<20x128xf32>
    %c0_18 = arith.constant 0 : index
    %c0_19 = arith.constant 0 : index
    %35 = vector.load %arg7[%c0_18, %c0_19] : memref<1x128xf32, #tpu.memory_space<vmem>>, vector<1x128xf32>
    %36 = vector.broadcast %35 : vector<1x128xf32> to vector<20x128xf32>
    %37 = arith.addf %34, %36 : vector<20x128xf32>
    %c0_20 = arith.constant 0 : index
    %c0_21 = arith.constant 0 : index
    %38 = vector.load %arg8[%c0_20, %c0_21] : memref<20x128xf32, #tpu.memory_space<vmem>>, vector<20x128xf32>
    tpu.vector_store %arg8[%c0_20, %c0_21], %37 {strides = array<i32>} : memref<20x128xf32, #tpu.memory_space<vmem>>, vector<20x128xf32>,
    return
  }
  func.func @transform_0(%arg0: i32) -> (i32, i32) {
    %c0_i32 = arith.constant 0 : i32
    %c0_i32_0 = arith.constant 0 : i32
    return %arg0, %c0_i32 : i32, i32
  }
  func.func @transform_1(%arg0: i32) -> (i32, i32) {
    %c0_i32 = arith.constant 0 : i32
    %c0_i32_0 = arith.constant 0 : i32
    %c0_i32_1 = arith.constant 0 : i32
    return %c0_i32, %c0_i32_0 : i32, i32
  }
  func.func @transform_2(%arg0: i32) -> (i32, i32) {
    %c0_i32 = arith.constant 0 : i32
    %c0_i32_0 = arith.constant 0 : i32
    %c0_i32_1 = arith.constant 0 : i32
    return %c0_i32, %c0_i32_0 : i32, i32
  }
  func.func @transform_3(%arg0: i32) -> (i32, i32) {
    %c0_i32 = arith.constant 0 : i32
    %c0_i32_0 = arith.constant 0 : i32
    %c0_i32_1 = arith.constant 0 : i32
    return %c0_i32, %c0_i32_0 : i32, i32
  }
  func.func @transform_4(%arg0: i32) -> (i32, i32) {
    %c0_i32 = arith.constant 0 : i32
    %c0_i32_0 = arith.constant 0 : i32
    %c0_i32_1 = arith.constant 0 : i32
    return %c0_i32, %c0_i32_0 : i32, i32
  }
  func.func @transform_5(%arg0: i32) -> (i32, i32) {
    %c0_i32 = arith.constant 0 : i32
    %c0_i32_0 = arith.constant 0 : i32
    %c0_i32_1 = arith.constant 0 : i32
    return %c0_i32, %c0_i32_0 : i32, i32
  }
  func.func @transform_6(%arg0: i32) -> (i32, i32) {
    %c0_i32 = arith.constant 0 : i32
    %c0_i32_0 = arith.constant 0 : i32
    %c0_i32_1 = arith.constant 0 : i32
    return %c0_i32, %c0_i32_0 : i32, i32
  }
  func.func @transform_7(%arg0: i32) -> (i32, i32) {
    %c0_i32 = arith.constant 0 : i32
    %c0_i32_0 = arith.constant 0 : i32
    return %arg0, %c0_i32 : i32, i32
  }
}

module attributes {stable_mosaic.version = 11 : i64} {
  func.func @_scale_add_pe_kernel(%arg0: i32, %arg1: memref<1x10x128xf32, #tpu.memory_space<vmem>>, %arg2: memref<10x128xf32, #tpu.memory_space<vmem>>, %arg3: memref<1x10x128xf32, #tpu.memory_space<vmem>>) attributes {dimension_semantics = [#tpu.dimension_semantics<parallel>], iteration_bounds = array<i64: 2>, scalar_prefetch = 0 : i64, scratch_operands = 0 : i64, tpu.core_type = #tpu.core_type<tc>, window_params = [{transform_indices = @transform_0, window_bounds = array<i64: 1, 10, 128>}, {pipeline_mode = #tpu.pipeline_mode<synchronous>, transform_indices = @transform_1, window_bounds = array<i64: 10, 128>}, {transform_indices = @transform_2, window_bounds = array<i64: 1, 10, 128>}]} {
    %c0 = arith.constant 0 : index
    %c0_0 = arith.constant 0 : index
    %c0_1 = arith.constant 0 : index
    %0 = vector.load %arg1[%c0, %c0_0, %c0_1] : memref<1x10x128xf32, #tpu.memory_space<vmem>>, vector<1x10x128xf32>
    %1 = vector.shape_cast %0 : vector<1x10x128xf32> to vector<10x128xf32>
    %cst = arith.constant 11.3137083 : f32
    %2 = vector.broadcast %cst : f32 to vector<10x128xf32>
    %3 = arith.mulf %1, %2 : vector<10x128xf32>
    %c0_2 = arith.constant 0 : index
    %c0_3 = arith.constant 0 : index
    %4 = vector.load %arg2[%c0_2, %c0_3] : memref<10x128xf32, #tpu.memory_space<vmem>>, vector<10x128xf32>
    %5 = arith.addf %3, %4 : vector<10x128xf32>
    %c0_4 = arith.constant 0 : index
    %c0_5 = arith.constant 0 : index
    %c0_6 = arith.constant 0 : index
    %6 = vector.load %arg3[%c0_4, %c0_5, %c0_6] : memref<1x10x128xf32, #tpu.memory_space<vmem>>, vector<1x10x128xf32>
    %7 = vector.shape_cast %6 : vector<1x10x128xf32> to vector<10x128xf32>
    %8 = vector.shape_cast %5 : vector<10x128xf32> to vector<1x10x128xf32>
    tpu.vector_store %arg3[%c0_4, %c0_5, %c0_6], %8 {strides = array<i32>} : memref<1x10x128xf32, #tpu.memory_space<vmem>>, vector<1x10x128xf32>,
    return
  }
  func.func @transform_0(%arg0: i32) -> (i32, i32, i32) {
    %c0_i32 = arith.constant 0 : i32
    %c0_i32_0 = arith.constant 0 : i32
    %c0_i32_1 = arith.constant 0 : i32
    return %arg0, %c0_i32, %c0_i32_0 : i32, i32, i32
  }
  func.func @transform_1(%arg0: i32) -> (i32, i32) {
    %c0_i32 = arith.constant 0 : i32
    %c0_i32_0 = arith.constant 0 : i32
    %c0_i32_1 = arith.constant 0 : i32
    return %c0_i32, %c0_i32_0 : i32, i32
  }
  func.func @transform_2(%arg0: i32) -> (i32, i32, i32) {
    %c0_i32 = arith.constant 0 : i32
    %c0_i32_0 = arith.constant 0 : i32
    %c0_i32_1 = arith.constant 0 : i32
    return %arg0, %c0_i32, %c0_i32_0 : i32, i32, i32
  }
}

module attributes {stable_mosaic.version = 11 : i64} {
  func.func @_layernorm_kernel(%arg0: i32, %arg1: memref<20x128xf32, #tpu.memory_space<vmem>>, %arg2: memref<1x128xf32, #tpu.memory_space<vmem>>, %arg3: memref<1x128xf32, #tpu.memory_space<vmem>>, %arg4: memref<20x128xf32, #tpu.memory_space<vmem>>) attributes {dimension_semantics = [#tpu.dimension_semantics<parallel>], iteration_bounds = array<i64: 1>, scalar_prefetch = 0 : i64, scratch_operands = 0 : i64, tpu.core_type = #tpu.core_type<tc>, window_params = [{transform_indices = @transform_0, window_bounds = array<i64: 20, 128>}, {pipeline_mode = #tpu.pipeline_mode<synchronous>, transform_indices = @transform_1, window_bounds = array<i64: 1, 128>}, {pipeline_mode = #tpu.pipeline_mode<synchronous>, transform_indices = @transform_2, window_bounds = array<i64: 1, 128>}, {transform_indices = @transform_3, window_bounds = array<i64: 20, 128>}]} {
    %c0 = arith.constant 0 : index
    %c0_0 = arith.constant 0 : index
    %0 = vector.load %arg1[%c0, %c0_0] : memref<20x128xf32, #tpu.memory_space<vmem>>, vector<20x128xf32>
    %cst = arith.constant dense<0.000000e+00> : vector<20xf32>
    %1 = vector.multi_reduction <add>, %0, %cst [1] : vector<20x128xf32> to vector<20xf32>
    %2 = vector.shape_cast %1 : vector<20xf32> to vector<20x1xf32>
    %cst_1 = arith.constant 1.280000e+02 : f32
    %3 = vector.broadcast %cst_1 : f32 to vector<20x1xf32>
    %4 = arith.divf %2, %3 : vector<20x1xf32>
    %5 = vector.broadcast %4 : vector<20x1xf32> to vector<20x128xf32>
    %6 = arith.subf %0, %5 : vector<20x128xf32>
    %7 = arith.mulf %6, %6 : vector<20x128xf32>
    %cst_2 = arith.constant dense<0.000000e+00> : vector<20xf32>
    %8 = vector.multi_reduction <add>, %7, %cst_2 [1] : vector<20x128xf32> to vector<20xf32>
    %9 = vector.shape_cast %8 : vector<20xf32> to vector<20x1xf32>
    %cst_3 = arith.constant 1.280000e+02 : f32
    %10 = vector.broadcast %cst_3 : f32 to vector<20x1xf32>
    %11 = arith.divf %9, %10 : vector<20x1xf32>
    %cst_4 = arith.constant 9.99999974E-6 : f32
    %12 = vector.broadcast %cst_4 : f32 to vector<20x1xf32>
    %13 = arith.addf %11, %12 : vector<20x1xf32>
    %14 = math.rsqrt %13 : vector<20x1xf32>
    %15 = vector.broadcast %14 : vector<20x1xf32> to vector<20x128xf32>
    %16 = arith.mulf %6, %15 : vector<20x128xf32>
    %c0_5 = arith.constant 0 : index
    %c0_6 = arith.constant 0 : index
    %17 = vector.load %arg2[%c0_5, %c0_6] : memref<1x128xf32, #tpu.memory_space<vmem>>, vector<1x128xf32>
    %18 = vector.broadcast %17 : vector<1x128xf32> to vector<20x128xf32>
    %19 = arith.mulf %16, %18 : vector<20x128xf32>
    %c0_7 = arith.constant 0 : index
    %c0_8 = arith.constant 0 : index
    %20 = vector.load %arg3[%c0_7, %c0_8] : memref<1x128xf32, #tpu.memory_space<vmem>>, vector<1x128xf32>
    %21 = vector.broadcast %20 : vector<1x128xf32> to vector<20x128xf32>
    %22 = arith.addf %19, %21 : vector<20x128xf32>
    %c0_9 = arith.constant 0 : index
    %c0_10 = arith.constant 0 : index
    %23 = vector.load %arg4[%c0_9, %c0_10] : memref<20x128xf32, #tpu.memory_space<vmem>>, vector<20x128xf32>
    tpu.vector_store %arg4[%c0_9, %c0_10], %22 {strides = array<i32>} : memref<20x128xf32, #tpu.memory_space<vmem>>, vector<20x128xf32>,
    return
  }
  func.func @transform_0(%arg0: i32) -> (i32, i32) {
    %c0_i32 = arith.constant 0 : i32
    %c0_i32_0 = arith.constant 0 : i32
    return %arg0, %c0_i32 : i32, i32
  }
  func.func @transform_1(%arg0: i32) -> (i32, i32) {
    %c0_i32 = arith.constant 0 : i32
    %c0_i32_0 = arith.constant 0 : i32
    %c0_i32_1 = arith.constant 0 : i32
    return %c0_i32, %c0_i32_0 : i32, i32
  }
  func.func @transform_2(%arg0: i32) -> (i32, i32) {
    %c0_i32 = arith.constant 0 : i32
    %c0_i32_0 = arith.constant 0 : i32
    %c0_i32_1 = arith.constant 0 : i32
    return %c0_i32, %c0_i32_0 : i32, i32
  }
  func.func @transform_3(%arg0: i32) -> (i32, i32) {
    %c0_i32 = arith.constant 0 : i32
    %c0_i32_0 = arith.constant 0 : i32
    return %arg0, %c0_i32 : i32, i32
  }
}

module attributes {stable_mosaic.version = 11 : i64} {
  func.func @_scale_add_pe_kernel(%arg0: i32, %arg1: memref<1x8x128xf32, #tpu.memory_space<vmem>>, %arg2: memref<8x128xf32, #tpu.memory_space<vmem>>, %arg3: memref<1x8x128xf32, #tpu.memory_space<vmem>>) attributes {dimension_semantics = [#tpu.dimension_semantics<parallel>], iteration_bounds = array<i64: 2>, scalar_prefetch = 0 : i64, scratch_operands = 0 : i64, tpu.core_type = #tpu.core_type<tc>, window_params = [{transform_indices = @transform_0, window_bounds = array<i64: 1, 8, 128>}, {pipeline_mode = #tpu.pipeline_mode<synchronous>, transform_indices = @transform_1, window_bounds = array<i64: 8, 128>}, {transform_indices = @transform_2, window_bounds = array<i64: 1, 8, 128>}]} {
    %c0 = arith.constant 0 : index
    %c0_0 = arith.constant 0 : index
    %c0_1 = arith.constant 0 : index
    %0 = vector.load %arg1[%c0, %c0_0, %c0_1] : memref<1x8x128xf32, #tpu.memory_space<vmem>>, vector<1x8x128xf32>
    %1 = vector.shape_cast %0 : vector<1x8x128xf32> to vector<8x128xf32>
    %cst = arith.constant 11.3137083 : f32
    %2 = vector.broadcast %cst : f32 to vector<8x128xf32>
    %3 = arith.mulf %1, %2 : vector<8x128xf32>
    %c0_2 = arith.constant 0 : index
    %c0_3 = arith.constant 0 : index
    %4 = vector.load %arg2[%c0_2, %c0_3] : memref<8x128xf32, #tpu.memory_space<vmem>>, vector<8x128xf32>
    %5 = arith.addf %3, %4 : vector<8x128xf32>
    %c0_4 = arith.constant 0 : index
    %c0_5 = arith.constant 0 : index
    %c0_6 = arith.constant 0 : index
    %6 = vector.load %arg3[%c0_4, %c0_5, %c0_6] : memref<1x8x128xf32, #tpu.memory_space<vmem>>, vector<1x8x128xf32>
    %7 = vector.shape_cast %6 : vector<1x8x128xf32> to vector<8x128xf32>
    %8 = vector.shape_cast %5 : vector<8x128xf32> to vector<1x8x128xf32>
    tpu.vector_store %arg3[%c0_4, %c0_5, %c0_6], %8 {strides = array<i32>} : memref<1x8x128xf32, #tpu.memory_space<vmem>>, vector<1x8x128xf32>,
    return
  }
  func.func @transform_0(%arg0: i32) -> (i32, i32, i32) {
    %c0_i32 = arith.constant 0 : i32
    %c0_i32_0 = arith.constant 0 : i32
    %c0_i32_1 = arith.constant 0 : i32
    return %arg0, %c0_i32, %c0_i32_0 : i32, i32, i32
  }
  func.func @transform_1(%arg0: i32) -> (i32, i32) {
    %c0_i32 = arith.constant 0 : i32
    %c0_i32_0 = arith.constant 0 : i32
    %c0_i32_1 = arith.constant 0 : i32
    return %c0_i32, %c0_i32_0 : i32, i32
  }
  func.func @transform_2(%arg0: i32) -> (i32, i32, i32) {
    %c0_i32 = arith.constant 0 : i32
    %c0_i32_0 = arith.constant 0 : i32
    %c0_i32_1 = arith.constant 0 : i32
    return %arg0, %c0_i32, %c0_i32_0 : i32, i32, i32
  }
}

module attributes {stable_mosaic.version = 11 : i64} {
  func.func @_mha_ln_kernel(%arg0: i32, %arg1: i32, %arg2: memref<1x8x128xf32, #tpu.memory_space<vmem>>, %arg3: memref<1x8x128xf32, #tpu.memory_space<vmem>>, %arg4: memref<128x128xbf16, #tpu.memory_space<vmem>>, %arg5: memref<1x128xf32, #tpu.memory_space<vmem>>, %arg6: memref<128x256xbf16, #tpu.memory_space<vmem>>, %arg7: memref<1x256xf32, #tpu.memory_space<vmem>>, %arg8: memref<128x128xbf16, #tpu.memory_space<vmem>>, %arg9: memref<1x128xf32, #tpu.memory_space<vmem>>, %arg10: memref<8x8xf32, #tpu.memory_space<vmem>>, %arg11: memref<1x1x8xf32, #tpu.memory_space<vmem>>, %arg12: memref<1x128xf32, #tpu.memory_space<vmem>>, %arg13: memref<1x128xf32, #tpu.memory_space<vmem>>, %arg14: memref<1x8x128xf32, #tpu.memory_space<vmem>>) attributes {dimension_semantics = [#tpu.dimension_semantics<parallel>, #tpu.dimension_semantics<parallel>], iteration_bounds = array<i64: 2, 1>, scalar_prefetch = 0 : i64, scratch_operands = 0 : i64, tpu.core_type = #tpu.core_type<tc>, window_params = [{transform_indices = @transform_0, window_bounds = array<i64: 1, 8, 128>}, {transform_indices = @transform_1, window_bounds = array<i64: 1, 8, 128>}, {pipeline_mode = #tpu.pipeline_mode<synchronous>, transform_indices = @transform_2, window_bounds = array<i64: 128, 128>}, {pipeline_mode = #tpu.pipeline_mode<synchronous>, transform_indices = @transform_3, window_bounds = array<i64: 1, 128>}, {pipeline_mode = #tpu.pipeline_mode<synchronous>, transform_indices = @transform_4, window_bounds = array<i64: 128, 256>}, {pipeline_mode = #tpu.pipeline_mode<synchronous>, transform_indices = @transform_5, window_bounds = array<i64: 1, 256>}, {pipeline_mode = #tpu.pipeline_mode<synchronous>, transform_indices = @transform_6, window_bounds = array<i64: 128, 128>}, {pipeline_mode = #tpu.pipeline_mode<synchronous>, transform_indices = @transform_7, window_bounds = array<i64: 1, 128>}, {transform_indices = @transform_8, window_bounds = array<i64: 8, 8>}, {transform_indices = @transform_9, window_bounds = array<i64: 1, 1, 8>}, {pipeline_mode = #tpu.pipeline_mode<synchronous>, transform_indices = @transform_10, window_bounds = array<i64: 1, 128>}, {pipeline_mode = #tpu.pipeline_mode<synchronous>, transform_indices = @transform_11, window_bounds = array<i64: 1, 128>}, {transform_indices = @transform_12, window_bounds = array<i64: 1, 8, 128>}]} {
    %c0 = arith.constant 0 : index
    %c0_0 = arith.constant 0 : index
    %c0_1 = arith.constant 0 : index
    %0 = vector.load %arg2[%c0, %c0_0, %c0_1] : memref<1x8x128xf32, #tpu.memory_space<vmem>>, vector<1x8x128xf32>
    %1 = vector.shape_cast %0 : vector<1x8x128xf32> to vector<8x128xf32>
    %2 = arith.truncf %1 : vector<8x128xf32> to vector<8x128xbf16>
    %c0_2 = arith.constant 0 : index
    %c0_3 = arith.constant 0 : index
    %c0_4 = arith.constant 0 : index
    %3 = vector.load %arg3[%c0_2, %c0_3, %c0_4] : memref<1x8x128xf32, #tpu.memory_space<vmem>>, vector<1x8x128xf32>
    %4 = vector.shape_cast %3 : vector<1x8x128xf32> to vector<8x128xf32>
    %5 = arith.truncf %4 : vector<8x128xf32> to vector<8x128xbf16>
    %c0_5 = arith.constant 0 : index
    %c0_6 = arith.constant 0 : index
    %6 = vector.load %arg4[%c0_5, %c0_6] : memref<128x128xbf16, #tpu.memory_space<vmem>>, vector<128x128xbf16>
    %cst = arith.constant dense<0.000000e+00> : vector<8x128xf32>
    %7 = tpu.matmul %2, %6, %cst {dimension_numbers = #tpu.dot_dimension_numbers<[1], [0], [0], [1], [0, 0, 1, 1], [], []>} : vector<8x128xbf16>, vector<128x128xbf16>, vector<8x128xf32> -> vector<8x128xf32>
    %c0_7 = arith.constant 0 : index
    %c0_8 = arith.constant 0 : index
    %8 = vector.load %arg5[%c0_7, %c0_8] : memref<1x128xf32, #tpu.memory_space<vmem>>, vector<1x128xf32>
    %9 = vector.broadcast %8 : vector<1x128xf32> to vector<8x128xf32>
    %10 = arith.addf %7, %9 : vector<8x128xf32>
    %c0_9 = arith.constant 0 : index
    %c0_10 = arith.constant 0 : index
    %11 = vector.load %arg6[%c0_9, %c0_10] : memref<128x256xbf16, #tpu.memory_space<vmem>>, vector<128x256xbf16>
    %cst_11 = arith.constant dense<0.000000e+00> : vector<8x256xf32>
    %12 = tpu.matmul %5, %11, %cst_11 {dimension_numbers = #tpu.dot_dimension_numbers<[1], [0], [0], [1], [0, 0, 1, 1], [], []>} : vector<8x128xbf16>, vector<128x256xbf16>, vector<8x256xf32> -> vector<8x256xf32>
    %c0_12 = arith.constant 0 : index
    %c0_13 = arith.constant 0 : index
    %13 = vector.load %arg7[%c0_12, %c0_13] : memref<1x256xf32, #tpu.memory_space<vmem>>, vector<1x256xf32>
    %14 = vector.broadcast %13 : vector<1x256xf32> to vector<8x256xf32>
    %15 = arith.addf %12, %14 : vector<8x256xf32>
    %16 = vector.extract_strided_slice %15 {offsets = [0, 128], sizes = [8, 128], strides = [1, 1]} : vector<8x256xf32> to vector<8x128xf32>
    %17 = arith.truncf %16 : vector<8x128xf32> to vector<8x128xbf16>
    %18 = vector.extract_strided_slice %15 {offsets = [0, 0], sizes = [8, 128], strides = [1, 1]} : vector<8x256xf32> to vector<8x128xf32>
    %19 = tpu.transpose %18, [1, 0] : vector<8x128xf32> -> vector<128x8xf32>
    %20 = arith.truncf %19 : vector<128x8xf32> to vector<128x8xbf16>
    %c0_14 = arith.constant 0 : index
    %c0_15 = arith.constant 0 : index
    %21 = vector.load %arg10[%c0_14, %c0_15] : memref<8x8xf32, #tpu.memory_space<vmem>>, vector<8x8xf32>
    %c0_16 = arith.constant 0 : index
    %c0_17 = arith.constant 0 : index
    %c0_18 = arith.constant 0 : index
    %22 = vector.load %arg11[%c0_16, %c0_17, %c0_18] : memref<1x1x8xf32, #tpu.memory_space<vmem>>, vector<1x1x8xf32>
    %23 = vector.shape_cast %22 : vector<1x1x8xf32> to vector<1x8xf32>
    %24 = vector.broadcast %23 : vector<1x8xf32> to vector<8x8xf32>
    %25 = arith.addf %21, %24 : vector<8x8xf32>
    %c0_19 = arith.constant 0 : index
    %c0_20 = arith.constant 0 : index
    %26 = vector.load %arg8[%c0_19, %c0_20] : memref<128x128xbf16, #tpu.memory_space<vmem>>, vector<128x128xbf16>
    %cst_21 = arith.constant 0.000000e+00 : f32
    %27 = vector.broadcast %cst_21 : f32 to vector<8x128xf32>
    %28 = vector.extract_strided_slice %10 {offsets = [0, 0], sizes = [8, 32], strides = [1, 1]} : vector<8x128xf32> to vector<8x32xf32>
    %cst_22 = arith.constant 0.176776692 : f32
    %29 = vector.broadcast %cst_22 : f32 to vector<8x32xf32>
    %30 = arith.mulf %28, %29 : vector<8x32xf32>
    %31 = arith.truncf %30 : vector<8x32xf32> to vector<8x32xbf16>
    %32 = vector.extract_strided_slice %20 {offsets = [0, 0], sizes = [32, 8], strides = [1, 1]} : vector<128x8xbf16> to vector<32x8xbf16>
    %cst_23 = arith.constant dense<0.000000e+00> : vector<8x8xf32>
    %33 = tpu.matmul %31, %32, %cst_23 {dimension_numbers = #tpu.dot_dimension_numbers<[1], [0], [0], [1], [0, 0, 1, 1], [], []>} : vector<8x32xbf16>, vector<32x8xbf16>, vector<8x8xf32> -> vector<8x8xf32>
    %34 = arith.addf %33, %25 : vector<8x8xf32>
    %cst_24 = arith.constant dense<0xFF800000> : vector<8xf32>
    %35 = vector.multi_reduction <maximumf>, %34, %cst_24 [1] : vector<8x8xf32> to vector<8xf32>
    %36 = vector.shape_cast %35 : vector<8xf32> to vector<8x1xf32>
    %37 = vector.broadcast %36 : vector<8x1xf32> to vector<8x8xf32>
    %38 = arith.subf %34, %37 : vector<8x8xf32>
    %39 = math.exp %38 : vector<8x8xf32>
    %cst_25 = arith.constant dense<0.000000e+00> : vector<8xf32>
    %40 = vector.multi_reduction <add>, %39, %cst_25 [1] : vector<8x8xf32> to vector<8xf32>
    %41 = vector.shape_cast %40 : vector<8xf32> to vector<8x1xf32>
    %42 = vector.broadcast %41 : vector<8x1xf32> to vector<8x8xf32>
    %43 = arith.divf %39, %42 : vector<8x8xf32>
    %44 = arith.truncf %43 : vector<8x8xf32> to vector<8x8xbf16>
    %45 = vector.extract_strided_slice %17 {offsets = [0, 0], sizes = [8, 32], strides = [1, 1]} : vector<8x128xbf16> to vector<8x32xbf16>
    %cst_26 = arith.constant dense<0.000000e+00> : vector<8x32xf32>
    %46 = tpu.matmul %44, %45, %cst_26 {dimension_numbers = #tpu.dot_dimension_numbers<[1], [0], [0], [1], [0, 0, 1, 1], [], []>} : vector<8x8xbf16>, vector<8x32xbf16>, vector<8x32xf32> -> vector<8x32xf32>
    %47 = arith.truncf %46 : vector<8x32xf32> to vector<8x32xbf16>
    %48 = vector.extract_strided_slice %26 {offsets = [0, 0], sizes = [32, 128], strides = [1, 1]} : vector<128x128xbf16> to vector<32x128xbf16>
    %cst_27 = arith.constant dense<0.000000e+00> : vector<8x128xf32>
    %49 = tpu.matmul %47, %48, %cst_27 {dimension_numbers = #tpu.dot_dimension_numbers<[1], [0], [0], [1], [0, 0, 1, 1], [], []>} : vector<8x32xbf16>, vector<32x128xbf16>, vector<8x128xf32> -> vector<8x128xf32>
    %50 = arith.addf %27, %49 : vector<8x128xf32>
    %51 = vector.extract_strided_slice %10 {offsets = [0, 32], sizes = [8, 32], strides = [1, 1]} : vector<8x128xf32> to vector<8x32xf32>
    %cst_28 = arith.constant 0.176776692 : f32
    %52 = vector.broadcast %cst_28 : f32 to vector<8x32xf32>
    %53 = arith.mulf %51, %52 : vector<8x32xf32>
    %54 = arith.truncf %53 : vector<8x32xf32> to vector<8x32xbf16>
    %55 = vector.extract_strided_slice %20 {offsets = [32, 0], sizes = [32, 8], strides = [1, 1]} : vector<128x8xbf16> to vector<32x8xbf16>
    %cst_29 = arith.constant dense<0.000000e+00> : vector<8x8xf32>
    %56 = tpu.matmul %54, %55, %cst_29 {dimension_numbers = #tpu.dot_dimension_numbers<[1], [0], [0], [1], [0, 0, 1, 1], [], []>} : vector<8x32xbf16>, vector<32x8xbf16>, vector<8x8xf32> -> vector<8x8xf32>
    %57 = arith.addf %56, %25 : vector<8x8xf32>
    %cst_30 = arith.constant dense<0xFF800000> : vector<8xf32>
    %58 = vector.multi_reduction <maximumf>, %57, %cst_30 [1] : vector<8x8xf32> to vector<8xf32>
    %59 = vector.shape_cast %58 : vector<8xf32> to vector<8x1xf32>
    %60 = vector.broadcast %59 : vector<8x1xf32> to vector<8x8xf32>
    %61 = arith.subf %57, %60 : vector<8x8xf32>
    %62 = math.exp %61 : vector<8x8xf32>
    %cst_31 = arith.constant dense<0.000000e+00> : vector<8xf32>
    %63 = vector.multi_reduction <add>, %62, %cst_31 [1] : vector<8x8xf32> to vector<8xf32>
    %64 = vector.shape_cast %63 : vector<8xf32> to vector<8x1xf32>
    %65 = vector.broadcast %64 : vector<8x1xf32> to vector<8x8xf32>
    %66 = arith.divf %62, %65 : vector<8x8xf32>
    %67 = arith.truncf %66 : vector<8x8xf32> to vector<8x8xbf16>
    %68 = vector.extract_strided_slice %17 {offsets = [0, 32], sizes = [8, 32], strides = [1, 1]} : vector<8x128xbf16> to vector<8x32xbf16>
    %cst_32 = arith.constant dense<0.000000e+00> : vector<8x32xf32>
    %69 = tpu.matmul %67, %68, %cst_32 {dimension_numbers = #tpu.dot_dimension_numbers<[1], [0], [0], [1], [0, 0, 1, 1], [], []>} : vector<8x8xbf16>, vector<8x32xbf16>, vector<8x32xf32> -> vector<8x32xf32>
    %70 = arith.truncf %69 : vector<8x32xf32> to vector<8x32xbf16>
    %71 = vector.extract_strided_slice %26 {offsets = [32, 0], sizes = [32, 128], strides = [1, 1]} : vector<128x128xbf16> to vector<32x128xbf16>
    %cst_33 = arith.constant dense<0.000000e+00> : vector<8x128xf32>
    %72 = tpu.matmul %70, %71, %cst_33 {dimension_numbers = #tpu.dot_dimension_numbers<[1], [0], [0], [1], [0, 0, 1, 1], [], []>} : vector<8x32xbf16>, vector<32x128xbf16>, vector<8x128xf32> -> vector<8x128xf32>
    %73 = arith.addf %50, %72 : vector<8x128xf32>
    %74 = vector.extract_strided_slice %10 {offsets = [0, 64], sizes = [8, 32], strides = [1, 1]} : vector<8x128xf32> to vector<8x32xf32>
    %cst_34 = arith.constant 0.176776692 : f32
    %75 = vector.broadcast %cst_34 : f32 to vector<8x32xf32>
    %76 = arith.mulf %74, %75 : vector<8x32xf32>
    %77 = arith.truncf %76 : vector<8x32xf32> to vector<8x32xbf16>
    %78 = vector.extract_strided_slice %20 {offsets = [64, 0], sizes = [32, 8], strides = [1, 1]} : vector<128x8xbf16> to vector<32x8xbf16>
    %cst_35 = arith.constant dense<0.000000e+00> : vector<8x8xf32>
    %79 = tpu.matmul %77, %78, %cst_35 {dimension_numbers = #tpu.dot_dimension_numbers<[1], [0], [0], [1], [0, 0, 1, 1], [], []>} : vector<8x32xbf16>, vector<32x8xbf16>, vector<8x8xf32> -> vector<8x8xf32>
    %80 = arith.addf %79, %25 : vector<8x8xf32>
    %cst_36 = arith.constant dense<0xFF800000> : vector<8xf32>
    %81 = vector.multi_reduction <maximumf>, %80, %cst_36 [1] : vector<8x8xf32> to vector<8xf32>
    %82 = vector.shape_cast %81 : vector<8xf32> to vector<8x1xf32>
    %83 = vector.broadcast %82 : vector<8x1xf32> to vector<8x8xf32>
    %84 = arith.subf %80, %83 : vector<8x8xf32>
    %85 = math.exp %84 : vector<8x8xf32>
    %cst_37 = arith.constant dense<0.000000e+00> : vector<8xf32>
    %86 = vector.multi_reduction <add>, %85, %cst_37 [1] : vector<8x8xf32> to vector<8xf32>
    %87 = vector.shape_cast %86 : vector<8xf32> to vector<8x1xf32>
    %88 = vector.broadcast %87 : vector<8x1xf32> to vector<8x8xf32>
    %89 = arith.divf %85, %88 : vector<8x8xf32>
    %90 = arith.truncf %89 : vector<8x8xf32> to vector<8x8xbf16>
    %91 = vector.extract_strided_slice %17 {offsets = [0, 64], sizes = [8, 32], strides = [1, 1]} : vector<8x128xbf16> to vector<8x32xbf16>
    %cst_38 = arith.constant dense<0.000000e+00> : vector<8x32xf32>
    %92 = tpu.matmul %90, %91, %cst_38 {dimension_numbers = #tpu.dot_dimension_numbers<[1], [0], [0], [1], [0, 0, 1, 1], [], []>} : vector<8x8xbf16>, vector<8x32xbf16>, vector<8x32xf32> -> vector<8x32xf32>
    %93 = arith.truncf %92 : vector<8x32xf32> to vector<8x32xbf16>
    %94 = vector.extract_strided_slice %26 {offsets = [64, 0], sizes = [32, 128], strides = [1, 1]} : vector<128x128xbf16> to vector<32x128xbf16>
    %cst_39 = arith.constant dense<0.000000e+00> : vector<8x128xf32>
    %95 = tpu.matmul %93, %94, %cst_39 {dimension_numbers = #tpu.dot_dimension_numbers<[1], [0], [0], [1], [0, 0, 1, 1], [], []>} : vector<8x32xbf16>, vector<32x128xbf16>, vector<8x128xf32> -> vector<8x128xf32>
    %96 = arith.addf %73, %95 : vector<8x128xf32>
    %97 = vector.extract_strided_slice %10 {offsets = [0, 96], sizes = [8, 32], strides = [1, 1]} : vector<8x128xf32> to vector<8x32xf32>
    %cst_40 = arith.constant 0.176776692 : f32
    %98 = vector.broadcast %cst_40 : f32 to vector<8x32xf32>
    %99 = arith.mulf %97, %98 : vector<8x32xf32>
    %100 = arith.truncf %99 : vector<8x32xf32> to vector<8x32xbf16>
    %101 = vector.extract_strided_slice %20 {offsets = [96, 0], sizes = [32, 8], strides = [1, 1]} : vector<128x8xbf16> to vector<32x8xbf16>
    %cst_41 = arith.constant dense<0.000000e+00> : vector<8x8xf32>
    %102 = tpu.matmul %100, %101, %cst_41 {dimension_numbers = #tpu.dot_dimension_numbers<[1], [0], [0], [1], [0, 0, 1, 1], [], []>} : vector<8x32xbf16>, vector<32x8xbf16>, vector<8x8xf32> -> vector<8x8xf32>
    %103 = arith.addf %102, %25 : vector<8x8xf32>
    %cst_42 = arith.constant dense<0xFF800000> : vector<8xf32>
    %104 = vector.multi_reduction <maximumf>, %103, %cst_42 [1] : vector<8x8xf32> to vector<8xf32>
    %105 = vector.shape_cast %104 : vector<8xf32> to vector<8x1xf32>
    %106 = vector.broadcast %105 : vector<8x1xf32> to vector<8x8xf32>
    %107 = arith.subf %103, %106 : vector<8x8xf32>
    %108 = math.exp %107 : vector<8x8xf32>
    %cst_43 = arith.constant dense<0.000000e+00> : vector<8xf32>
    %109 = vector.multi_reduction <add>, %108, %cst_43 [1] : vector<8x8xf32> to vector<8xf32>
    %110 = vector.shape_cast %109 : vector<8xf32> to vector<8x1xf32>
    %111 = vector.broadcast %110 : vector<8x1xf32> to vector<8x8xf32>
    %112 = arith.divf %108, %111 : vector<8x8xf32>
    %113 = arith.truncf %112 : vector<8x8xf32> to vector<8x8xbf16>
    %114 = vector.extract_strided_slice %17 {offsets = [0, 96], sizes = [8, 32], strides = [1, 1]} : vector<8x128xbf16> to vector<8x32xbf16>
    %cst_44 = arith.constant dense<0.000000e+00> : vector<8x32xf32>
    %115 = tpu.matmul %113, %114, %cst_44 {dimension_numbers = #tpu.dot_dimension_numbers<[1], [0], [0], [1], [0, 0, 1, 1], [], []>} : vector<8x8xbf16>, vector<8x32xbf16>, vector<8x32xf32> -> vector<8x32xf32>
    %116 = arith.truncf %115 : vector<8x32xf32> to vector<8x32xbf16>
    %117 = vector.extract_strided_slice %26 {offsets = [96, 0], sizes = [32, 128], strides = [1, 1]} : vector<128x128xbf16> to vector<32x128xbf16>
    %cst_45 = arith.constant dense<0.000000e+00> : vector<8x128xf32>
    %118 = tpu.matmul %116, %117, %cst_45 {dimension_numbers = #tpu.dot_dimension_numbers<[1], [0], [0], [1], [0, 0, 1, 1], [], []>} : vector<8x32xbf16>, vector<32x128xbf16>, vector<8x128xf32> -> vector<8x128xf32>
    %119 = arith.addf %96, %118 : vector<8x128xf32>
    %c0_46 = arith.constant 0 : index
    %c0_47 = arith.constant 0 : index
    %120 = vector.load %arg9[%c0_46, %c0_47] : memref<1x128xf32, #tpu.memory_space<vmem>>, vector<1x128xf32>
    %121 = vector.broadcast %120 : vector<1x128xf32> to vector<8x128xf32>
    %122 = arith.addf %119, %121 : vector<8x128xf32>
    %123 = arith.addf %122, %1 : vector<8x128xf32>
    %cst_48 = arith.constant dense<0.000000e+00> : vector<8xf32>
    %124 = vector.multi_reduction <add>, %123, %cst_48 [1] : vector<8x128xf32> to vector<8xf32>
    %125 = vector.shape_cast %124 : vector<8xf32> to vector<8x1xf32>
    %cst_49 = arith.constant 1.280000e+02 : f32
    %126 = vector.broadcast %cst_49 : f32 to vector<8x1xf32>
    %127 = arith.divf %125, %126 : vector<8x1xf32>
    %128 = vector.broadcast %127 : vector<8x1xf32> to vector<8x128xf32>
    %129 = arith.subf %123, %128 : vector<8x128xf32>
    %130 = arith.mulf %129, %129 : vector<8x128xf32>
    %cst_50 = arith.constant dense<0.000000e+00> : vector<8xf32>
    %131 = vector.multi_reduction <add>, %130, %cst_50 [1] : vector<8x128xf32> to vector<8xf32>
    %132 = vector.shape_cast %131 : vector<8xf32> to vector<8x1xf32>
    %cst_51 = arith.constant 1.280000e+02 : f32
    %133 = vector.broadcast %cst_51 : f32 to vector<8x1xf32>
    %134 = arith.divf %132, %133 : vector<8x1xf32>
    %cst_52 = arith.constant 9.99999974E-6 : f32
    %135 = vector.broadcast %cst_52 : f32 to vector<8x1xf32>
    %136 = arith.addf %134, %135 : vector<8x1xf32>
    %137 = math.rsqrt %136 : vector<8x1xf32>
    %138 = vector.broadcast %137 : vector<8x1xf32> to vector<8x128xf32>
    %139 = arith.mulf %129, %138 : vector<8x128xf32>
    %c0_53 = arith.constant 0 : index
    %c0_54 = arith.constant 0 : index
    %140 = vector.load %arg12[%c0_53, %c0_54] : memref<1x128xf32, #tpu.memory_space<vmem>>, vector<1x128xf32>
    %141 = vector.broadcast %140 : vector<1x128xf32> to vector<8x128xf32>
    %142 = arith.mulf %139, %141 : vector<8x128xf32>
    %c0_55 = arith.constant 0 : index
    %c0_56 = arith.constant 0 : index
    %143 = vector.load %arg13[%c0_55, %c0_56] : memref<1x128xf32, #tpu.memory_space<vmem>>, vector<1x128xf32>
    %144 = vector.broadcast %143 : vector<1x128xf32> to vector<8x128xf32>
    %145 = arith.addf %142, %144 : vector<8x128xf32>
    %c0_57 = arith.constant 0 : index
    %c0_58 = arith.constant 0 : index
    %c0_59 = arith.constant 0 : index
    %146 = vector.load %arg14[%c0_57, %c0_58, %c0_59] : memref<1x8x128xf32, #tpu.memory_space<vmem>>, vector<1x8x128xf32>
    %147 = vector.shape_cast %146 : vector<1x8x128xf32> to vector<8x128xf32>
    %148 = vector.shape_cast %145 : vector<8x128xf32> to vector<1x8x128xf32>
    tpu.vector_store %arg14[%c0_57, %c0_58, %c0_59], %148 {strides = array<i32>} : memref<1x8x128xf32, #tpu.memory_space<vmem>>, vector<1x8x128xf32>,
    return
  }
  func.func @transform_0(%arg0: i32, %arg1: i32) -> (i32, i32, i32) {
    %c0_i32 = arith.constant 0 : i32
    %c0_i32_0 = arith.constant 0 : i32
    return %arg0, %arg1, %c0_i32 : i32, i32, i32
  }
  func.func @transform_1(%arg0: i32, %arg1: i32) -> (i32, i32, i32) {
    %c0_i32 = arith.constant 0 : i32
    %c0_i32_0 = arith.constant 0 : i32
    %c0_i32_1 = arith.constant 0 : i32
    return %arg0, %c0_i32, %c0_i32_0 : i32, i32, i32
  }
  func.func @transform_2(%arg0: i32, %arg1: i32) -> (i32, i32) {
    %c0_i32 = arith.constant 0 : i32
    %c0_i32_0 = arith.constant 0 : i32
    %c0_i32_1 = arith.constant 0 : i32
    return %c0_i32, %c0_i32_0 : i32, i32
  }
  func.func @transform_3(%arg0: i32, %arg1: i32) -> (i32, i32) {
    %c0_i32 = arith.constant 0 : i32
    %c0_i32_0 = arith.constant 0 : i32
    %c0_i32_1 = arith.constant 0 : i32
    return %c0_i32, %c0_i32_0 : i32, i32
  }
  func.func @transform_4(%arg0: i32, %arg1: i32) -> (i32, i32) {
    %c0_i32 = arith.constant 0 : i32
    %c0_i32_0 = arith.constant 0 : i32
    %c0_i32_1 = arith.constant 0 : i32
    return %c0_i32, %c0_i32_0 : i32, i32
  }
  func.func @transform_5(%arg0: i32, %arg1: i32) -> (i32, i32) {
    %c0_i32 = arith.constant 0 : i32
    %c0_i32_0 = arith.constant 0 : i32
    %c0_i32_1 = arith.constant 0 : i32
    return %c0_i32, %c0_i32_0 : i32, i32
  }
  func.func @transform_6(%arg0: i32, %arg1: i32) -> (i32, i32) {
    %c0_i32 = arith.constant 0 : i32
    %c0_i32_0 = arith.constant 0 : i32
    %c0_i32_1 = arith.constant 0 : i32
    return %c0_i32, %c0_i32_0 : i32, i32
  }
  func.func @transform_7(%arg0: i32, %arg1: i32) -> (i32, i32) {
    %c0_i32 = arith.constant 0 : i32
    %c0_i32_0 = arith.constant 0 : i32
    %c0_i32_1 = arith.constant 0 : i32
    return %c0_i32, %c0_i32_0 : i32, i32
  }
  func.func @transform_8(%arg0: i32, %arg1: i32) -> (i32, i32) {
    %c0_i32 = arith.constant 0 : i32
    %c0_i32_0 = arith.constant 0 : i32
    return %arg1, %c0_i32 : i32, i32
  }
  func.func @transform_9(%arg0: i32, %arg1: i32) -> (i32, i32, i32) {
    %c0_i32 = arith.constant 0 : i32
    %c0_i32_0 = arith.constant 0 : i32
    %c0_i32_1 = arith.constant 0 : i32
    return %arg0, %c0_i32, %c0_i32_0 : i32, i32, i32
  }
  func.func @transform_10(%arg0: i32, %arg1: i32) -> (i32, i32) {
    %c0_i32 = arith.constant 0 : i32
    %c0_i32_0 = arith.constant 0 : i32
    %c0_i32_1 = arith.constant 0 : i32
    return %c0_i32, %c0_i32_0 : i32, i32
  }
  func.func @transform_11(%arg0: i32, %arg1: i32) -> (i32, i32) {
    %c0_i32 = arith.constant 0 : i32
    %c0_i32_0 = arith.constant 0 : i32
    %c0_i32_1 = arith.constant 0 : i32
    return %c0_i32, %c0_i32_0 : i32, i32
  }
  func.func @transform_12(%arg0: i32, %arg1: i32) -> (i32, i32, i32) {
    %c0_i32 = arith.constant 0 : i32
    %c0_i32_0 = arith.constant 0 : i32
    return %arg0, %arg1, %c0_i32 : i32, i32, i32
  }
}

module attributes {stable_mosaic.version = 11 : i64} {
  func.func @_ffn_ln_kernel(%arg0: i32, %arg1: memref<16x128xf32, #tpu.memory_space<vmem>>, %arg2: memref<128x256xbf16, #tpu.memory_space<vmem>>, %arg3: memref<1x256xf32, #tpu.memory_space<vmem>>, %arg4: memref<256x128xbf16, #tpu.memory_space<vmem>>, %arg5: memref<1x128xf32, #tpu.memory_space<vmem>>, %arg6: memref<1x128xf32, #tpu.memory_space<vmem>>, %arg7: memref<1x128xf32, #tpu.memory_space<vmem>>, %arg8: memref<16x128xf32, #tpu.memory_space<vmem>>) attributes {dimension_semantics = [#tpu.dimension_semantics<parallel>], iteration_bounds = array<i64: 1>, scalar_prefetch = 0 : i64, scratch_operands = 0 : i64, tpu.core_type = #tpu.core_type<tc>, window_params = [{transform_indices = @transform_0, window_bounds = array<i64: 16, 128>}, {pipeline_mode = #tpu.pipeline_mode<synchronous>, transform_indices = @transform_1, window_bounds = array<i64: 128, 256>}, {pipeline_mode = #tpu.pipeline_mode<synchronous>, transform_indices = @transform_2, window_bounds = array<i64: 1, 256>}, {pipeline_mode = #tpu.pipeline_mode<synchronous>, transform_indices = @transform_3, window_bounds = array<i64: 256, 128>}, {pipeline_mode = #tpu.pipeline_mode<synchronous>, transform_indices = @transform_4, window_bounds = array<i64: 1, 128>}, {pipeline_mode = #tpu.pipeline_mode<synchronous>, transform_indices = @transform_5, window_bounds = array<i64: 1, 128>}, {pipeline_mode = #tpu.pipeline_mode<synchronous>, transform_indices = @transform_6, window_bounds = array<i64: 1, 128>}, {transform_indices = @transform_7, window_bounds = array<i64: 16, 128>}]} {
    %c0 = arith.constant 0 : index
    %c0_0 = arith.constant 0 : index
    %0 = vector.load %arg1[%c0, %c0_0] : memref<16x128xf32, #tpu.memory_space<vmem>>, vector<16x128xf32>
    %1 = arith.truncf %0 : vector<16x128xf32> to vector<16x128xbf16>
    %c0_1 = arith.constant 0 : index
    %c0_2 = arith.constant 0 : index
    %2 = vector.load %arg2[%c0_1, %c0_2] : memref<128x256xbf16, #tpu.memory_space<vmem>>, vector<128x256xbf16>
    %cst = arith.constant dense<0.000000e+00> : vector<16x256xf32>
    %3 = tpu.matmul %1, %2, %cst {dimension_numbers = #tpu.dot_dimension_numbers<[1], [0], [0], [1], [0, 0, 1, 1], [], []>} : vector<16x128xbf16>, vector<128x256xbf16>, vector<16x256xf32> -> vector<16x256xf32>
    %c0_3 = arith.constant 0 : index
    %c0_4 = arith.constant 0 : index
    %4 = vector.load %arg3[%c0_3, %c0_4] : memref<1x256xf32, #tpu.memory_space<vmem>>, vector<1x256xf32>
    %5 = vector.broadcast %4 : vector<1x256xf32> to vector<16x256xf32>
    %6 = arith.addf %3, %5 : vector<16x256xf32>
    %cst_5 = arith.constant 0.000000e+00 : f32
    %7 = vector.broadcast %cst_5 : f32 to vector<16x256xf32>
    %8 = arith.maximumf %6, %7 : vector<16x256xf32>
    %9 = arith.truncf %8 : vector<16x256xf32> to vector<16x256xbf16>
    %c0_6 = arith.constant 0 : index
    %c0_7 = arith.constant 0 : index
    %10 = vector.load %arg4[%c0_6, %c0_7] : memref<256x128xbf16, #tpu.memory_space<vmem>>, vector<256x128xbf16>
    %cst_8 = arith.constant dense<0.000000e+00> : vector<16x128xf32>
    %11 = tpu.matmul %9, %10, %cst_8 {dimension_numbers = #tpu.dot_dimension_numbers<[1], [0], [0], [1], [0, 0, 1, 1], [], []>} : vector<16x256xbf16>, vector<256x128xbf16>, vector<16x128xf32> -> vector<16x128xf32>
    %c0_9 = arith.constant 0 : index
    %c0_10 = arith.constant 0 : index
    %12 = vector.load %arg5[%c0_9, %c0_10] : memref<1x128xf32, #tpu.memory_space<vmem>>, vector<1x128xf32>
    %13 = vector.broadcast %12 : vector<1x128xf32> to vector<16x128xf32>
    %14 = arith.addf %11, %13 : vector<16x128xf32>
    %15 = arith.addf %14, %0 : vector<16x128xf32>
    %cst_11 = arith.constant dense<0.000000e+00> : vector<16xf32>
    %16 = vector.multi_reduction <add>, %15, %cst_11 [1] : vector<16x128xf32> to vector<16xf32>
    %17 = vector.shape_cast %16 : vector<16xf32> to vector<16x1xf32>
    %cst_12 = arith.constant 1.280000e+02 : f32
    %18 = vector.broadcast %cst_12 : f32 to vector<16x1xf32>
    %19 = arith.divf %17, %18 : vector<16x1xf32>
    %20 = vector.broadcast %19 : vector<16x1xf32> to vector<16x128xf32>
    %21 = arith.subf %15, %20 : vector<16x128xf32>
    %22 = arith.mulf %21, %21 : vector<16x128xf32>
    %cst_13 = arith.constant dense<0.000000e+00> : vector<16xf32>
    %23 = vector.multi_reduction <add>, %22, %cst_13 [1] : vector<16x128xf32> to vector<16xf32>
    %24 = vector.shape_cast %23 : vector<16xf32> to vector<16x1xf32>
    %cst_14 = arith.constant 1.280000e+02 : f32
    %25 = vector.broadcast %cst_14 : f32 to vector<16x1xf32>
    %26 = arith.divf %24, %25 : vector<16x1xf32>
    %cst_15 = arith.constant 9.99999974E-6 : f32
    %27 = vector.broadcast %cst_15 : f32 to vector<16x1xf32>
    %28 = arith.addf %26, %27 : vector<16x1xf32>
    %29 = math.rsqrt %28 : vector<16x1xf32>
    %30 = vector.broadcast %29 : vector<16x1xf32> to vector<16x128xf32>
    %31 = arith.mulf %21, %30 : vector<16x128xf32>
    %c0_16 = arith.constant 0 : index
    %c0_17 = arith.constant 0 : index
    %32 = vector.load %arg6[%c0_16, %c0_17] : memref<1x128xf32, #tpu.memory_space<vmem>>, vector<1x128xf32>
    %33 = vector.broadcast %32 : vector<1x128xf32> to vector<16x128xf32>
    %34 = arith.mulf %31, %33 : vector<16x128xf32>
    %c0_18 = arith.constant 0 : index
    %c0_19 = arith.constant 0 : index
    %35 = vector.load %arg7[%c0_18, %c0_19] : memref<1x128xf32, #tpu.memory_space<vmem>>, vector<1x128xf32>
    %36 = vector.broadcast %35 : vector<1x128xf32> to vector<16x128xf32>
    %37 = arith.addf %34, %36 : vector<16x128xf32>
    %c0_20 = arith.constant 0 : index
    %c0_21 = arith.constant 0 : index
    %38 = vector.load %arg8[%c0_20, %c0_21] : memref<16x128xf32, #tpu.memory_space<vmem>>, vector<16x128xf32>
    tpu.vector_store %arg8[%c0_20, %c0_21], %37 {strides = array<i32>} : memref<16x128xf32, #tpu.memory_space<vmem>>, vector<16x128xf32>,
    return
  }
  func.func @transform_0(%arg0: i32) -> (i32, i32) {
    %c0_i32 = arith.constant 0 : i32
    %c0_i32_0 = arith.constant 0 : i32
    return %arg0, %c0_i32 : i32, i32
  }
  func.func @transform_1(%arg0: i32) -> (i32, i32) {
    %c0_i32 = arith.constant 0 : i32
    %c0_i32_0 = arith.constant 0 : i32
    %c0_i32_1 = arith.constant 0 : i32
    return %c0_i32, %c0_i32_0 : i32, i32
  }
  func.func @transform_2(%arg0: i32) -> (i32, i32) {
    %c0_i32 = arith.constant 0 : i32
    %c0_i32_0 = arith.constant 0 : i32
    %c0_i32_1 = arith.constant 0 : i32
    return %c0_i32, %c0_i32_0 : i32, i32
  }
  func.func @transform_3(%arg0: i32) -> (i32, i32) {
    %c0_i32 = arith.constant 0 : i32
    %c0_i32_0 = arith.constant 0 : i32
    %c0_i32_1 = arith.constant 0 : i32
    return %c0_i32, %c0_i32_0 : i32, i32
  }
  func.func @transform_4(%arg0: i32) -> (i32, i32) {
    %c0_i32 = arith.constant 0 : i32
    %c0_i32_0 = arith.constant 0 : i32
    %c0_i32_1 = arith.constant 0 : i32
    return %c0_i32, %c0_i32_0 : i32, i32
  }
  func.func @transform_5(%arg0: i32) -> (i32, i32) {
    %c0_i32 = arith.constant 0 : i32
    %c0_i32_0 = arith.constant 0 : i32
    %c0_i32_1 = arith.constant 0 : i32
    return %c0_i32, %c0_i32_0 : i32, i32
  }
  func.func @transform_6(%arg0: i32) -> (i32, i32) {
    %c0_i32 = arith.constant 0 : i32
    %c0_i32_0 = arith.constant 0 : i32
    %c0_i32_1 = arith.constant 0 : i32
    return %c0_i32, %c0_i32_0 : i32, i32
  }
  func.func @transform_7(%arg0: i32) -> (i32, i32) {
    %c0_i32 = arith.constant 0 : i32
    %c0_i32_0 = arith.constant 0 : i32
    return %arg0, %c0_i32 : i32, i32
  }
}

module attributes {stable_mosaic.version = 11 : i64} {
  func.func @_mha_ln_kernel(%arg0: i32, %arg1: i32, %arg2: memref<1x8x128xf32, #tpu.memory_space<vmem>>, %arg3: memref<1x10x128xf32, #tpu.memory_space<vmem>>, %arg4: memref<128x128xbf16, #tpu.memory_space<vmem>>, %arg5: memref<1x128xf32, #tpu.memory_space<vmem>>, %arg6: memref<128x256xbf16, #tpu.memory_space<vmem>>, %arg7: memref<1x256xf32, #tpu.memory_space<vmem>>, %arg8: memref<128x128xbf16, #tpu.memory_space<vmem>>, %arg9: memref<1x128xf32, #tpu.memory_space<vmem>>, %arg10: memref<8x10xf32, #tpu.memory_space<vmem>>, %arg11: memref<1x1x10xf32, #tpu.memory_space<vmem>>, %arg12: memref<1x128xf32, #tpu.memory_space<vmem>>, %arg13: memref<1x128xf32, #tpu.memory_space<vmem>>, %arg14: memref<1x8x128xf32, #tpu.memory_space<vmem>>) attributes {dimension_semantics = [#tpu.dimension_semantics<parallel>, #tpu.dimension_semantics<parallel>], iteration_bounds = array<i64: 2, 1>, scalar_prefetch = 0 : i64, scratch_operands = 0 : i64, tpu.core_type = #tpu.core_type<tc>, window_params = [{transform_indices = @transform_0, window_bounds = array<i64: 1, 8, 128>}, {transform_indices = @transform_1, window_bounds = array<i64: 1, 10, 128>}, {pipeline_mode = #tpu.pipeline_mode<synchronous>, transform_indices = @transform_2, window_bounds = array<i64: 128, 128>}, {pipeline_mode = #tpu.pipeline_mode<synchronous>, transform_indices = @transform_3, window_bounds = array<i64: 1, 128>}, {pipeline_mode = #tpu.pipeline_mode<synchronous>, transform_indices = @transform_4, window_bounds = array<i64: 128, 256>}, {pipeline_mode = #tpu.pipeline_mode<synchronous>, transform_indices = @transform_5, window_bounds = array<i64: 1, 256>}, {pipeline_mode = #tpu.pipeline_mode<synchronous>, transform_indices = @transform_6, window_bounds = array<i64: 128, 128>}, {pipeline_mode = #tpu.pipeline_mode<synchronous>, transform_indices = @transform_7, window_bounds = array<i64: 1, 128>}, {transform_indices = @transform_8, window_bounds = array<i64: 8, 10>}, {transform_indices = @transform_9, window_bounds = array<i64: 1, 1, 10>}, {pipeline_mode = #tpu.pipeline_mode<synchronous>, transform_indices = @transform_10, window_bounds = array<i64: 1, 128>}, {pipeline_mode = #tpu.pipeline_mode<synchronous>, transform_indices = @transform_11, window_bounds = array<i64: 1, 128>}, {transform_indices = @transform_12, window_bounds = array<i64: 1, 8, 128>}]} {
    %c0 = arith.constant 0 : index
    %c0_0 = arith.constant 0 : index
    %c0_1 = arith.constant 0 : index
    %0 = vector.load %arg2[%c0, %c0_0, %c0_1] : memref<1x8x128xf32, #tpu.memory_space<vmem>>, vector<1x8x128xf32>
    %1 = vector.shape_cast %0 : vector<1x8x128xf32> to vector<8x128xf32>
    %2 = arith.truncf %1 : vector<8x128xf32> to vector<8x128xbf16>
    %c0_2 = arith.constant 0 : index
    %c0_3 = arith.constant 0 : index
    %c0_4 = arith.constant 0 : index
    %3 = vector.load %arg3[%c0_2, %c0_3, %c0_4] : memref<1x10x128xf32, #tpu.memory_space<vmem>>, vector<1x10x128xf32>
    %4 = vector.shape_cast %3 : vector<1x10x128xf32> to vector<10x128xf32>
    %5 = arith.truncf %4 : vector<10x128xf32> to vector<10x128xbf16>
    %c0_5 = arith.constant 0 : index
    %c0_6 = arith.constant 0 : index
    %6 = vector.load %arg4[%c0_5, %c0_6] : memref<128x128xbf16, #tpu.memory_space<vmem>>, vector<128x128xbf16>
    %cst = arith.constant dense<0.000000e+00> : vector<8x128xf32>
    %7 = tpu.matmul %2, %6, %cst {dimension_numbers = #tpu.dot_dimension_numbers<[1], [0], [0], [1], [0, 0, 1, 1], [], []>} : vector<8x128xbf16>, vector<128x128xbf16>, vector<8x128xf32> -> vector<8x128xf32>
    %c0_7 = arith.constant 0 : index
    %c0_8 = arith.constant 0 : index
    %8 = vector.load %arg5[%c0_7, %c0_8] : memref<1x128xf32, #tpu.memory_space<vmem>>, vector<1x128xf32>
    %9 = vector.broadcast %8 : vector<1x128xf32> to vector<8x128xf32>
    %10 = arith.addf %7, %9 : vector<8x128xf32>
    %c0_9 = arith.constant 0 : index
    %c0_10 = arith.constant 0 : index
    %11 = vector.load %arg6[%c0_9, %c0_10] : memref<128x256xbf16, #tpu.memory_space<vmem>>, vector<128x256xbf16>
    %cst_11 = arith.constant dense<0.000000e+00> : vector<10x256xf32>
    %12 = tpu.matmul %5, %11, %cst_11 {dimension_numbers = #tpu.dot_dimension_numbers<[1], [0], [0], [1], [0, 0, 1, 1], [], []>} : vector<10x128xbf16>, vector<128x256xbf16>, vector<10x256xf32> -> vector<10x256xf32>
    %c0_12 = arith.constant 0 : index
    %c0_13 = arith.constant 0 : index
    %13 = vector.load %arg7[%c0_12, %c0_13] : memref<1x256xf32, #tpu.memory_space<vmem>>, vector<1x256xf32>
    %14 = vector.broadcast %13 : vector<1x256xf32> to vector<10x256xf32>
    %15 = arith.addf %12, %14 : vector<10x256xf32>
    %16 = vector.extract_strided_slice %15 {offsets = [0, 128], sizes = [10, 128], strides = [1, 1]} : vector<10x256xf32> to vector<10x128xf32>
    %17 = arith.truncf %16 : vector<10x128xf32> to vector<10x128xbf16>
    %18 = vector.extract_strided_slice %15 {offsets = [0, 0], sizes = [10, 128], strides = [1, 1]} : vector<10x256xf32> to vector<10x128xf32>
    %19 = tpu.transpose %18, [1, 0] : vector<10x128xf32> -> vector<128x10xf32>
    %20 = arith.truncf %19 : vector<128x10xf32> to vector<128x10xbf16>
    %c0_14 = arith.constant 0 : index
    %c0_15 = arith.constant 0 : index
    %21 = vector.load %arg10[%c0_14, %c0_15] : memref<8x10xf32, #tpu.memory_space<vmem>>, vector<8x10xf32>
    %c0_16 = arith.constant 0 : index
    %c0_17 = arith.constant 0 : index
    %c0_18 = arith.constant 0 : index
    %22 = vector.load %arg11[%c0_16, %c0_17, %c0_18] : memref<1x1x10xf32, #tpu.memory_space<vmem>>, vector<1x1x10xf32>
    %23 = vector.shape_cast %22 : vector<1x1x10xf32> to vector<1x10xf32>
    %24 = vector.broadcast %23 : vector<1x10xf32> to vector<8x10xf32>
    %25 = arith.addf %21, %24 : vector<8x10xf32>
    %c0_19 = arith.constant 0 : index
    %c0_20 = arith.constant 0 : index
    %26 = vector.load %arg8[%c0_19, %c0_20] : memref<128x128xbf16, #tpu.memory_space<vmem>>, vector<128x128xbf16>
    %cst_21 = arith.constant 0.000000e+00 : f32
    %27 = vector.broadcast %cst_21 : f32 to vector<8x128xf32>
    %28 = vector.extract_strided_slice %10 {offsets = [0, 0], sizes = [8, 32], strides = [1, 1]} : vector<8x128xf32> to vector<8x32xf32>
    %cst_22 = arith.constant 0.176776692 : f32
    %29 = vector.broadcast %cst_22 : f32 to vector<8x32xf32>
    %30 = arith.mulf %28, %29 : vector<8x32xf32>
    %31 = arith.truncf %30 : vector<8x32xf32> to vector<8x32xbf16>
    %32 = vector.extract_strided_slice %20 {offsets = [0, 0], sizes = [32, 10], strides = [1, 1]} : vector<128x10xbf16> to vector<32x10xbf16>
    %cst_23 = arith.constant dense<0.000000e+00> : vector<8x10xf32>
    %33 = tpu.matmul %31, %32, %cst_23 {dimension_numbers = #tpu.dot_dimension_numbers<[1], [0], [0], [1], [0, 0, 1, 1], [], []>} : vector<8x32xbf16>, vector<32x10xbf16>, vector<8x10xf32> -> vector<8x10xf32>
    %34 = arith.addf %33, %25 : vector<8x10xf32>
    %cst_24 = arith.constant dense<0xFF800000> : vector<8xf32>
    %35 = vector.multi_reduction <maximumf>, %34, %cst_24 [1] : vector<8x10xf32> to vector<8xf32>
    %36 = vector.shape_cast %35 : vector<8xf32> to vector<8x1xf32>
    %37 = vector.broadcast %36 : vector<8x1xf32> to vector<8x10xf32>
    %38 = arith.subf %34, %37 : vector<8x10xf32>
    %39 = math.exp %38 : vector<8x10xf32>
    %cst_25 = arith.constant dense<0.000000e+00> : vector<8xf32>
    %40 = vector.multi_reduction <add>, %39, %cst_25 [1] : vector<8x10xf32> to vector<8xf32>
    %41 = vector.shape_cast %40 : vector<8xf32> to vector<8x1xf32>
    %42 = vector.broadcast %41 : vector<8x1xf32> to vector<8x10xf32>
    %43 = arith.divf %39, %42 : vector<8x10xf32>
    %44 = arith.truncf %43 : vector<8x10xf32> to vector<8x10xbf16>
    %45 = vector.extract_strided_slice %17 {offsets = [0, 0], sizes = [10, 32], strides = [1, 1]} : vector<10x128xbf16> to vector<10x32xbf16>
    %cst_26 = arith.constant dense<0.000000e+00> : vector<8x32xf32>
    %46 = tpu.matmul %44, %45, %cst_26 {dimension_numbers = #tpu.dot_dimension_numbers<[1], [0], [0], [1], [0, 0, 1, 1], [], []>} : vector<8x10xbf16>, vector<10x32xbf16>, vector<8x32xf32> -> vector<8x32xf32>
    %47 = arith.truncf %46 : vector<8x32xf32> to vector<8x32xbf16>
    %48 = vector.extract_strided_slice %26 {offsets = [0, 0], sizes = [32, 128], strides = [1, 1]} : vector<128x128xbf16> to vector<32x128xbf16>
    %cst_27 = arith.constant dense<0.000000e+00> : vector<8x128xf32>
    %49 = tpu.matmul %47, %48, %cst_27 {dimension_numbers = #tpu.dot_dimension_numbers<[1], [0], [0], [1], [0, 0, 1, 1], [], []>} : vector<8x32xbf16>, vector<32x128xbf16>, vector<8x128xf32> -> vector<8x128xf32>
    %50 = arith.addf %27, %49 : vector<8x128xf32>
    %51 = vector.extract_strided_slice %10 {offsets = [0, 32], sizes = [8, 32], strides = [1, 1]} : vector<8x128xf32> to vector<8x32xf32>
    %cst_28 = arith.constant 0.176776692 : f32
    %52 = vector.broadcast %cst_28 : f32 to vector<8x32xf32>
    %53 = arith.mulf %51, %52 : vector<8x32xf32>
    %54 = arith.truncf %53 : vector<8x32xf32> to vector<8x32xbf16>
    %55 = vector.extract_strided_slice %20 {offsets = [32, 0], sizes = [32, 10], strides = [1, 1]} : vector<128x10xbf16> to vector<32x10xbf16>
    %cst_29 = arith.constant dense<0.000000e+00> : vector<8x10xf32>
    %56 = tpu.matmul %54, %55, %cst_29 {dimension_numbers = #tpu.dot_dimension_numbers<[1], [0], [0], [1], [0, 0, 1, 1], [], []>} : vector<8x32xbf16>, vector<32x10xbf16>, vector<8x10xf32> -> vector<8x10xf32>
    %57 = arith.addf %56, %25 : vector<8x10xf32>
    %cst_30 = arith.constant dense<0xFF800000> : vector<8xf32>
    %58 = vector.multi_reduction <maximumf>, %57, %cst_30 [1] : vector<8x10xf32> to vector<8xf32>
    %59 = vector.shape_cast %58 : vector<8xf32> to vector<8x1xf32>
    %60 = vector.broadcast %59 : vector<8x1xf32> to vector<8x10xf32>
    %61 = arith.subf %57, %60 : vector<8x10xf32>
    %62 = math.exp %61 : vector<8x10xf32>
    %cst_31 = arith.constant dense<0.000000e+00> : vector<8xf32>
    %63 = vector.multi_reduction <add>, %62, %cst_31 [1] : vector<8x10xf32> to vector<8xf32>
    %64 = vector.shape_cast %63 : vector<8xf32> to vector<8x1xf32>
    %65 = vector.broadcast %64 : vector<8x1xf32> to vector<8x10xf32>
    %66 = arith.divf %62, %65 : vector<8x10xf32>
    %67 = arith.truncf %66 : vector<8x10xf32> to vector<8x10xbf16>
    %68 = vector.extract_strided_slice %17 {offsets = [0, 32], sizes = [10, 32], strides = [1, 1]} : vector<10x128xbf16> to vector<10x32xbf16>
    %cst_32 = arith.constant dense<0.000000e+00> : vector<8x32xf32>
    %69 = tpu.matmul %67, %68, %cst_32 {dimension_numbers = #tpu.dot_dimension_numbers<[1], [0], [0], [1], [0, 0, 1, 1], [], []>} : vector<8x10xbf16>, vector<10x32xbf16>, vector<8x32xf32> -> vector<8x32xf32>
    %70 = arith.truncf %69 : vector<8x32xf32> to vector<8x32xbf16>
    %71 = vector.extract_strided_slice %26 {offsets = [32, 0], sizes = [32, 128], strides = [1, 1]} : vector<128x128xbf16> to vector<32x128xbf16>
    %cst_33 = arith.constant dense<0.000000e+00> : vector<8x128xf32>
    %72 = tpu.matmul %70, %71, %cst_33 {dimension_numbers = #tpu.dot_dimension_numbers<[1], [0], [0], [1], [0, 0, 1, 1], [], []>} : vector<8x32xbf16>, vector<32x128xbf16>, vector<8x128xf32> -> vector<8x128xf32>
    %73 = arith.addf %50, %72 : vector<8x128xf32>
    %74 = vector.extract_strided_slice %10 {offsets = [0, 64], sizes = [8, 32], strides = [1, 1]} : vector<8x128xf32> to vector<8x32xf32>
    %cst_34 = arith.constant 0.176776692 : f32
    %75 = vector.broadcast %cst_34 : f32 to vector<8x32xf32>
    %76 = arith.mulf %74, %75 : vector<8x32xf32>
    %77 = arith.truncf %76 : vector<8x32xf32> to vector<8x32xbf16>
    %78 = vector.extract_strided_slice %20 {offsets = [64, 0], sizes = [32, 10], strides = [1, 1]} : vector<128x10xbf16> to vector<32x10xbf16>
    %cst_35 = arith.constant dense<0.000000e+00> : vector<8x10xf32>
    %79 = tpu.matmul %77, %78, %cst_35 {dimension_numbers = #tpu.dot_dimension_numbers<[1], [0], [0], [1], [0, 0, 1, 1], [], []>} : vector<8x32xbf16>, vector<32x10xbf16>, vector<8x10xf32> -> vector<8x10xf32>
    %80 = arith.addf %79, %25 : vector<8x10xf32>
    %cst_36 = arith.constant dense<0xFF800000> : vector<8xf32>
    %81 = vector.multi_reduction <maximumf>, %80, %cst_36 [1] : vector<8x10xf32> to vector<8xf32>
    %82 = vector.shape_cast %81 : vector<8xf32> to vector<8x1xf32>
    %83 = vector.broadcast %82 : vector<8x1xf32> to vector<8x10xf32>
    %84 = arith.subf %80, %83 : vector<8x10xf32>
    %85 = math.exp %84 : vector<8x10xf32>
    %cst_37 = arith.constant dense<0.000000e+00> : vector<8xf32>
    %86 = vector.multi_reduction <add>, %85, %cst_37 [1] : vector<8x10xf32> to vector<8xf32>
    %87 = vector.shape_cast %86 : vector<8xf32> to vector<8x1xf32>
    %88 = vector.broadcast %87 : vector<8x1xf32> to vector<8x10xf32>
    %89 = arith.divf %85, %88 : vector<8x10xf32>
    %90 = arith.truncf %89 : vector<8x10xf32> to vector<8x10xbf16>
    %91 = vector.extract_strided_slice %17 {offsets = [0, 64], sizes = [10, 32], strides = [1, 1]} : vector<10x128xbf16> to vector<10x32xbf16>
    %cst_38 = arith.constant dense<0.000000e+00> : vector<8x32xf32>
    %92 = tpu.matmul %90, %91, %cst_38 {dimension_numbers = #tpu.dot_dimension_numbers<[1], [0], [0], [1], [0, 0, 1, 1], [], []>} : vector<8x10xbf16>, vector<10x32xbf16>, vector<8x32xf32> -> vector<8x32xf32>
    %93 = arith.truncf %92 : vector<8x32xf32> to vector<8x32xbf16>
    %94 = vector.extract_strided_slice %26 {offsets = [64, 0], sizes = [32, 128], strides = [1, 1]} : vector<128x128xbf16> to vector<32x128xbf16>
    %cst_39 = arith.constant dense<0.000000e+00> : vector<8x128xf32>
    %95 = tpu.matmul %93, %94, %cst_39 {dimension_numbers = #tpu.dot_dimension_numbers<[1], [0], [0], [1], [0, 0, 1, 1], [], []>} : vector<8x32xbf16>, vector<32x128xbf16>, vector<8x128xf32> -> vector<8x128xf32>
    %96 = arith.addf %73, %95 : vector<8x128xf32>
    %97 = vector.extract_strided_slice %10 {offsets = [0, 96], sizes = [8, 32], strides = [1, 1]} : vector<8x128xf32> to vector<8x32xf32>
    %cst_40 = arith.constant 0.176776692 : f32
    %98 = vector.broadcast %cst_40 : f32 to vector<8x32xf32>
    %99 = arith.mulf %97, %98 : vector<8x32xf32>
    %100 = arith.truncf %99 : vector<8x32xf32> to vector<8x32xbf16>
    %101 = vector.extract_strided_slice %20 {offsets = [96, 0], sizes = [32, 10], strides = [1, 1]} : vector<128x10xbf16> to vector<32x10xbf16>
    %cst_41 = arith.constant dense<0.000000e+00> : vector<8x10xf32>
    %102 = tpu.matmul %100, %101, %cst_41 {dimension_numbers = #tpu.dot_dimension_numbers<[1], [0], [0], [1], [0, 0, 1, 1], [], []>} : vector<8x32xbf16>, vector<32x10xbf16>, vector<8x10xf32> -> vector<8x10xf32>
    %103 = arith.addf %102, %25 : vector<8x10xf32>
    %cst_42 = arith.constant dense<0xFF800000> : vector<8xf32>
    %104 = vector.multi_reduction <maximumf>, %103, %cst_42 [1] : vector<8x10xf32> to vector<8xf32>
    %105 = vector.shape_cast %104 : vector<8xf32> to vector<8x1xf32>
    %106 = vector.broadcast %105 : vector<8x1xf32> to vector<8x10xf32>
    %107 = arith.subf %103, %106 : vector<8x10xf32>
    %108 = math.exp %107 : vector<8x10xf32>
    %cst_43 = arith.constant dense<0.000000e+00> : vector<8xf32>
    %109 = vector.multi_reduction <add>, %108, %cst_43 [1] : vector<8x10xf32> to vector<8xf32>
    %110 = vector.shape_cast %109 : vector<8xf32> to vector<8x1xf32>
    %111 = vector.broadcast %110 : vector<8x1xf32> to vector<8x10xf32>
    %112 = arith.divf %108, %111 : vector<8x10xf32>
    %113 = arith.truncf %112 : vector<8x10xf32> to vector<8x10xbf16>
    %114 = vector.extract_strided_slice %17 {offsets = [0, 96], sizes = [10, 32], strides = [1, 1]} : vector<10x128xbf16> to vector<10x32xbf16>
    %cst_44 = arith.constant dense<0.000000e+00> : vector<8x32xf32>
    %115 = tpu.matmul %113, %114, %cst_44 {dimension_numbers = #tpu.dot_dimension_numbers<[1], [0], [0], [1], [0, 0, 1, 1], [], []>} : vector<8x10xbf16>, vector<10x32xbf16>, vector<8x32xf32> -> vector<8x32xf32>
    %116 = arith.truncf %115 : vector<8x32xf32> to vector<8x32xbf16>
    %117 = vector.extract_strided_slice %26 {offsets = [96, 0], sizes = [32, 128], strides = [1, 1]} : vector<128x128xbf16> to vector<32x128xbf16>
    %cst_45 = arith.constant dense<0.000000e+00> : vector<8x128xf32>
    %118 = tpu.matmul %116, %117, %cst_45 {dimension_numbers = #tpu.dot_dimension_numbers<[1], [0], [0], [1], [0, 0, 1, 1], [], []>} : vector<8x32xbf16>, vector<32x128xbf16>, vector<8x128xf32> -> vector<8x128xf32>
    %119 = arith.addf %96, %118 : vector<8x128xf32>
    %c0_46 = arith.constant 0 : index
    %c0_47 = arith.constant 0 : index
    %120 = vector.load %arg9[%c0_46, %c0_47] : memref<1x128xf32, #tpu.memory_space<vmem>>, vector<1x128xf32>
    %121 = vector.broadcast %120 : vector<1x128xf32> to vector<8x128xf32>
    %122 = arith.addf %119, %121 : vector<8x128xf32>
    %123 = arith.addf %122, %1 : vector<8x128xf32>
    %cst_48 = arith.constant dense<0.000000e+00> : vector<8xf32>
    %124 = vector.multi_reduction <add>, %123, %cst_48 [1] : vector<8x128xf32> to vector<8xf32>
    %125 = vector.shape_cast %124 : vector<8xf32> to vector<8x1xf32>
    %cst_49 = arith.constant 1.280000e+02 : f32
    %126 = vector.broadcast %cst_49 : f32 to vector<8x1xf32>
    %127 = arith.divf %125, %126 : vector<8x1xf32>
    %128 = vector.broadcast %127 : vector<8x1xf32> to vector<8x128xf32>
    %129 = arith.subf %123, %128 : vector<8x128xf32>
    %130 = arith.mulf %129, %129 : vector<8x128xf32>
    %cst_50 = arith.constant dense<0.000000e+00> : vector<8xf32>
    %131 = vector.multi_reduction <add>, %130, %cst_50 [1] : vector<8x128xf32> to vector<8xf32>
    %132 = vector.shape_cast %131 : vector<8xf32> to vector<8x1xf32>
    %cst_51 = arith.constant 1.280000e+02 : f32
    %133 = vector.broadcast %cst_51 : f32 to vector<8x1xf32>
    %134 = arith.divf %132, %133 : vector<8x1xf32>
    %cst_52 = arith.constant 9.99999974E-6 : f32
    %135 = vector.broadcast %cst_52 : f32 to vector<8x1xf32>
    %136 = arith.addf %134, %135 : vector<8x1xf32>
    %137 = math.rsqrt %136 : vector<8x1xf32>
    %138 = vector.broadcast %137 : vector<8x1xf32> to vector<8x128xf32>
    %139 = arith.mulf %129, %138 : vector<8x128xf32>
    %c0_53 = arith.constant 0 : index
    %c0_54 = arith.constant 0 : index
    %140 = vector.load %arg12[%c0_53, %c0_54] : memref<1x128xf32, #tpu.memory_space<vmem>>, vector<1x128xf32>
    %141 = vector.broadcast %140 : vector<1x128xf32> to vector<8x128xf32>
    %142 = arith.mulf %139, %141 : vector<8x128xf32>
    %c0_55 = arith.constant 0 : index
    %c0_56 = arith.constant 0 : index
    %143 = vector.load %arg13[%c0_55, %c0_56] : memref<1x128xf32, #tpu.memory_space<vmem>>, vector<1x128xf32>
    %144 = vector.broadcast %143 : vector<1x128xf32> to vector<8x128xf32>
    %145 = arith.addf %142, %144 : vector<8x128xf32>
    %c0_57 = arith.constant 0 : index
    %c0_58 = arith.constant 0 : index
    %c0_59 = arith.constant 0 : index
    %146 = vector.load %arg14[%c0_57, %c0_58, %c0_59] : memref<1x8x128xf32, #tpu.memory_space<vmem>>, vector<1x8x128xf32>
    %147 = vector.shape_cast %146 : vector<1x8x128xf32> to vector<8x128xf32>
    %148 = vector.shape_cast %145 : vector<8x128xf32> to vector<1x8x128xf32>
    tpu.vector_store %arg14[%c0_57, %c0_58, %c0_59], %148 {strides = array<i32>} : memref<1x8x128xf32, #tpu.memory_space<vmem>>, vector<1x8x128xf32>,
    return
  }
  func.func @transform_0(%arg0: i32, %arg1: i32) -> (i32, i32, i32) {
    %c0_i32 = arith.constant 0 : i32
    %c0_i32_0 = arith.constant 0 : i32
    return %arg0, %arg1, %c0_i32 : i32, i32, i32
  }
  func.func @transform_1(%arg0: i32, %arg1: i32) -> (i32, i32, i32) {
    %c0_i32 = arith.constant 0 : i32
    %c0_i32_0 = arith.constant 0 : i32
    %c0_i32_1 = arith.constant 0 : i32
    return %arg0, %c0_i32, %c0_i32_0 : i32, i32, i32
  }
  func.func @transform_2(%arg0: i32, %arg1: i32) -> (i32, i32) {
    %c0_i32 = arith.constant 0 : i32
    %c0_i32_0 = arith.constant 0 : i32
    %c0_i32_1 = arith.constant 0 : i32
    return %c0_i32, %c0_i32_0 : i32, i32
  }
  func.func @transform_3(%arg0: i32, %arg1: i32) -> (i32, i32) {
    %c0_i32 = arith.constant 0 : i32
    %c0_i32_0 = arith.constant 0 : i32
    %c0_i32_1 = arith.constant 0 : i32
    return %c0_i32, %c0_i32_0 : i32, i32
  }
  func.func @transform_4(%arg0: i32, %arg1: i32) -> (i32, i32) {
    %c0_i32 = arith.constant 0 : i32
    %c0_i32_0 = arith.constant 0 : i32
    %c0_i32_1 = arith.constant 0 : i32
    return %c0_i32, %c0_i32_0 : i32, i32
  }
  func.func @transform_5(%arg0: i32, %arg1: i32) -> (i32, i32) {
    %c0_i32 = arith.constant 0 : i32
    %c0_i32_0 = arith.constant 0 : i32
    %c0_i32_1 = arith.constant 0 : i32
    return %c0_i32, %c0_i32_0 : i32, i32
  }
  func.func @transform_6(%arg0: i32, %arg1: i32) -> (i32, i32) {
    %c0_i32 = arith.constant 0 : i32
    %c0_i32_0 = arith.constant 0 : i32
    %c0_i32_1 = arith.constant 0 : i32
    return %c0_i32, %c0_i32_0 : i32, i32
  }
  func.func @transform_7(%arg0: i32, %arg1: i32) -> (i32, i32) {
    %c0_i32 = arith.constant 0 : i32
    %c0_i32_0 = arith.constant 0 : i32
    %c0_i32_1 = arith.constant 0 : i32
    return %c0_i32, %c0_i32_0 : i32, i32
  }
  func.func @transform_8(%arg0: i32, %arg1: i32) -> (i32, i32) {
    %c0_i32 = arith.constant 0 : i32
    %c0_i32_0 = arith.constant 0 : i32
    return %arg1, %c0_i32 : i32, i32
  }
  func.func @transform_9(%arg0: i32, %arg1: i32) -> (i32, i32, i32) {
    %c0_i32 = arith.constant 0 : i32
    %c0_i32_0 = arith.constant 0 : i32
    %c0_i32_1 = arith.constant 0 : i32
    return %arg0, %c0_i32, %c0_i32_0 : i32, i32, i32
  }
  func.func @transform_10(%arg0: i32, %arg1: i32) -> (i32, i32) {
    %c0_i32 = arith.constant 0 : i32
    %c0_i32_0 = arith.constant 0 : i32
    %c0_i32_1 = arith.constant 0 : i32
    return %c0_i32, %c0_i32_0 : i32, i32
  }
  func.func @transform_11(%arg0: i32, %arg1: i32) -> (i32, i32) {
    %c0_i32 = arith.constant 0 : i32
    %c0_i32_0 = arith.constant 0 : i32
    %c0_i32_1 = arith.constant 0 : i32
    return %c0_i32, %c0_i32_0 : i32, i32
  }
  func.func @transform_12(%arg0: i32, %arg1: i32) -> (i32, i32, i32) {
    %c0_i32 = arith.constant 0 : i32
    %c0_i32_0 = arith.constant 0 : i32
    return %arg0, %arg1, %c0_i32 : i32, i32, i32
  }
}

module attributes {stable_mosaic.version = 11 : i64} {
  func.func @_layernorm_kernel(%arg0: i32, %arg1: memref<16x128xf32, #tpu.memory_space<vmem>>, %arg2: memref<1x128xf32, #tpu.memory_space<vmem>>, %arg3: memref<1x128xf32, #tpu.memory_space<vmem>>, %arg4: memref<16x128xf32, #tpu.memory_space<vmem>>) attributes {dimension_semantics = [#tpu.dimension_semantics<parallel>], iteration_bounds = array<i64: 1>, scalar_prefetch = 0 : i64, scratch_operands = 0 : i64, tpu.core_type = #tpu.core_type<tc>, window_params = [{transform_indices = @transform_0, window_bounds = array<i64: 16, 128>}, {pipeline_mode = #tpu.pipeline_mode<synchronous>, transform_indices = @transform_1, window_bounds = array<i64: 1, 128>}, {pipeline_mode = #tpu.pipeline_mode<synchronous>, transform_indices = @transform_2, window_bounds = array<i64: 1, 128>}, {transform_indices = @transform_3, window_bounds = array<i64: 16, 128>}]} {
    %c0 = arith.constant 0 : index
    %c0_0 = arith.constant 0 : index
    %0 = vector.load %arg1[%c0, %c0_0] : memref<16x128xf32, #tpu.memory_space<vmem>>, vector<16x128xf32>
    %cst = arith.constant dense<0.000000e+00> : vector<16xf32>
    %1 = vector.multi_reduction <add>, %0, %cst [1] : vector<16x128xf32> to vector<16xf32>
    %2 = vector.shape_cast %1 : vector<16xf32> to vector<16x1xf32>
    %cst_1 = arith.constant 1.280000e+02 : f32
    %3 = vector.broadcast %cst_1 : f32 to vector<16x1xf32>
    %4 = arith.divf %2, %3 : vector<16x1xf32>
    %5 = vector.broadcast %4 : vector<16x1xf32> to vector<16x128xf32>
    %6 = arith.subf %0, %5 : vector<16x128xf32>
    %7 = arith.mulf %6, %6 : vector<16x128xf32>
    %cst_2 = arith.constant dense<0.000000e+00> : vector<16xf32>
    %8 = vector.multi_reduction <add>, %7, %cst_2 [1] : vector<16x128xf32> to vector<16xf32>
    %9 = vector.shape_cast %8 : vector<16xf32> to vector<16x1xf32>
    %cst_3 = arith.constant 1.280000e+02 : f32
    %10 = vector.broadcast %cst_3 : f32 to vector<16x1xf32>
    %11 = arith.divf %9, %10 : vector<16x1xf32>
    %cst_4 = arith.constant 9.99999974E-6 : f32
    %12 = vector.broadcast %cst_4 : f32 to vector<16x1xf32>
    %13 = arith.addf %11, %12 : vector<16x1xf32>
    %14 = math.rsqrt %13 : vector<16x1xf32>
    %15 = vector.broadcast %14 : vector<16x1xf32> to vector<16x128xf32>
    %16 = arith.mulf %6, %15 : vector<16x128xf32>
    %c0_5 = arith.constant 0 : index
    %c0_6 = arith.constant 0 : index
    %17 = vector.load %arg2[%c0_5, %c0_6] : memref<1x128xf32, #tpu.memory_space<vmem>>, vector<1x128xf32>
    %18 = vector.broadcast %17 : vector<1x128xf32> to vector<16x128xf32>
    %19 = arith.mulf %16, %18 : vector<16x128xf32>
    %c0_7 = arith.constant 0 : index
    %c0_8 = arith.constant 0 : index
    %20 = vector.load %arg3[%c0_7, %c0_8] : memref<1x128xf32, #tpu.memory_space<vmem>>, vector<1x128xf32>
    %21 = vector.broadcast %20 : vector<1x128xf32> to vector<16x128xf32>
    %22 = arith.addf %19, %21 : vector<16x128xf32>
    %c0_9 = arith.constant 0 : index
    %c0_10 = arith.constant 0 : index
    %23 = vector.load %arg4[%c0_9, %c0_10] : memref<16x128xf32, #tpu.memory_space<vmem>>, vector<16x128xf32>
    tpu.vector_store %arg4[%c0_9, %c0_10], %22 {strides = array<i32>} : memref<16x128xf32, #tpu.memory_space<vmem>>, vector<16x128xf32>,
    return
  }
  func.func @transform_0(%arg0: i32) -> (i32, i32) {
    %c0_i32 = arith.constant 0 : i32
    %c0_i32_0 = arith.constant 0 : i32
    return %arg0, %c0_i32 : i32, i32
  }
  func.func @transform_1(%arg0: i32) -> (i32, i32) {
    %c0_i32 = arith.constant 0 : i32
    %c0_i32_0 = arith.constant 0 : i32
    %c0_i32_1 = arith.constant 0 : i32
    return %c0_i32, %c0_i32_0 : i32, i32
  }
  func.func @transform_2(%arg0: i32) -> (i32, i32) {
    %c0_i32 = arith.constant 0 : i32
    %c0_i32_0 = arith.constant 0 : i32
    %c0_i32_1 = arith.constant 0 : i32
    return %c0_i32, %c0_i32_0 : i32, i32
  }
  func.func @transform_3(%arg0: i32) -> (i32, i32) {
    %c0_i32 = arith.constant 0 : i32
    %c0_i32_0 = arith.constant 0 : i32
    return %arg0, %c0_i32 : i32, i32
  }
}

module attributes {stable_mosaic.version = 11 : i64} {
  func.func @_linear_kernel(%arg0: i32, %arg1: i32, %arg2: i32, %arg3: memref<16x128xf32, #tpu.memory_space<vmem>>, %arg4: memref<128x256xbf16, #tpu.memory_space<vmem>>, %arg5: memref<1x256xf32, #tpu.memory_space<vmem>>, %arg6: memref<16x256xf32, #tpu.memory_space<vmem>>, %arg7: memref<16x256xf32, #tpu.memory_space<vmem>>) attributes {dimension_semantics = [#tpu.dimension_semantics<parallel>, #tpu.dimension_semantics<parallel>, #tpu.dimension_semantics<arbitrary>], iteration_bounds = array<i64: 1, 1, 1>, scalar_prefetch = 0 : i64, scratch_operands = 1 : i64, tpu.core_type = #tpu.core_type<tc>, window_params = [{transform_indices = @transform_0, window_bounds = array<i64: 16, 128>}, {transform_indices = @transform_1, window_bounds = array<i64: 128, 256>}, {transform_indices = @transform_2, window_bounds = array<i64: 1, 256>}, {transform_indices = @transform_3, window_bounds = array<i64: 16, 256>}]} {
    %c0_i32 = arith.constant 0 : i32
    %0 = arith.cmpi eq, %arg2, %c0_i32 : i32
    %1 = arith.extui %0 : i1 to i32
    %c0_i32_0 = arith.constant 0 : i32
    %2 = arith.cmpi ne, %1, %c0_i32_0 : i32
    scf.if %2 {
      %cst_10 = arith.constant 0.000000e+00 : f32
      %13 = vector.broadcast %cst_10 : f32 to vector<16x256xf32>
      %c0_11 = arith.constant 0 : index
      %c0_12 = arith.constant 0 : index
      %14 = vector.load %arg7[%c0_11, %c0_12] : memref<16x256xf32, #tpu.memory_space<vmem>>, vector<16x256xf32>
      tpu.vector_store %arg7[%c0_11, %c0_12], %13 {strides = array<i32>} : memref<16x256xf32, #tpu.memory_space<vmem>>, vector<16x256xf32>,
    } else {
    }
    %c0 = arith.constant 0 : index
    %c0_1 = arith.constant 0 : index
    %3 = vector.load %arg7[%c0, %c0_1] : memref<16x256xf32, #tpu.memory_space<vmem>>, vector<16x256xf32>
    %c0_2 = arith.constant 0 : index
    %c0_3 = arith.constant 0 : index
    %4 = vector.load %arg3[%c0_2, %c0_3] : memref<16x128xf32, #tpu.memory_space<vmem>>, vector<16x128xf32>
    %5 = arith.truncf %4 : vector<16x128xf32> to vector<16x128xbf16>
    %c0_4 = arith.constant 0 : index
    %c0_5 = arith.constant 0 : index
    %6 = vector.load %arg4[%c0_4, %c0_5] : memref<128x256xbf16, #tpu.memory_space<vmem>>, vector<128x256xbf16>
    %cst = arith.constant dense<0.000000e+00> : vector<16x256xf32>
    %7 = tpu.matmul %5, %6, %cst {dimension_numbers = #tpu.dot_dimension_numbers<[1], [0], [0], [1], [0, 0, 1, 1], [], []>} : vector<16x128xbf16>, vector<128x256xbf16>, vector<16x256xf32> -> vector<16x256xf32>
    %8 = arith.addf %3, %7 : vector<16x256xf32>
    %c0_6 = arith.constant 0 : index
    %c0_7 = arith.constant 0 : index
    %9 = vector.load %arg7[%c0_6, %c0_7] : memref<16x256xf32, #tpu.memory_space<vmem>>, vector<16x256xf32>
    tpu.vector_store %arg7[%c0_6, %c0_7], %8 {strides = array<i32>} : memref<16x256xf32, #tpu.memory_space<vmem>>, vector<16x256xf32>,
    %c0_i32_8 = arith.constant 0 : i32
    %10 = arith.cmpi eq, %arg2, %c0_i32_8 : i32
    %11 = arith.extui %10 : i1 to i32
    %c0_i32_9 = arith.constant 0 : i32
    %12 = arith.cmpi ne, %11, %c0_i32_9 : i32
    scf.if %12 {
      %c0_10 = arith.constant 0 : index
      %c0_11 = arith.constant 0 : index
      %13 = vector.load %arg7[%c0_10, %c0_11] : memref<16x256xf32, #tpu.memory_space<vmem>>, vector<16x256xf32>
      %c0_12 = arith.constant 0 : index
      %c0_13 = arith.constant 0 : index
      %14 = vector.load %arg5[%c0_12, %c0_13] : memref<1x256xf32, #tpu.memory_space<vmem>>, vector<1x256xf32>
      %15 = vector.broadcast %14 : vector<1x256xf32> to vector<16x256xf32>
      %16 = arith.addf %13, %15 : vector<16x256xf32>
      %c0_14 = arith.constant 0 : index
      %c0_15 = arith.constant 0 : index
      %17 = vector.load %arg6[%c0_14, %c0_15] : memref<16x256xf32, #tpu.memory_space<vmem>>, vector<16x256xf32>
      tpu.vector_store %arg6[%c0_14, %c0_15], %16 {strides = array<i32>} : memref<16x256xf32, #tpu.memory_space<vmem>>, vector<16x256xf32>,
    } else {
    }
    return
  }
  func.func @transform_0(%arg0: i32, %arg1: i32, %arg2: i32) -> (i32, i32) {
    %c0_i32 = arith.constant 0 : i32
    return %arg0, %arg2 : i32, i32
  }
  func.func @transform_1(%arg0: i32, %arg1: i32, %arg2: i32) -> (i32, i32) {
    %c0_i32 = arith.constant 0 : i32
    return %arg2, %arg1 : i32, i32
  }
  func.func @transform_2(%arg0: i32, %arg1: i32, %arg2: i32) -> (i32, i32) {
    %c0_i32 = arith.constant 0 : i32
    %c0_i32_0 = arith.constant 0 : i32
    return %c0_i32, %arg1 : i32, i32
  }
  func.func @transform_3(%arg0: i32, %arg1: i32, %arg2: i32) -> (i32, i32) {
    %c0_i32 = arith.constant 0 : i32
    return %arg0, %arg1 : i32, i32
  }
}

</mosaic_0001>

<bundles_post_ra>
// kernel: seq2seq_forward.15
= control target key start
LH: loop header
LB: loop body
LE: loop exit
PB: predicated region body
PF: predicated region fallthrough
CT: control target
= control target key end

     0   :  { %s234_s9 = smov 0   ;;  %s265_s0 = inlined_call_operand.vmem [shape: f32[2,10,128], index: 0, kind: input, shape index: {}]   ;;  %s266_s1 = inlined_call_operand.vmem [shape: f32[10,128], index: 1, kind: input, shape index: {}]   ;;  %s267_s2 = inlined_call_operand.vmem [shape: f32[2,10,128], index: 2, kind: output, shape index: {}]  }
   0x1 LB: > { %s209_s10 = sadd.s32 4294967295, %s236_s9   ;;  %p213_p0 = scmp.ge.s32.totalorder %s236_s9, 1  ;;  %s236_s9 = sphi %s234_s9, %s12_s9  }
   0x2   : > { %p112_p1 = scmp.lt.s32.totalorder %s236_s9, 3 }
   0x4   : > { %p113_p2 = pnand %p213_p0, %p112_p1 }
   0x5   : > { %p134_p3 = scmp.lt.s32.totalorder (!%p113_p2), %s209_s10, 1  ;;  %v148_v0 = vld [vmem:[%s266_s1] sm:$0xff] (!%p113_p2)  ;;  %v149_v3 = vld [vmem:[%s266_s1 + $0x8] sm:$0x3] (!%p113_p2) }
   0x6   : > { %116 = sbr.rel (%p113_p2) target bundleno = 22 (0x16), region = 28 }
   0xd   : > { %s269_s10 = smov (!%p134_p3, %s209_s10), 1 }
   0xe   : > { %s220_s11 = sshll.u32 %s269_s10, 4 }
   0xf   : > { %s138_s14 = scalar_lea.vmem %s265_s0, %s220_s11  ;;  %s143_s21 = scalar_lea.vmem %s267_s2, %s220_s11 }
  0x10   : > { %v144_v1 = vld [vmem:[%s138_s14] sm:$0xff]  ;;  %v145_v2 = vld [vmem:[%s138_s14 + $0x8] sm:$0x3] }
  0x11   : > { %v146_v4 = vmul.f32 11.313708, %v144_v1  ;;  %v147_v5 = vmul.f32 11.313708, %v145_v2 }
  0x13   : > { %v150_v6 = vadd.f32 %v148_v0, %v146_v4  ;;  %v151_v7 = vadd.f32 %v149_v3, %v147_v5 }
  0x15   : > { %152 = vst [vmem:[%s143_s21] sm:$0xff] %v150_v6  ;;  %153 = vst [vmem:[%s143_s21 + $0x8] sm:$0x3] %v151_v7 }
  0x16 PF: > { %s12_s9 = sadd.s32 1, %s236_s9  }
  0x17   : > { %p9_p4 = scmp.ge.s32.totalorder %s12_s9, 4  }
  0x19   :  { %11 = sbr.rel (!%p9_p4) target bundleno = 1 (0x1), region = 58 }

// kernel: seq2seq_forward.21
= control target key start
LH: loop header
LB: loop body
LE: loop exit
PB: predicated region body
PF: predicated region fallthrough
CT: control target
= control target key end

     0   :  { %vm21_vm0 = vcmask 1043456   ;;  %s135_s0 = inlined_call_operand.vmem [shape: f32[20,128], index: 0, kind: input, shape index: {}]   ;;  %s136_s1 = inlined_call_operand.vmem [shape: f32[1,128], index: 1, kind: input, shape index: {}]   ;;  %s137_s2 = inlined_call_operand.vmem [shape: f32[1,128], index: 2, kind: input, shape index: {}]   ;;  %s138_s3 = inlined_call_operand.vmem [shape: f32[20,128], index: 3, kind: output, shape index: {}]  }
   0x1   :  { %v15_v0 = vld [vmem:[%s135_s0 + $0x8] sm:$0xff]  ;;  %v16_v1 = vld [vmem:[%s135_s0 + $0x10] sm:$0xf]  ;;  %v14_v3 = vld [vmem:[%s135_s0] sm:$0xff] }
   0x2   :  { %19 = vadd.xlane.f32.xlu1 %v15_v0  ;;  %v22_v2 = vsel %vm21_vm0, %v16_v1, 0.0  ;;  %v81_v27 = vld [vmem:[%s136_s1] ss:$0 sm:$0xff] }
   0x3   :  { %23 = vadd.xlane.f32.xlu0 %v22_v2  ;;  %v82_v29 = vld [vmem:[%s137_s2] ss:$0 sm:$0xff] }
   0x7   :  { %17 = vadd.xlane.f32.xlu0 %v14_v3 }
  0x8f   :  { %v20_v4 = vpop.xlane.xlu1 %19 }
  0x90   :  { %v27_v5 = vmul.f32 0.0078125, %v20_v4  ;;  %v24_v6 = vpop.xlane.xlu0 %23 }
  0x91   :  { %v28_v8 = vmul.f32 0.0078125, %v24_v6 }
  0x92   :  { %v30_v7 = vsub.f32 %v15_v0, %v27_v5 }
  0x93   :  { %v31_v12 = vsub.f32 %v16_v1, %v28_v8 }
  0x94   :  { %v18_v9 = vpop.xlane.xlu0 %17  ;;  %v33_v10 = vmul.f32 %v30_v7, %v30_v7 }
  0x95   :  { %v26_v11 = vmul.f32 0.0078125, %v18_v9  ;;  %v34_v15 = vmul.f32 %v31_v12, %v31_v12 }
  0x96   :  { %37 = vadd.xlane.f32.xlu0 %v33_v10 }
  0x97   :  { %v29_v13 = vsub.f32 %v14_v3, %v26_v11  ;;  %v39_v16 = vsel %vm21_vm0, %v34_v15, 0.0 }
  0x99   :  { %v32_v14 = vmul.f32 %v29_v13, %v29_v13 }
  0x9b   :  { %35 = vadd.xlane.f32.xlu1 %v32_v14 }
  0x9f   :  { %40 = vadd.xlane.f32.xlu1 %v39_v16 }
 0x123   :  { %v38_v17 = vpop.xlane.xlu0 %37 }
 0x124   :  { %v43_v18 = vmul.f32 0.0078125, %v38_v17 }
 0x126   :  { %v46_v19 = vadd.f32 1e-05, %v43_v18 }
 0x128   :  { %83 = vrsqrt.f32 %v46_v19  ;;  %v36_v20 = vpop.xlane.xlu1 %35 }
 0x129   :  { %v42_v21 = vmul.f32 0.0078125, %v36_v20 }
 0x12b   :  { %v45_v22 = vadd.f32 1e-05, %v42_v21 }
 0x12c   :  { %v41_v23 = vpop.xlane.xlu1 %40 }
 0x12d   :  { %85 = vrsqrt.f32 %v45_v22  ;;  %v44_v24 = vmul.f32 0.0078125, %v41_v23 }
 0x12f   :  { %v47_v25 = vadd.f32 1e-05, %v44_v24 }
 0x131   :  { %87 = vrsqrt.f32 %v47_v25 }
 0x132   :  { %v84_v26 = vpop.eup %83 }
 0x133   :  { %v52_v28 = vmul.f32 %v84_v26, %v30_v7 }
 0x135   :  { %v62_v30 = vmul.f32 %v81_v27, %v52_v28 }
 0x137   :  { %v86_v31 = vpop.eup %85  ;;  %v72_v32 = vadd.f32 %v82_v29, %v62_v30 }
 0x138   :  { %v51_v33 = vmul.f32 %v86_v31, %v29_v13 }
 0x139   :  { %75 = vst [vmem:[%s138_s3 + $0x8] sm:$0xff] %v72_v32 }
 0x13a   :  { %v61_v34 = vmul.f32 %v81_v27, %v51_v33 }
 0x13b   :  { %v88_v35 = vpop.eup %87 }
 0x13c   :  { %v71_v36 = vadd.f32 %v82_v29, %v61_v34  ;;  %v53_v37 = vmul.f32 %v88_v35, %v31_v12 }
 0x13e   :  { %74 = vst [vmem:[%s138_s3] sm:$0xff] %v71_v36  ;;  %v63_v38 = vmul.f32 %v81_v27, %v53_v37 }
 0x140   :  { %v73_v39 = vadd.f32 %v82_v29, %v63_v38 }
 0x142   :  { %76 = vst [vmem:[%s138_s3 + $0x10] sm:$0xf] %v73_v39 }

// kernel: seq2seq_forward.18
= control target key start
LH: loop header
LB: loop body
LE: loop exit
PB: predicated region body
PF: predicated region fallthrough
CT: control target
= control target key end

     0   :  { %v561_v1 = vmov 0   ;;  %v50_v38 = vlaneseq  ;;  %vm391_vm0 = vcmask 1043456   ;;  %s743_s1 = inlined_call_operand.vmem [shape: bf16[128,256], index: 1, kind: input, shape index: {}]   ;;  %s744_s3 = inlined_call_operand.vmem [shape: bf16[256,128], index: 3, kind: input, shape index: {}]   ;;  %s745_s0 = inlined_call_operand.vmem [shape: f32[20,128], index: 0, kind: input, shape index: {}]   ;;  %s746_s2 = inlined_call_operand.vmem [shape: f32[1,256], index: 2, kind: input, shape index: {}]   ;;  %s747_s4 = inlined_call_operand.vmem [shape: f32[1,128], index: 4, kind: input, shape index: {}]   ;;  %s748_s5 = inlined_call_operand.vmem [shape: f32[1,128], index: 5, kind: input, shape index: {}]   ;;  %s749_s6 = inlined_call_operand.vmem [shape: f32[1,128], index: 6, kind: input, shape index: {}]   ;;  %s750_s7 = inlined_call_operand.vmem [shape: f32[20,128], index: 7, kind: output, shape index: {}]  }
   0x1   :  { %v515_v0 = vld [vmem:[%s743_s1 + $0x4] ss:$8 sps:$4 sm:$0xff]   ;;  %172 = vmatprep.mubr.bf16.mxu0 %v561_v1  ;;  %v517_v2 = vld [vmem:[%s743_s1] ss:$8 sps:$4 sm:$0xff]   ;;  %v518_v3 = vld [vmem:[%s743_s1 + $0x14] ss:$8 sps:$4 sm:$0xff]  }
   0x2   :  { %140 = vmatprep.subr.bf16.mxu0 %v515_v0  ;;  %v520_v4 = vld [vmem:[%s743_s1 + $0x10] ss:$8 sps:$4 sm:$0xff]   ;;  %v521_v5 = vld [vmem:[%s743_s1 + $0x24] ss:$8 sps:$4 sm:$0xff]   ;;  %v523_v6 = vld [vmem:[%s743_s1 + $0x20] ss:$8 sps:$4 sm:$0xff]  }
   0x3   :  { %141 = vmatpush1.bf16.msra.mxu0 %v517_v2  ;;  %v524_v7 = vld [vmem:[%s743_s1 + $0x34] ss:$8 sps:$4 sm:$0xff]   ;;  %v526_v8 = vld [vmem:[%s743_s1 + $0x30] ss:$8 sps:$4 sm:$0xff]   ;;  %v527_v9 = vld [vmem:[%s743_s1 + $0x44] ss:$8 sps:$4 sm:$0xff]  }
   0x4   :  { %142 = vmatprep.subr.bf16.mxu0 %v518_v3  ;;  %v539_v10 = vld [vmem:[%s744_s3 + $0x40] sm:$0xff]   ;;  %v530_v13 = vld [vmem:[%s743_s1 + $0x54] ss:$8 sps:$4 sm:$0xff]   ;;  %v541_v14 = vld [vmem:[%s744_s3 + $0x48] sm:$0xff]   ;;  %v51_v39 = vshrl.u32 %v50_v38, 7 }
   0x5   :  { %v529_v11 = vld [vmem:[%s743_s1 + $0x40] ss:$8 sps:$4 sm:$0xff]   ;;  %486 = vmatprep.subr.bf16.mxu1 %v539_v10  ;;  %v543_v16 = vld [vmem:[%s744_s3 + $0x50] sm:$0xff]   ;;  %v533_v18 = vld [vmem:[%s743_s1 + $0x64] ss:$8 sps:$4 sm:$0xff]  }
   0x6   :  { %v540_v12 = vld [vmem:[%s744_s3] sm:$0xff]   ;;  %v542_v15 = vld [vmem:[%s744_s3 + $0x8] sm:$0xff]   ;;  %v532_v17 = vld [vmem:[%s743_s1 + $0x50] ss:$8 sps:$4 sm:$0xff]   ;;  %v52_v40 = vsub.s32 0, %v51_v39  ;;  %v56_v42 = vsub.s32 1, %v51_v39 }
   0x7   :  { %143 = vmatpush1.bf16.msra.mxu0 %v520_v4  ;;  %487 = vmatpush3.bf16.msra.mxu1 %v540_v12  ;;  %v544_v19 = vld [vmem:[%s744_s3 + $0x10] sm:$0xff]   ;;  %v545_v20 = vld [vmem:[%s744_s3 + $0x58] sm:$0xff]   ;;  %v535_v21 = vld [vmem:[%s743_s1 + $0x60] ss:$8 sps:$4 sm:$0xff]  }
   0x8   :  { %144 = vmatprep.subr.bf16.mxu0 %v521_v5  ;;  %488 = vmatprep.subr.bf16.mxu1 %v541_v14  ;;  %v536_v22 = vld [vmem:[%s743_s1 + $0x74] ss:$8 sps:$4 sm:$0xff]   ;;  %v547_v24 = vld [vmem:[%s744_s3 + $0x60] sm:$0xff]   ;;  %v538_v25 = vld [vmem:[%s743_s1 + $0x70] ss:$8 sps:$4 sm:$0xff]  }
   0x9   :  { %v546_v23 = vld [vmem:[%s744_s3 + $0x18] sm:$0xff]   ;;  %v680_v26 = vld [vmem:[%s745_s0] sm:$0xff]  ;;  %v685_v27 = vld [vmem:[%s745_s0 + $0x8] sm:$0xff] }
   0xa   :  { %v548_v28 = vld [vmem:[%s744_s3 + $0x20] sm:$0xff]   ;;  %v549_v29 = vld [vmem:[%s744_s3 + $0x68] sm:$0xff]   ;;  %v30_v30 = vpack.c.bf16 %v685_v27, %v680_v26  ;;  %v698_v31 = vld [vmem:[%s745_s0 + $0x10] sm:$0xf] }
   0xb   :  { %145 = vmatpush1.bf16.msra.mxu0 %v523_v6  ;;  %489 = vmatpush3.bf16.msra.mxu1 %v542_v15  ;;  %v31_v32 = vpack.c.bf16 %v698_v31, %v698_v31  ;;  %v550_v33 = vld [vmem:[%s744_s3 + $0x28] sm:$0xff]   ;;  %v551_v34 = vld [vmem:[%s744_s3 + $0x70] sm:$0xff]   ;;  %v553_v36 = vld [vmem:[%s744_s3 + $0x78] sm:$0xff]  }
   0xc   :  { %146 = vmatprep.subr.bf16.mxu0 %v524_v7  ;;  %490 = vmatprep.subr.bf16.mxu1 %v543_v16  ;;  %v552_v35 = vld [vmem:[%s744_s3 + $0x30] sm:$0xff]   ;;  %v554_v37 = vld [vmem:[%s744_s3 + $0x38] sm:$0xff]   ;;  %v48_v41 = vld [vmem:[%s746_s2] sm:$0x3] }
   0xd   :  { %v53_v43 = vrot.slane %v48_v41, %v52_v40  ;;  %v57_v44 = vrot.slane %v48_v41, %v56_v42 }
   0xf   :  { %147 = vmatpush1.bf16.msra.mxu0 %v526_v8  ;;  %491 = vmatpush3.bf16.msra.mxu1 %v544_v19 }
  0x10   :  { %148 = vmatprep.subr.bf16.mxu0 %v527_v9  ;;  %492 = vmatprep.subr.bf16.mxu1 %v545_v20 }
  0x13   :  { %149 = vmatpush1.bf16.msra.mxu0 %v529_v11  ;;  %493 = vmatpush3.bf16.msra.mxu1 %v546_v23  ;;  %v467_v11 = vld [vmem:[%s747_s4] ss:$0 sm:$0xff] }
  0x14   :  { %150 = vmatprep.subr.bf16.mxu0 %v530_v13  ;;  %494 = vmatprep.subr.bf16.mxu1 %v547_v24 }
  0x17   :  { %151 = vmatpush1.bf16.msra.mxu0 %v532_v17  ;;  %495 = vmatpush3.bf16.msra.mxu1 %v548_v28 }
  0x18   :  { %152 = vmatprep.subr.bf16.mxu0 %v533_v18  ;;  %496 = vmatprep.subr.bf16.mxu1 %v549_v29 }
  0x1b   :  { %153 = vmatpush1.bf16.msra.mxu0 %v535_v21  ;;  %497 = vmatpush3.bf16.msra.mxu1 %v550_v33 }
  0x1c   :  { %154 = vmatprep.subr.bf16.mxu0 %v536_v22  ;;  %498 = vmatprep.subr.bf16.mxu1 %v551_v34 }
  0x1f   :  { %155 = vmatpush1.bf16.msra.mxu0 %v538_v25  ;;  %499 = vmatpush3.bf16.msra.mxu1 %v552_v35 }
  0x20   :  { %500 = vmatprep.subr.bf16.mxu1 %v553_v36 }
  0x22   :  { %173 = vmatmul.mubr.bf16.vlgmr.msra.gmra.mrb[0].mxu0 %v30_v30 }
  0x23   :  { %182 = vmatprep.mubr.bf16.mxu0 %v561_v1  ;;  %501 = vmatpush3.bf16.msra.mxu1 %v554_v37 }
  0x2a   :  { %183 = vmatmul.mubr.bf16.gmra.mrb[4].mxu0 %v31_v32 }
  0xf5   :  { %v174_v45 = vpop.f32.mrb[0].mxu0 }
  0xf6   :  { %v175_v46 = vadd.f32 %v174_v45, %v53_v43  ;;  %v176_v47 = vpop.f32.mrb[1].mxu0 }
  0xf7   :  { %v177_v48 = vadd.f32 %v176_v47, %v57_v44  ;;  %v178_v49 = vpop.f32.mrb[2].mxu0 }
  0xf8   :  { %v179_v50 = vadd.f32 %v178_v49, %v53_v43  ;;  %v180_v51 = vpop.f32.mrb[3].mxu0  ;;  %v191_v53 = vmax.f32 %v175_v46, 0.0 }
  0xf9   :  { %v181_v52 = vadd.f32 %v180_v51, %v57_v44  ;;  %v192_v55 = vmax.f32 %v177_v48, 0.0  ;;  %v485_v48 = vld [vmem:[%s749_s6] ss:$0 sm:$0xff] }
  0xfa   :  { %v193_v54 = vmax.f32 %v179_v50, 0.0 }
  0xfb   :  { %v194_v56 = vmax.f32 %v181_v52, 0.0 }
  0xfc   :  { %v197_v57 = vpack.c.bf16 %v193_v54, %v191_v53 }
  0xfd   :  { %v184_v58 = vpop.f32.mrb[4].mxu0  ;;  %v198_v59 = vpack.c.bf16 %v194_v56, %v192_v55 }
  0xfe   :  { %v185_v60 = vadd.f32 %v184_v58, %v53_v43  ;;  %v186_v61 = vpop.f32.mrb[5].mxu0 }
  0xff   :  { %v187_v62 = vadd.f32 %v186_v61, %v57_v44  ;;  %v188_v63 = vpop.f32.mrb[6].mxu0  ;;  %368 = vmatprep.mubr.bf16.mxu1 %v198_v59  ;;  %v484_v44 = vld [vmem:[%s748_s5] ss:$0 sm:$0xff] }
 0x100   :  { %v189_v0 = vpop.f32.mrb[7].mxu0  ;;  %369 = vmatmul.mubr.bf16.vlgmr.msra.gmra.mrb[0].mxu1 %v197_v57  ;;  %v195_v2 = vmax.f32 %v185_v60, 0.0 }
 0x101   :  { %v196_v1 = vmax.f32 %v187_v62, 0.0 }
 0x102   :  { %v199_v4 = vpack.c.bf16 %v195_v2, %v195_v2 }
 0x103   :  { %v200_v3 = vpack.c.bf16 %v196_v1, %v196_v1 }
 0x105   :  { %376 = vmatprep.mubr.bf16.mxu1 %v200_v3 }
 0x108   :  { %377 = vmatmul.mubr.bf16.gmra.mrb[4].mxu1 %v199_v4 }
 0x1d3   :  { %v502_v5 = vpop.f32.mrb[0].mxu1 }
 0x1d4   :  { %v503_v6 = vpop.f32.mrb[1].mxu1 }
 0x1d5   :  { %v504_v7 = vadd.f32 %v503_v6, %v502_v5  ;;  %v505_v8 = vpop.f32.mrb[2].mxu1 }
 0x1d6   :  { %v506_v9 = vpop.f32.mrb[3].mxu1 }
 0x1d7   :  { %v507_v10 = vadd.f32 %v506_v9, %v505_v8  ;;  %v371_v21 = vadd.f32 %v504_v7, %v467_v11 }
 0x1d9   :  { %v374_v12 = vadd.f32 %v507_v10, %v467_v11  ;;  %v384_v23 = vadd.f32 %v371_v21, %v680_v26 }
 0x1db   :  { %v508_v13 = vpop.f32.mrb[4].mxu1  ;;  %v385_v14 = vadd.f32 %v374_v12, %v685_v27 }
 0x1dc   :  { %v509_v15 = vpop.f32.mrb[5].mxu1 }
 0x1dd   :  { %v510_v16 = vadd.f32 %v509_v15, %v508_v13  ;;  %v511_v17 = vpop.f32.mrb[6].mxu1  ;;  %389 = vadd.xlane.f32.xlu1 %v385_v14 }
 0x1de   :  { %v512_v18 = vpop.f32.mrb[7].mxu1 }
 0x1df   :  { %v379_v19 = vadd.f32 %v510_v16, %v467_v11 }
 0x1e1   :  { %v386_v20 = vadd.f32 %v379_v19, %v698_v31 }
 0x1e3   :  { %v392_v22 = vsel %vm391_vm0, %v386_v20, 0.0 }
 0x1e4   :  { %393 = vadd.xlane.f32.xlu0 %v392_v22 }
 0x1e8   :  { %387 = vadd.xlane.f32.xlu0 %v384_v23 }
 0x26a   :  { %v390_v24 = vpop.xlane.xlu1 %389 }
 0x26b   :  { %v397_v25 = vmul.f32 0.0078125, %v390_v24 }
 0x26d   :  { %v400_v28 = vsub.f32 %v385_v14, %v397_v25 }
 0x26f   :  { %v403_v27 = vmul.f32 %v400_v28, %v400_v28 }
 0x271   :  { %v394_v29 = vpop.xlane.xlu0 %393  ;;  %407 = vadd.xlane.f32.xlu0 %v403_v27 }
 0x272   :  { %v398_v30 = vmul.f32 0.0078125, %v394_v29 }
 0x274   :  { %v401_v34 = vsub.f32 %v386_v20, %v398_v30 }
 0x275   :  { %v388_v32 = vpop.xlane.xlu0 %387 }
 0x276   :  { %v396_v33 = vmul.f32 0.0078125, %v388_v32  ;;  %v404_v31 = vmul.f32 %v401_v34, %v401_v34 }
 0x278   :  { %v399_v35 = vsub.f32 %v384_v23, %v396_v33  ;;  %v409_v37 = vsel %vm391_vm0, %v404_v31, 0.0 }
 0x27a   :  { %v402_v36 = vmul.f32 %v399_v35, %v399_v35 }
 0x27c   :  { %405 = vadd.xlane.f32.xlu1 %v402_v36 }
 0x280   :  { %410 = vadd.xlane.f32.xlu1 %v409_v37 }
 0x2fe   :  { %v408_v38 = vpop.xlane.xlu0 %407 }
 0x2ff   :  { %v413_v26 = vmul.f32 0.0078125, %v408_v38 }
 0x301   :  { %v416_v39 = vadd.f32 1e-05, %v413_v26 }
 0x303   :  { %555 = vrsqrt.f32 %v416_v39 }
 0x309   :  { %v406_v40 = vpop.xlane.xlu1 %405 }
 0x30a   :  { %v412_v41 = vmul.f32 0.0078125, %v406_v40 }
 0x30c   :  { %v415_v42 = vadd.f32 1e-05, %v412_v41 }
 0x30d   :  { %v556_v43 = vpop.eup %555  ;;  %v411_v45 = vpop.xlane.xlu1 %410 }
 0x30e   :  { %v422_v46 = vmul.f32 %v556_v43, %v400_v28  ;;  %557 = vrsqrt.f32 %v415_v42  ;;  %v414_v47 = vmul.f32 0.0078125, %v411_v45 }
 0x310   :  { %v432_v49 = vmul.f32 %v484_v44, %v422_v46  ;;  %v417_v50 = vadd.f32 1e-05, %v414_v47 }
 0x312   :  { %v442_v51 = vadd.f32 %v485_v48, %v432_v49  ;;  %559 = vrsqrt.f32 %v417_v50 }
 0x314   :  { %445 = vst [vmem:[%s750_s7 + $0x8] sm:$0xff] %v442_v51 }
 0x318   :  { %v558_v52 = vpop.eup %557 }
 0x319   :  { %v421_v53 = vmul.f32 %v558_v52, %v399_v35 }
 0x31b   :  { %v431_v54 = vmul.f32 %v484_v44, %v421_v53 }
 0x31c   :  { %v560_v55 = vpop.eup %559 }
 0x31d   :  { %v441_v56 = vadd.f32 %v485_v48, %v431_v54  ;;  %v423_v57 = vmul.f32 %v560_v55, %v401_v34 }
 0x31f   :  { %444 = vst [vmem:[%s750_s7] sm:$0xff] %v441_v56  ;;  %v433_v58 = vmul.f32 %v484_v44, %v423_v57 }
 0x321   :  { %v443_v59 = vadd.f32 %v485_v48, %v433_v58 }
 0x323   :  { %446 = vst [vmem:[%s750_s7 + $0x10] sm:$0xf] %v443_v59 }

// kernel: seq2seq_forward.16
= control target key start
LH: loop header
LB: loop body
LE: loop exit
PB: predicated region body
PF: predicated region fallthrough
CT: control target
= control target key end

     0   :  { %s218_s9 = smov 0   ;;  %s246_s0 = inlined_call_operand.vmem [shape: f32[2,8,128], index: 0, kind: input, shape index: {}]   ;;  %s247_s1 = inlined_call_operand.vmem [shape: f32[8,128], index: 1, kind: input, shape index: {}]   ;;  %s248_s2 = inlined_call_operand.vmem [shape: f32[2,8,128], index: 2, kind: output, shape index: {}]  }
   0x1 LB: > { %s197_s10 = sadd.s32 4294967295, %s220_s9   ;;  %p201_p0 = scmp.ge.s32.totalorder %s220_s9, 1  ;;  %s220_s9 = sphi %s218_s9, %s12_s9  }
   0x2   : > { %p111_p1 = scmp.lt.s32.totalorder %s220_s9, 3 }
   0x4   : > { %p112_p2 = pnand %p201_p0, %p111_p1 }
   0x5   : > { %p131_p3 = scmp.lt.s32.totalorder (!%p112_p2), %s197_s10, 1  ;;  %v141_v1 = vld [vmem:[%s247_s1] sm:$0xff] (!%p112_p2) }
   0x6   : > { %115 = sbr.rel (%p112_p2) target bundleno = 22 (0x16), region = 28 }
   0xd   : > { %s250_s10 = smov (!%p131_p3, %s197_s10), 1 }
   0xe   : > { %s202_s11 = sshll.u32 %s250_s10, 3 }
   0xf   : > { %s134_s14 = scalar_lea.vmem %s246_s0, %s202_s11  ;;  %s138_s19 = scalar_lea.vmem %s248_s2, %s202_s11 }
  0x10   : > { %v139_v0 = vld [vmem:[%s134_s14] sm:$0xff] }
  0x11   : > { %v140_v2 = vmul.f32 11.313708, %v139_v0 }
  0x13   : > { %v142_v3 = vadd.f32 %v141_v1, %v140_v2 }
  0x15   : > { %143 = vst [vmem:[%s138_s19] sm:$0xff] %v142_v3 }
  0x16 PF: > { %s12_s9 = sadd.s32 1, %s220_s9  }
  0x17   : > { %p9_p4 = scmp.ge.s32.totalorder %s12_s9, 4  }
  0x19   :  { %11 = sbr.rel (!%p9_p4) target bundleno = 1 (0x1), region = 58 }

// kernel: seq2seq_forward.17
= control target key start
LH: loop header
LB: loop body
LE: loop exit
PB: predicated region body
PF: predicated region fallthrough
CT: control target
= control target key end

     0   :  { %s2152_s21 = smov 0   ;;  %s2154_s22 = smov 0   ;;  %s2483_s0 = inlined_call_operand.vmem [shape: f32[2,10,128], index: 0, kind: input, shape index: {}, may-alias: {0,1}]   ;;  %s2484_s1 = inlined_call_operand.vmem [shape: f32[2,10,128], index: 1, kind: input, shape index: {}, may-alias: {0,1}]   ;;  %s2485_s2 = inlined_call_operand.vmem [shape: bf16[128,128], index: 2, kind: input, shape index: {}]   ;;  %s2486_s3 = inlined_call_operand.vmem [shape: f32[1,128], index: 3, kind: input, shape index: {}]   ;;  %s2487_s4 = inlined_call_operand.vmem [shape: bf16[128,256], index: 4, kind: input, shape index: {}]   ;;  %s2488_s5 = inlined_call_operand.vmem [shape: f32[1,256], index: 5, kind: input, shape index: {}]   ;;  %s2489_s6 = inlined_call_operand.vmem [shape: bf16[128,128], index: 6, kind: input, shape index: {}]   ;;  %s2490_s7 = inlined_call_operand.vmem [shape: f32[1,128], index: 7, kind: input, shape index: {}]   ;;  %s2491_s8 = inlined_call_operand.vmem [shape: f32[10,10], index: 8, kind: input, shape index: {}]   ;;  %s2492_s9 = inlined_call_operand.vmem [shape: f32[2,1,10], index: 9, kind: input, shape index: {}]   ;;  %s2493_s10 = inlined_call_operand.vmem [shape: f32[1,128], index: 10, kind: input, shape index: {}]   ;;  %s2494_s11 = inlined_call_operand.vmem [shape: f32[1,128], index: 11, kind: input, shape index: {}]   ;;  %s2495_s12 = inlined_call_operand.vmem [shape: f32[2,10,128], index: 12, kind: output, shape index: {}]  }
   0x1   :  { %s2156_s23 = smov 0  }
   0x2 LB: > { %s34_s24 = sadd.s32 1, %s2075_s22  ;;  %p1741_p0 = scmp.ge.s32.totalorder %s2079_s23, 1  ;;  %s2079_s23 = sphi %s2156_s23, %s22_s23   ;;  %s2075_s22 = sphi %s2154_s22, %s2497_s22   ;;  %s2071_s21 = sphi %s2152_s21, %s2496_s21  }
   0x3   : > { %p36_p1 = scmp.ge.s32.totalorder %s34_s24, 2  ;;  %p412_p2 = scmp.lt.s32.totalorder %s2079_s23, 3 }
   0x5   : > { %s2499_s24 = smov (%p36_p1, %s34_s24), 0  ;;  %p413_p3 = pnand %p1741_p0, %p412_p2 }
   0x6   : > { %v1981_v0 = vld [vmem:[%s2485_s2] sm:$0xff] (!%p413_p3)   ;;  %v2081_v1 = vmov (!%p413_p3), 0.0   ;;  %v1982_v2 = vld [vmem:[%s2485_s2 + $0x8] sm:$0xff] (!%p413_p3)   ;;  %vm2082_vm0 = vmmov (!%p413_p3), 0   ;;  %v2083_v3 = vmov (!%p413_p3), 0   ;;  %v1983_v4 = vld [vmem:[%s2485_s2 + $0x10] sm:$0xff] (!%p413_p3)   ;;  %v646_v32 = vlaneseq (!%p413_p3) }
   0x7   : > { %416 = sbr.rel (%p413_p3) target bundleno = 3042 (0xbe2), region = 68  ;;  %1843 = vmatprep.subr.bf16.mxu0 (!%p413_p3), %v2081_v1  ;;  %1859 = vmatprep.mubr.msk.bf16.mxu0 (!%p413_p3), %vm2082_vm0, %v2081_v1  ;;  %v1984_v5 = vld [vmem:[%s2485_s2 + $0x18] sm:$0xff] (!%p413_p3)   ;;  %v1989_v6 = vld [vmem:[%s2487_s4 + $0x4] ss:$8 sps:$4 sm:$0xff] (!%p413_p3)   ;;  %v1991_v7 = vld [vmem:[%s2487_s4] ss:$8 sps:$4 sm:$0xff] (!%p413_p3)  }
   0x8   : > { %1844 = vmatpush3.bf16.msra.mxu0 (!%p413_p3), %v1981_v0  ;;  %768 = vmatprep.mubr.bf16.mxu1 (!%p413_p3), %v2083_v3  ;;  %v1992_v8 = vld [vmem:[%s2487_s4 + $0x14] ss:$8 sps:$4 sm:$0xff] (!%p413_p3)   ;;  %p476_p4 = scmp.lt.s32.totalorder (!%p413_p3), %s2071_s21, 1  ;;  %v1994_v9 = vld [vmem:[%s2487_s4 + $0x10] ss:$8 sps:$4 sm:$0xff] (!%p413_p3)   ;;  %v1985_v11 = vld [vmem:[%s2485_s2 + $0x20] sm:$0xff] (!%p413_p3)  }
   0x9   : > { %1845 = vmatprep.subr.bf16.mxu0 (!%p413_p3), %v2081_v1  ;;  %736 = vmatprep.subr.bf16.mxu1 (!%p413_p3), %v1989_v6  ;;  %v1995_v10 = vld [vmem:[%s2487_s4 + $0x24] ss:$8 sps:$4 sm:$0xff] (!%p413_p3)   ;;  %v1997_v12 = vld [vmem:[%s2487_s4 + $0x20] ss:$8 sps:$4 sm:$0xff] (!%p413_p3)   ;;  %v1998_v13 = vld [vmem:[%s2487_s4 + $0x34] ss:$8 sps:$4 sm:$0xff] (!%p413_p3)  }
   0xa   : > { %737 = vmatpush1.bf16.msra.mxu1 (!%p413_p3), %v1991_v7  ;;  %v1986_v14 = vld [vmem:[%s2485_s2 + $0x28] sm:$0xff] (!%p413_p3)   ;;  %v2000_v15 = vld [vmem:[%s2487_s4 + $0x30] ss:$8 sps:$4 sm:$0xff] (!%p413_p3)   ;;  %v2004_v19 = vld [vmem:[%s2487_s4 + $0x54] ss:$8 sps:$4 sm:$0xff] (!%p413_p3)   ;;  %v647_v35 = vshrl.u32 (!%p413_p3), %v646_v32, 7 }
   0xb   : > { %738 = vmatprep.subr.bf16.mxu1 (!%p413_p3), %v1992_v8  ;;  %v1987_v16 = vld [vmem:[%s2485_s2 + $0x30] sm:$0xff] (!%p413_p3)   ;;  %v2001_v17 = vld [vmem:[%s2487_s4 + $0x44] ss:$8 sps:$4 sm:$0xff] (!%p413_p3)   ;;  %v2003_v18 = vld [vmem:[%s2487_s4 + $0x40] ss:$8 sps:$4 sm:$0xff] (!%p413_p3)   ;;  %s2084_s30 = smov (!%p413_p3), 96  }
   0xc   : > { %1846 = vmatpush3.bf16.msra.mxu0 (!%p413_p3), %v1982_v2  ;;  %v1988_v20 = vld [vmem:[%s2485_s2 + $0x38] sm:$0xff] (!%p413_p3)   ;;  %v2007_v25 = vld [vmem:[%s2487_s4 + $0x64] ss:$8 sps:$4 sm:$0xff] (!%p413_p3)   ;;  %v2009_v26 = vld [vmem:[%s2487_s4 + $0x60] ss:$8 sps:$4 sm:$0xff] (!%p413_p3)   ;;  %v652_v41 = vsub.s32 (!%p413_p3), 1, %v647_v35 }
   0xd   : > { %1847 = vmatprep.subr.bf16.mxu0 (!%p413_p3), %v2081_v1  ;;  %v2006_v23 = vld [vmem:[%s2487_s4 + $0x50] ss:$8 sps:$4 sm:$0xff] (!%p413_p3)   ;;  %v2010_v27 = vld [vmem:[%s2487_s4 + $0x74] ss:$8 sps:$4 sm:$0xff] (!%p413_p3)   ;;  %v1748_v33 = vld [vmem:[%s2486_s3] ss:$0 sm:$0xff] (!%p413_p3) }
   0xe   : > { %s2501_s21 = smov (!%p476_p4, %s2071_s21), 1  ;;  %739 = vmatpush1.bf16.msra.mxu1 %v1994_v9  ;;  %v2012_v28 = vld [vmem:[%s2487_s4 + $0x70] ss:$8 sps:$4 sm:$0xff]   ;;  %v644_v44 = vld [vmem:[%s2488_s5] sm:$0x3]  ;;  %vm923_vm1 = vcmask 1044480  }
   0xf   : > { %740 = vmatprep.subr.bf16.mxu1 %v1995_v10  ;;  %s2224_s19 = sshll.u32 %s2501_s21, 4  ;;  %v653_v46 = vrot.slane %v644_v44, %v652_v41  ;;  %v648_v55 = vsub.s32 0, %v647_v35  ;;  %s2085_s13 = smov 64   ;;  %vm850_vm2 = vcmask 261120   ;;  %vm895_vm3 = vcmask 80896  }
  0x10   : > { %1848 = vmatpush3.bf16.msra.mxu0 %v1983_v4  ;;  %s483_s16 = scalar_lea.vmem %s2483_s0, %s2224_s19  ;;  %s489_s18 = scalar_lea.vmem %s2484_s1, %s2224_s19  ;;  %vm899_vm4 = vcmask 74752   ;;  %vm1569_vm5 = vcmask 1041408  }
  0x11   : > { %1849 = vmatprep.subr.bf16.mxu0 %v2081_v1  ;;  %v2249_v21 = vld [vmem:[%s483_s16] sm:$0xff]  ;;  %v2251_v22 = vld [vmem:[%s483_s16 + $0x8] sm:$0x3]  ;;  %v649_v56 = vrot.slane %v644_v44, %v648_v55  ;;  %s498_s16 = scalar_lea.vmem %s2492_s9, %s2501_s21 }
  0x12   : > { %741 = vmatpush1.bf16.msra.mxu1 %v1997_v12  ;;  %v512_v24 = vpack.c.bf16 %v2251_v22, %v2249_v21  ;;  %v513_v29 = vld [vmem:[%s489_s18] sm:$0xff]  ;;  %v514_v30 = vld [vmem:[%s489_s18 + $0x8] sm:$0x3] }
  0x13   : > { %742 = vmatprep.subr.bf16.mxu1 %v1998_v13  ;;  %v515_v31 = vpack.c.bf16 %v514_v30, %v513_v29 }
  0x14   : > { %1850 = vmatpush3.bf16.msra.mxu0 %v1984_v5 }
  0x15   : > { %1851 = vmatprep.subr.bf16.mxu0 %v2081_v1 }
  0x16   : > { %743 = vmatpush1.bf16.msra.mxu1 %v2000_v15 }
  0x17   : > { %744 = vmatprep.subr.bf16.mxu1 %v2001_v17 }
  0x18   : > { %1852 = vmatpush3.bf16.msra.mxu0 %v1985_v11 }
  0x19   : > { %1853 = vmatprep.subr.bf16.mxu0 %v2081_v1 }
  0x1a   : > { %745 = vmatpush1.bf16.msra.mxu1 %v2003_v18 }
  0x1b   : > { %746 = vmatprep.subr.bf16.mxu1 %v2004_v19  ;;  %v820_v19 = vld [vmem:[%s2491_s8] sm:$0xff] }
  0x1c   : > { %1854 = vmatpush3.bf16.msra.mxu0 %v1986_v14 }
  0x1d   : > { %1855 = vmatprep.subr.bf16.mxu0 %v2081_v1 }
  0x1e   : > { %747 = vmatpush1.bf16.msra.mxu1 %v2006_v23  ;;  %v821_v23 = vld [vmem:[%s2491_s8 + $0x8] sm:$0x3] }
  0x1f   : > { %748 = vmatprep.subr.bf16.mxu1 %v2007_v25 }
  0x20   : > { %1856 = vmatpush3.bf16.msra.mxu0 %v1987_v16 }
  0x21   : > { %1857 = vmatprep.subr.bf16.mxu0 %v2081_v1 }
  0x22   : > { %749 = vmatpush1.bf16.msra.mxu1 %v2009_v26 }
  0x23   : > { %750 = vmatprep.subr.bf16.mxu1 %v2010_v27 }
  0x24   : > { %1858 = vmatpush3.bf16.msra.mxu0 %v1988_v20  ;;  %v1773_v20 = vld [vmem:[%s498_s16] ss:$0 sm:$0xff]  ;;  %s2086_s16 = smov 32  }
  0x25   : > { %1863 = vmatprep.subr.bf16.mxu0 %v2081_v1  ;;  %v2341_v25 = vadd.f32 %v1773_v20, %v821_v23 }
  0x26   : > { %751 = vmatpush1.bf16.msra.mxu1 %v2012_v28 }
  0x27   : > { %1860 = vmatmul.mubr.bf16.vlgmr.msra.gmra.mrb[0].mxu0 %v512_v24  ;;  %1871 = vmatprep.subr.bf16.mxu1 %v2081_v1  ;;  %v2339_v24 = vadd.f32 %v1773_v20, %v820_v19 }
  0x28   : > { %1867 = vmatprep.mubr.msk.bf16.mxu0 %vm2082_vm0, %v2081_v1 }
  0x29   : > { %769 = vmatmul.mubr.bf16.vlgmr.msra.gmra.mrb[0].mxu1 %v515_v31 }
  0x2a   : > { %1873 = vmatprep.mubr.msk.bf16.mxu1 %vm2082_vm0, %v2081_v1 }
  0xfa   : > { %v621_v34 = vpop.f32.mrb[0].mxu0 }
  0xfb   : > { %v622_v36 = vadd.f32 %v1748_v33, %v621_v34  ;;  %v1861_v37 = vpop.f32.mrb[1].mxu0 }
  0xfc   : > { %v624_v38 = vpop.f32.mrb[2].mxu0  ;;  %v770_v47 = vpop.f32.mrb[0].mxu1 }
  0xfd   : > { %v625_v39 = vadd.f32 %v1748_v33, %v624_v38  ;;  %v1862_v40 = vpop.f32.mrb[3].mxu0  ;;  %v847_v42 = vmul.f32 0.17677669, %v622_v36  ;;  %v772_v48 = vpop.f32.mrb[1].mxu1  ;;  %v771_v57 = vadd.f32 %v770_v47, %v649_v56 }
  0xfe   : > { %v773_v49 = vadd.f32 %v772_v48, %v653_v46  ;;  %v774_v50 = vpop.f32.mrb[2].mxu1 }
  0xff   : > { %v848_v43 = vmul.f32 0.17677669, %v625_v39  ;;  %v776_v51 = vpop.f32.mrb[3].mxu1  ;;  %v775_v58 = vadd.f32 %v774_v50, %v649_v56 }
 0x100   : > { %v777_v52 = vadd.f32 %v776_v51, %v653_v46 }
 0x101   : > { %v2287_v45 = vpack.c.bf16 %v848_v43, %v847_v42 }
 0x102   : > { %v2291_v53 = vpack.c.bf16 %v777_v52, %v773_v49 }
 0x103   : > { %970 = vrot.lane.b32.xlu0 %v2287_v45, %s2084_s30 }
 0x104   : > { %v925_v54 = vsel %vm923_vm1, %v2291_v53, 0 }
 0x105   : > { %1872 = vmatpush3.bf16.msra.mxu1 %v925_v54 }
 0x106   : > { %1885 = vmatprep.subr.bf16.mxu1 %v2081_v1 }
 0x121   : > { %780 = vxpose.xlu0.b32.start [1/2] (short) %v771_v57, 128 }
 0x125   : > { %781 = vxpose.xlu0.b32.end [2/2] (short) %v775_v58, 128 }
 0x175   : > { %v971_v59 = vpop.permute.xlu0 %970 }
 0x186   : > { %1202 = vrot.lane.b32.xlu0 %v2287_v45, %s2085_s13 }
 0x1a1   : > { %v796_v60 = vpop.trf.xlu0 }
 0x1a5   : > { %v797_v61 = vpop.trf.xlu0 }
 0x1a6   : > { %v812_v62 = vpack.c.bf16 %v797_v61, %v796_v60 }
 0x1a8   : > { %1864 = vmatpush3.bf16.msra.mxu0 %v812_v62 }
 0x1a9   : > { %v798_v63 = vpop.trf.xlu0  ;;  %1865 = vmatprep.subr.bf16.mxu0 %v2081_v1 }
 0x1ad   : > { %v799_v0 = vpop.trf.xlu0 }
 0x1ae   : > { %v813_v2 = vpack.c.bf16 %v799_v0, %v798_v63 }
 0x1b0   : > { %1866 = vmatpush3.bf16.msra.mxu0 %v813_v2 }
 0x1b1   : > { %v800_v3 = vpop.trf.xlu0  ;;  %1877 = vmatprep.subr.bf16.mxu0 %v2081_v1 }
 0x1b3   : > { %1868 = vmatmul.mubr.msk.bf16.vlgmr.msra.gmra.mrb[4].mxu0 %vm850_vm2, %v2287_v45 }
 0x1b4   : > { %1881 = vmatprep.mubr.msk.bf16.mxu0 %vm2082_vm0, %v2081_v1 }
 0x1b5   : > { %v801_v4 = vpop.trf.xlu0 }
 0x1b6   : > { %v814_v5 = vpack.c.bf16 %v801_v4, %v800_v3 }
 0x1b8   : > { %1878 = vmatpush3.bf16.msra.mxu0 %v814_v5 }
 0x1b9   : > { %v802_v6 = vpop.trf.xlu0  ;;  %1879 = vmatprep.subr.bf16.mxu0 %v2081_v1 }
 0x1bd   : > { %v803_v7 = vpop.trf.xlu0 }
 0x1be   : > { %v815_v8 = vpack.c.bf16 %v803_v7, %v802_v6 }
 0x1c0   : > { %1880 = vmatpush3.bf16.msra.mxu0 %v815_v8 }
 0x1c1   : > { %v2305_v9 = vpop.trf.xlu0  ;;  %1891 = vmatprep.subr.bf16.mxu0 %v2081_v1 }
 0x1c3   : > { %1882 = vmatmul.mubr.msk.bf16.vlgmr.msra.gmra.mrb[8].mxu0 %vm850_vm2, %v971_v59 }
 0x1c4   : > { %1895 = vmatprep.mubr.msk.bf16.mxu0 %vm2082_vm0, %v2081_v1 }
 0x1c5   : > { %v2311_v10 = vpop.trf.xlu0 }
 0x1c9   : > { %v2313_v11 = vpop.trf.xlu0 }
 0x1cd   : > { %v2315_v12 = vpop.trf.xlu0 }
 0x1d1   : > { %v2317_v13 = vpop.trf.xlu0 }
 0x1d5   : > { %v2319_v14 = vpop.trf.xlu0 }
 0x1d6   : > { %v818_v15 = vpack.c.bf16 %v2319_v14, %v2317_v13  ;;  %v2018_v13 = vld [vmem:[%s2489_s6 + $0x28] sm:$0xff]  }
 0x1d9   : > { %v2323_v16 = vpop.trf.xlu0 }
 0x1dd   : > { %v2325_v17 = vpop.trf.xlu0 }
 0x1de   : > { %v819_v18 = vpack.c.bf16 %v2325_v17, %v2323_v16 }
 0x286   : > { %v888_v26 = vpop.f32.mrb[4].mxu0 }
 0x287   : > { %v889_v27 = vadd.f32 %v888_v26, %v2339_v24  ;;  %v1869_v28 = vpop.f32.mrb[5].mxu0 }
 0x288   : > { %v891_v29 = vpop.f32.mrb[6].mxu0 }
 0x289   : > { %v892_v30 = vadd.f32 %v891_v29, %v2341_v25  ;;  %v1870_v31 = vpop.f32.mrb[7].mxu0  ;;  %v896_v32 = vsel %vm895_vm3, %v889_v27, -inf }
 0x28a   : > { %897 = vmax.xlane.f32.xlu1 %v896_v32  ;;  %v2014_v32 = vld [vmem:[%s2489_s6 + $0x8] sm:$0xff]  }
 0x28b   : > { %v900_v33 = vsel %vm899_vm4, %v892_v30, -inf }
 0x28e   : > { %901 = vmax.xlane.f32.xlu1 %v900_v33  ;;  %v2015_v33 = vld [vmem:[%s2489_s6 + $0x10] sm:$0xff]  }
 0x28f   : > { %1892 = vmatpush3.bf16.msra.mxu0 %v2015_v33 }
 0x290   : > { %1893 = vmatprep.subr.bf16.mxu0 %v2081_v1 }
 0x296   : > { %v1009_v34 = vpop.f32.mrb[8].mxu0 }
 0x297   : > { %v1010_v35 = vadd.f32 %v1009_v34, %v2339_v24  ;;  %v1883_v36 = vpop.f32.mrb[9].mxu0  ;;  %v2016_v34 = vld [vmem:[%s2489_s6 + $0x18] sm:$0xff]  }
 0x298   : > { %v1012_v37 = vpop.f32.mrb[10].mxu0  ;;  %1894 = vmatpush3.bf16.msra.mxu0 %v2016_v34 }
 0x299   : > { %v1013_v38 = vadd.f32 %v1012_v37, %v2341_v25  ;;  %v1884_v39 = vpop.f32.mrb[11].mxu0  ;;  %v1016_v40 = vsel %vm895_vm3, %v1010_v35, -inf  ;;  %1907 = vmatprep.subr.bf16.mxu0 %v2081_v1 }
 0x29a   : > { %1017 = vmax.xlane.f32.xlu1 %v1016_v40 }
 0x29b   : > { %v1019_v41 = vsel %vm899_vm4, %v1013_v38, -inf }
 0x29e   : > { %1020 = vmax.xlane.f32.xlu1 %v1019_v41 }
 0x317   : > { %v898_v42 = vpop.xlane.xlu1 %897 }
 0x318   : > { %v903_v43 = vsub.f32 %v889_v27, %v898_v42 }
 0x31a   : > { %v905_v44 = vmul.f32 1.442695, %v903_v43 }
 0x31b   : > { %v902_v46 = vpop.xlane.xlu1 %901 }
 0x31c   : > { %2021 = vpow2.f32 %v905_v44  ;;  %v904_v47 = vsub.f32 %v892_v30, %v902_v46  ;;  %v2013_v30 = vld [vmem:[%s2489_s6] sm:$0xff]   ;;  %v816_v46 = vpack.c.bf16 %v2311_v10, %v2305_v9 }
 0x31e   : > { %v907_v48 = vmul.f32 1.442695, %v904_v47  ;;  %v817_v47 = vpack.c.bf16 %v2315_v12, %v2313_v11 }
 0x320   : > { %2023 = vpow2.f32 %v907_v48  ;;  %v1203_v48 = vpop.permute.xlu0 %1202 }
 0x326   : > { %v2022_v49 = vpop.eup %2021 }
 0x327   : > { %v1018_v50 = vpop.xlane.xlu1 %1017  ;;  %v909_v51 = vsel %vm895_vm3, %v2022_v49, 0.0 }
 0x328   : > { %v1022_v52 = vsub.f32 %v1010_v35, %v1018_v50  ;;  %910 = vadd.xlane.f32.xlu1 %v909_v51 }
 0x32a   : > { %v2024_v54 = vpop.eup %2023  ;;  %v1024_v55 = vmul.f32 1.442695, %v1022_v52 }
 0x32b   : > { %v1021_v56 = vpop.xlane.xlu1 %1020  ;;  %v912_v57 = vsel %vm899_vm4, %v2024_v54, 0.0 }
 0x32c   : > { %2025 = vpow2.f32 %v1024_v55  ;;  %v1023_v58 = vsub.f32 %v1013_v38, %v1021_v56  ;;  %913 = vadd.xlane.f32.xlu1 %v912_v57 }
 0x32e   : > { %v1026_v59 = vmul.f32 1.442695, %v1023_v58 }
 0x330   : > { %2027 = vpow2.f32 %v1026_v59 }
 0x336   : > { %v2026_v60 = vpop.eup %2025 }
 0x337   : > { %v1028_v61 = vsel %vm895_vm3, %v2026_v60, 0.0 }
 0x338   : > { %1029 = vadd.xlane.f32.xlu1 %v1028_v61 }
 0x33a   : > { %v2028_v62 = vpop.eup %2027 }
 0x33b   : > { %v1031_v63 = vsel %vm899_vm4, %v2028_v62, 0.0 }
 0x33c   : > { %1032 = vadd.xlane.f32.xlu1 %v1031_v63 }
 0x34d   : > { %1040 = vrot.lane.b32.xlu1 %v2291_v53, %s2084_s30 }
 0x3b5   : > { %v911_v0 = vpop.xlane.xlu1 %910 }
 0x3b6   : > { %2029 = vrcp.f32 %v911_v0 }
 0x3b9   : > { %v914_v2 = vpop.xlane.xlu1 %913 }
 0x3ba   : > { %2031 = vrcp.f32 %v914_v2 }
 0x3c0   : > { %v2030_v3 = vpop.eup %2029 }
 0x3c1   : > { %v916_v5 = vmul.f32 %v2030_v3, %v2022_v49 }
 0x3c4   : > { %v2032_v4 = vpop.eup %2031 }
 0x3c5   : > { %v918_v6 = vmul.f32 %v2032_v4, %v2024_v54  ;;  %v1030_v7 = vpop.xlane.xlu1 %1029 }
 0x3c6   : > { %2033 = vrcp.f32 %v1030_v7 }
 0x3c7   : > { %v919_v8 = vpack.c.bf16 %v918_v6, %v916_v5 }
 0x3c9   : > { %1874 = vmatmul.mubr.msk.bf16.vlgmr.msra.gmra.mrb[4].mxu1 %vm895_vm3, %v919_v8  ;;  %v1033_v19 = vpop.xlane.xlu1 %1032 }
 0x3ca   : > { %2035 = vrcp.f32 %v1033_v19  ;;  %1887 = vmatprep.mubr.msk.bf16.mxu1 %vm2082_vm0, %v2081_v1 }
 0x3cd   : > { %v1041_v20 = vpop.permute.xlu1 %1040 }
 0x3ce   : > { %v1046_v23 = vsel %vm923_vm1, %v1041_v20, 0 }
 0x3cf   : > { %1886 = vmatpush3.bf16.msra.mxu1 %v1046_v23  ;;  %v2017_v23 = vld [vmem:[%s2489_s6 + $0x20] sm:$0xff]  }
 0x3d0   : > { %1899 = vmatprep.subr.bf16.mxu1 %v2081_v1  ;;  %v2034_v26 = vpop.eup %2033 }
 0x3d1   : > { %v1035_v28 = vmul.f32 %v2034_v26, %v2026_v60 }
 0x3d4   : > { %v2036_v27 = vpop.eup %2035 }
 0x3d5   : > { %v1037_v29 = vmul.f32 %v2036_v27, %v2028_v62 }
 0x3d7   : > { %v1038_v31 = vpack.c.bf16 %v1037_v29, %v1035_v28 }
 0x3d9   : > { %1888 = vmatmul.mubr.msk.bf16.vlgmr.msra.gmra.mrb[8].mxu1 %vm895_vm3, %v1038_v31 }
 0x3da   : > { %1900 = vmatpush3.bf16.msra.mxu1 %v2013_v30  ;;  %1903 = vmatprep.mubr.msk.bf16.mxu1 %vm2082_vm0, %v2081_v1 }
 0x3db   : > { %1901 = vmatprep.subr.bf16.mxu1 %v2081_v1 }
 0x3de   : > { %1902 = vmatpush3.bf16.msra.mxu1 %v2014_v32 }
 0x3df   : > { %1915 = vmatprep.subr.bf16.mxu1 %v2081_v1 }
 0x49c   : > { %v961_v35 = vpop.f32.mrb[4].mxu1 }
 0x49d   : > { %v1875_v36 = vpop.f32.mrb[5].mxu1 }
 0x49e   : > { %v964_v37 = vpop.f32.mrb[6].mxu1 }
 0x49f   : > { %v968_v38 = vpack.c.bf16 %v964_v37, %v961_v35  ;;  %v1876_v39 = vpop.f32.mrb[7].mxu1 }
 0x4a1   : > { %1904 = vmatmul.mubr.msk.bf16.vlgmr.msra.gmra.mrb[12].mxu1 %vm850_vm2, %v968_v38 }
 0x4a2   : > { %1917 = vmatprep.mubr.msk.bf16.mxu1 %vm2082_vm0, %v2081_v1 }
 0x4ac   : > { %v1082_v40 = vpop.f32.mrb[8].mxu1 }
 0x4ad   : > { %v1889_v41 = vpop.f32.mrb[9].mxu1 }
 0x4ae   : > { %v1085_v42 = vpop.f32.mrb[10].mxu1 }
 0x4af   : > { %v1089_v43 = vpack.c.bf16 %v1085_v42, %v1082_v40  ;;  %v1890_v44 = vpop.f32.mrb[11].mxu1 }
 0x4b1   : > { %1896 = vmatmul.mubr.msk.bf16.vlgmr.msra.gmra.mrb[12].mxu0 %vm850_vm2, %v1089_v43 }
 0x4b2   : > { %1908 = vmatpush3.bf16.msra.mxu0 %v816_v46  ;;  %1911 = vmatprep.mubr.msk.bf16.mxu0 %vm2082_vm0, %v2081_v1 }
 0x4b3   : > { %1909 = vmatprep.subr.bf16.mxu0 %v2081_v1 }
 0x4b6   : > { %1910 = vmatpush3.bf16.msra.mxu0 %v817_v47 }
 0x4b7   : > { %1921 = vmatprep.subr.bf16.mxu0 %v2081_v1 }
 0x4b9   : > { %1912 = vmatmul.mubr.msk.bf16.vlgmr.msra.gmra.mrb[16].mxu0 %vm850_vm2, %v1203_v48 }
 0x4ba   : > { %1925 = vmatprep.mubr.msk.bf16.mxu0 %vm2082_vm0, %v2081_v1  ;;  %1922 = vmatpush3.bf16.msra.mxu0 %v2017_v23 }
 0x4bb   : > { %1923 = vmatprep.subr.bf16.mxu0 %v2081_v1 }
 0x4be   : > { %1924 = vmatpush3.bf16.msra.mxu0 %v2018_v13 }
 0x4bf   : > { %1937 = vmatprep.subr.bf16.mxu0 %v2081_v1 }
 0x574   : > { %v1195_v9 = vpop.f32.mrb[12].mxu1 }
 0x575   : > { %v1905_v10 = vpop.f32.mrb[13].mxu1 }
 0x576   : > { %v1198_v49 = vpop.f32.mrb[14].mxu1 }
 0x577   : > { %v1906_v50 = vpop.f32.mrb[15].mxu1 }
 0x578   : > { %v2019_v50 = vld [vmem:[%s2489_s6 + $0x30] sm:$0xff]  }
 0x584   : > { %v1139_v51 = vpop.f32.mrb[12].mxu0 }
 0x585   : > { %v2396_v52 = vadd.f32 %v1195_v9, %v1139_v51  ;;  %v1897_v54 = vpop.f32.mrb[13].mxu0 }
 0x586   : > { %v1142_v55 = vpop.f32.mrb[14].mxu0 }
 0x587   : > { %v2398_v56 = vadd.f32 %v1198_v49, %v1142_v55  ;;  %v1898_v11 = vpop.f32.mrb[15].mxu0 }
 0x58c   : > { %v1241_v12 = vpop.f32.mrb[16].mxu0 }
 0x58d   : > { %v1242_v57 = vadd.f32 %v1241_v12, %v2339_v24  ;;  %v1913_v58 = vpop.f32.mrb[17].mxu0 }
 0x58e   : > { %v1244_v59 = vpop.f32.mrb[18].mxu0 }
 0x58f   : > { %v1245_v60 = vadd.f32 %v1244_v59, %v2341_v25  ;;  %v1914_v61 = vpop.f32.mrb[19].mxu0  ;;  %v1248_v62 = vsel %vm895_vm3, %v1242_v57, -inf }
 0x590   : > { %1249 = vmax.xlane.f32.xlu1 %v1248_v62 }
 0x591   : > { %v1251_v63 = vsel %vm899_vm4, %v1245_v60, -inf }
 0x594   : > { %1252 = vmax.xlane.f32.xlu1 %v1251_v63 }
 0x61d   : > { %v1250_v0 = vpop.xlane.xlu1 %1249 }
 0x61e   : > { %v1254_v2 = vsub.f32 %v1242_v57, %v1250_v0 }
 0x620   : > { %v1256_v3 = vmul.f32 1.442695, %v1254_v2 }
 0x621   : > { %v1253_v4 = vpop.xlane.xlu1 %1252 }
 0x622   : > { %2037 = vpow2.f32 %v1256_v3  ;;  %v1255_v5 = vsub.f32 %v1245_v60, %v1253_v4 }
 0x624   : > { %v1258_v6 = vmul.f32 1.442695, %v1255_v5 }
 0x626   : > { %2039 = vpow2.f32 %v1258_v6 }
 0x62c   : > { %v2038_v7 = vpop.eup %2037 }
 0x62d   : > { %v1260_v8 = vsel %vm895_vm3, %v2038_v7, 0.0 }
 0x62e   : > { %1261 = vadd.xlane.f32.xlu1 %v1260_v8 }
 0x630   : > { %v2040_v19 = vpop.eup %2039 }
 0x631   : > { %v1263_v20 = vsel %vm899_vm4, %v2040_v19, 0.0 }
 0x632   : > { %1264 = vadd.xlane.f32.xlu1 %v1263_v20 }
 0x643   : > { %1271 = vrot.lane.b32.xlu1 %v2291_v53, %s2085_s13  ;;  %s507_s13 = scalar_lea.vmem %s2495_s12, %s2224_s19 }
 0x647   : > { %1379 = vrot.lane.b32.xlu1 %v2287_v45, %s2086_s16 }
 0x6bb   : > { %v1262_v26 = vpop.xlane.xlu1 %1261 }
 0x6bc   : > { %2041 = vrcp.f32 %v1262_v26  ;;  %v1794_v26 = vld [vmem:[%s2490_s7] ss:$0 sm:$0xff] }
 0x6bf   : > { %v1265_v27 = vpop.xlane.xlu1 %1264 }
 0x6c0   : > { %2043 = vrcp.f32 %v1265_v27 }
 0x6c3   : > { %v1272_v28 = vpop.permute.xlu1 %1271 }
 0x6c4   : > { %v1277_v29 = vsel %vm923_vm1, %v1272_v28, 0 }
 0x6c5   : > { %1916 = vmatpush3.bf16.msra.mxu1 %v1277_v29 }
 0x6c6   : > { %1929 = vmatprep.subr.bf16.mxu1 %v2081_v1  ;;  %v2042_v30 = vpop.eup %2041 }
 0x6c7   : > { %v1267_v45 = vmul.f32 %v2042_v30, %v2038_v7  ;;  %v1380_v34 = vpop.permute.xlu1 %1379 }
 0x6ca   : > { %v2044_v31 = vpop.eup %2043 }
 0x6cb   : > { %v1269_v32 = vmul.f32 %v2044_v31, %v2040_v19 }
 0x6cd   : > { %v1270_v33 = vpack.c.bf16 %v1269_v32, %v1267_v45 }
 0x6cf   : > { %1918 = vmatmul.mubr.msk.bf16.vlgmr.msra.gmra.mrb[16].mxu1 %vm895_vm3, %v1270_v33 }
 0x6d0   : > { %1930 = vmatpush3.bf16.msra.mxu1 %v818_v15  ;;  %1933 = vmatprep.mubr.msk.bf16.mxu1 %vm2082_vm0, %v2081_v1 }
 0x6d1   : > { %1931 = vmatprep.subr.bf16.mxu1 %v2081_v1 }
 0x6d4   : > { %1932 = vmatpush3.bf16.msra.mxu1 %v819_v18 }
 0x6d5   : > { %1943 = vmatprep.subr.bf16.mxu1 %v2081_v1 }
 0x6d7   : > { %1934 = vmatmul.mubr.msk.bf16.vlgmr.msra.gmra.mrb[20].mxu1 %vm850_vm2, %v1380_v34 }
 0x6d8   : > { %1947 = vmatprep.mubr.msk.bf16.mxu1 %vm2082_vm0, %v2081_v1  ;;  %1944 = vmatpush3.bf16.msra.mxu1 %v2019_v50 }
 0x6d9   : > { %1945 = vmatprep.subr.bf16.mxu1 %v2081_v1 }
 0x7a2   : > { %v1313_v14 = vpop.f32.mrb[16].mxu1 }
 0x7a3   : > { %v1919_v15 = vpop.f32.mrb[17].mxu1 }
 0x7a4   : > { %v1316_v35 = vpop.f32.mrb[18].mxu1 }
 0x7a5   : > { %v1320_v16 = vpack.c.bf16 %v1316_v35, %v1313_v14  ;;  %v1920_v17 = vpop.f32.mrb[19].mxu1 }
 0x7a7   : > { %1926 = vmatmul.mubr.msk.bf16.vlgmr.msra.gmra.mrb[20].mxu0 %vm850_vm2, %v1320_v16 }
 0x7a8   : > { %1939 = vmatprep.mubr.msk.bf16.mxu0 %vm2082_vm0, %v2081_v1 }
 0x7aa   : > { %v1418_v18 = vpop.f32.mrb[20].mxu1 }
 0x7ab   : > { %v1419_v36 = vadd.f32 %v1418_v18, %v2339_v24  ;;  %v1935_v37 = vpop.f32.mrb[21].mxu1 }
 0x7ac   : > { %v1421_v38 = vpop.f32.mrb[22].mxu1 }
 0x7ad   : > { %v1422_v39 = vadd.f32 %v1421_v38, %v2341_v25  ;;  %v1936_v40 = vpop.f32.mrb[23].mxu1  ;;  %v1425_v41 = vsel %vm895_vm3, %v1419_v36, -inf }
 0x7ae   : > { %1426 = vmax.xlane.f32.xlu1 %v1425_v41  ;;  %v1796_v41 = vld [vmem:[%s2494_s11] ss:$0 sm:$0xff] }
 0x7af   : > { %v1428_v42 = vsel %vm899_vm4, %v1422_v39, -inf }
 0x7b0   : > { %1429 = vmax.xlane.f32.xlu0 %v1428_v42 }
 0x83b   : > { %v1427_v43 = vpop.xlane.xlu1 %1426 }
 0x83c   : > { %v1431_v44 = vsub.f32 %v1419_v36, %v1427_v43 }
 0x83d   : > { %v1430_v46 = vpop.xlane.xlu0 %1429 }
 0x83e   : > { %v1433_v47 = vmul.f32 1.442695, %v1431_v44  ;;  %v1432_v48 = vsub.f32 %v1422_v39, %v1430_v46  ;;  %v1795_v39 = vld [vmem:[%s2493_s10] ss:$0 sm:$0xff] }
 0x840   : > { %2045 = vpow2.f32 %v1433_v47  ;;  %v1435_v9 = vmul.f32 1.442695, %v1432_v48 }
 0x842   : > { %2047 = vpow2.f32 %v1435_v9 }
 0x84a   : > { %v2046_v24 = vpop.eup %2045 }
 0x84b   : > { %v1437_v10 = vsel %vm895_vm3, %v2046_v24, 0.0 }
 0x84c   : > { %v2048_v49 = vpop.eup %2047  ;;  %1438 = vadd.xlane.f32.xlu1 %v1437_v10 }
 0x84d   : > { %v1440_v25 = vsel %vm899_vm4, %v2048_v49, 0.0 }
 0x850   : > { %1441 = vadd.xlane.f32.xlu1 %v1440_v25 }
 0x861   : > { %1448 = vrot.lane.b32.xlu1 %v2291_v53, %s2086_s16 }
 0x87a   : > { %v1370_v51 = vpop.f32.mrb[20].mxu0 }
 0x87b   : > { %v1377_v54 = vadd.f32 %v1370_v51, %v2396_v52  ;;  %v1927_v55 = vpop.f32.mrb[21].mxu0  ;;  %v2020_v52 = vld [vmem:[%s2489_s6 + $0x38] sm:$0xff]  }
 0x87c   : > { %v1373_v11 = vpop.f32.mrb[22].mxu0  ;;  %1946 = vmatpush3.bf16.msra.mxu1 %v2020_v52 }
 0x87d   : > { %v1378_v12 = vadd.f32 %v1373_v11, %v2398_v56  ;;  %v1928_v57 = vpop.f32.mrb[23].mxu0 }
 0x8d9   : > { %v1439_v58 = vpop.xlane.xlu1 %1438 }
 0x8da   : > { %2049 = vrcp.f32 %v1439_v58 }
 0x8dd   : > { %v1442_v59 = vpop.xlane.xlu1 %1441 }
 0x8de   : > { %2051 = vrcp.f32 %v1442_v59 }
 0x8e1   : > { %v1449_v53 = vpop.permute.xlu1 %1448 }
 0x8e2   : > { %v1454_v60 = vsel %vm923_vm1, %v1449_v53, 0 }
 0x8e3   : > { %1938 = vmatpush3.bf16.msra.mxu0 %v1454_v60 }
 0x8e4   : > { %v2050_v61 = vpop.eup %2049 }
 0x8e5   : > { %v1444_v63 = vmul.f32 %v2050_v61, %v2046_v24 }
 0x8e8   : > { %v2052_v62 = vpop.eup %2051 }
 0x8e9   : > { %v1446_v1 = vmul.f32 %v2052_v62, %v2048_v49 }
 0x8eb   : > { %v1447_v0 = vpack.c.bf16 %v1446_v1, %v1444_v63 }
 0x8ed   : > { %1940 = vmatmul.mubr.msk.bf16.vlgmr.msra.gmra.mrb[24].mxu0 %vm895_vm3, %v1447_v0 }
 0x9c0   : > { %v1490_v56 = vpop.f32.mrb[24].mxu0 }
 0x9c1   : > { %v1941_v2 = vpop.f32.mrb[25].mxu0 }
 0x9c2   : > { %v1493_v3 = vpop.f32.mrb[26].mxu0 }
 0x9c3   : > { %v1497_v4 = vpack.c.bf16 %v1493_v3, %v1490_v56  ;;  %v1942_v5 = vpop.f32.mrb[27].mxu0 }
 0x9c5   : > { %1948 = vmatmul.mubr.msk.bf16.vlgmr.msra.gmra.mrb[24].mxu1 %vm850_vm2, %v1497_v4 }
 0xa98   : > { %v1547_v6 = vpop.f32.mrb[24].mxu1 }
 0xa99   : > { %v1554_v7 = vadd.f32 %v1547_v6, %v1377_v54  ;;  %v1949_v8 = vpop.f32.mrb[25].mxu1 }
 0xa9a   : > { %v1550_v19 = vpop.f32.mrb[26].mxu1 }
 0xa9b   : > { %v1555_v20 = vadd.f32 %v1550_v19, %v1378_v12  ;;  %v1950_v23 = vpop.f32.mrb[27].mxu1  ;;  %v1563_v29 = vadd.f32 %v1794_v26, %v1554_v7 }
 0xa9d   : > { %v1564_v27 = vadd.f32 %v1794_v26, %v1555_v20  ;;  %v1565_v31 = vadd.f32 %v1563_v29, %v2249_v21 }
 0xa9f   : > { %v1566_v28 = vadd.f32 %v1564_v27, %v2251_v22 }
 0xaa1   : > { %v1570_v30 = vsel %vm1569_vm5, %v1566_v28, 0.0 }
 0xaa2   : > { %1571 = vadd.xlane.f32.xlu0 %v1570_v30 }
 0xaa6   : > { %1567 = vadd.xlane.f32.xlu0 %v1565_v31 }
 0xb2f   : > { %v1572_v45 = vpop.xlane.xlu0 %1571 }
 0xb30   : > { %v1575_v32 = vmul.f32 0.0078125, %v1572_v45 }
 0xb32   : > { %v1577_v13 = vsub.f32 %v1566_v28, %v1575_v32 }
 0xb33   : > { %v1568_v33 = vpop.xlane.xlu0 %1567 }
 0xb34   : > { %v1574_v34 = vmul.f32 0.0078125, %v1568_v33  ;;  %v1579_v35 = vmul.f32 %v1577_v13, %v1577_v13 }
 0xb36   : > { %v1576_v14 = vsub.f32 %v1565_v31, %v1574_v34  ;;  %v1582_v16 = vsel %vm1569_vm5, %v1579_v35, 0.0 }
 0xb38   : > { %v1578_v15 = vmul.f32 %v1576_v14, %v1576_v14 }
 0xb3a   : > { %1580 = vadd.xlane.f32.xlu0 %v1578_v15 }
 0xb3e   : > { %1583 = vadd.xlane.f32.xlu0 %v1582_v16 }
 0xbc7   : > { %v1581_v22 = vpop.xlane.xlu0 %1580 }
 0xbc8   : > { %v1585_v17 = vmul.f32 0.0078125, %v1581_v22 }
 0xbca   : > { %v1587_v18 = vadd.f32 1e-05, %v1585_v17 }
 0xbcb   : > { %v1584_v36 = vpop.xlane.xlu0 %1583 }
 0xbcc   : > { %2053 = vrsqrt.f32 %v1587_v18  ;;  %v1586_v21 = vmul.f32 0.0078125, %v1584_v36 }
 0xbce   : > { %v1588_v37 = vadd.f32 1e-05, %v1586_v21 }
 0xbd0   : > { %2055 = vrsqrt.f32 %v1588_v37 }
 0xbd6   : > { %v2054_v38 = vpop.eup %2053 }
 0xbd7   : > { %v1591_v40 = vmul.f32 %v2054_v38, %v1576_v14 }
 0xbd9   : > { %v1600_v42 = vmul.f32 %v1795_v39, %v1591_v40 }
 0xbda   : > { %v2056_v43 = vpop.eup %2055 }
 0xbdb   : > { %v1609_v44 = vadd.f32 %v1796_v41, %v1600_v42  ;;  %v1592_v46 = vmul.f32 %v2056_v43, %v1577_v13 }
 0xbdd   : > { %1611 = vst [vmem:[%s507_s13] sm:$0xff] %v1609_v44  ;;  %v1601_v47 = vmul.f32 %v1795_v39, %v1592_v46 }
 0xbdf   : > { %v1610_v48 = vadd.f32 %v1796_v41, %v1601_v47 }
 0xbe1   : > { %1612 = vst [vmem:[%s507_s13 + $0x8] sm:$0x3] %v1610_v48 }
 0xbe2 PF: > { %s22_s23 = sadd.s32 1, %s2079_s23   ;;  %s2496_s21 = smov %s2075_s22 }
 0xbe3   : > { %p19_p5 = scmp.ge.s32.totalorder %s22_s23, 4   ;;  %s2497_s22 = smov %s2499_s24 }
 0xbe5   :  { %21 = sbr.rel (!%p19_p5) target bundleno = 2 (0x2), region = 107 }

// kernel: seq2seq_forward.24
= control target key start
LH: loop header
LB: loop body
LE: loop exit
PB: predicated region body
PF: predicated region fallthrough
CT: control target
= control target key end

     0   :  { %v514_v1 = vmov 0   ;;  %v48_v36 = vlaneseq  ;;  %s675_s1 = inlined_call_operand.vmem [shape: bf16[128,256], index: 1, kind: input, shape index: {}]   ;;  %s676_s3 = inlined_call_operand.vmem [shape: bf16[256,128], index: 3, kind: input, shape index: {}]   ;;  %s677_s0 = inlined_call_operand.vmem [shape: f32[16,128], index: 0, kind: input, shape index: {}]   ;;  %s678_s2 = inlined_call_operand.vmem [shape: f32[1,256], index: 2, kind: input, shape index: {}]   ;;  %s679_s4 = inlined_call_operand.vmem [shape: f32[1,128], index: 4, kind: input, shape index: {}]   ;;  %s680_s5 = inlined_call_operand.vmem [shape: f32[1,128], index: 5, kind: input, shape index: {}]   ;;  %s681_s6 = inlined_call_operand.vmem [shape: f32[1,128], index: 6, kind: input, shape index: {}]   ;;  %s682_s7 = inlined_call_operand.vmem [shape: f32[16,128], index: 7, kind: output, shape index: {}]  }
   0x1   :  { %v470_v0 = vld [vmem:[%s675_s1 + $0x4] ss:$8 sps:$4 sm:$0xff]   ;;  %170 = vmatprep.mubr.bf16.mxu0 %v514_v1  ;;  %v472_v2 = vld [vmem:[%s675_s1] ss:$8 sps:$4 sm:$0xff]   ;;  %v473_v3 = vld [vmem:[%s675_s1 + $0x14] ss:$8 sps:$4 sm:$0xff]  }
   0x2   :  { %138 = vmatprep.subr.bf16.mxu0 %v470_v0  ;;  %v475_v4 = vld [vmem:[%s675_s1 + $0x10] ss:$8 sps:$4 sm:$0xff]   ;;  %v476_v5 = vld [vmem:[%s675_s1 + $0x24] ss:$8 sps:$4 sm:$0xff]   ;;  %v478_v6 = vld [vmem:[%s675_s1 + $0x20] ss:$8 sps:$4 sm:$0xff]  }
   0x3   :  { %139 = vmatpush1.bf16.msra.mxu0 %v472_v2  ;;  %v479_v7 = vld [vmem:[%s675_s1 + $0x34] ss:$8 sps:$4 sm:$0xff]   ;;  %v481_v8 = vld [vmem:[%s675_s1 + $0x30] ss:$8 sps:$4 sm:$0xff]   ;;  %v482_v9 = vld [vmem:[%s675_s1 + $0x44] ss:$8 sps:$4 sm:$0xff]  }
   0x4   :  { %140 = vmatprep.subr.bf16.mxu0 %v473_v3  ;;  %v494_v10 = vld [vmem:[%s676_s3 + $0x40] sm:$0xff]   ;;  %v485_v13 = vld [vmem:[%s675_s1 + $0x54] ss:$8 sps:$4 sm:$0xff]   ;;  %v496_v14 = vld [vmem:[%s676_s3 + $0x48] sm:$0xff]   ;;  %v49_v37 = vshrl.u32 %v48_v36, 7 }
   0x5   :  { %v484_v11 = vld [vmem:[%s675_s1 + $0x40] ss:$8 sps:$4 sm:$0xff]   ;;  %447 = vmatprep.subr.bf16.mxu1 %v494_v10  ;;  %v498_v16 = vld [vmem:[%s676_s3 + $0x50] sm:$0xff]   ;;  %v488_v18 = vld [vmem:[%s675_s1 + $0x64] ss:$8 sps:$4 sm:$0xff]  }
   0x6   :  { %v495_v12 = vld [vmem:[%s676_s3] sm:$0xff]   ;;  %v497_v15 = vld [vmem:[%s676_s3 + $0x8] sm:$0xff]   ;;  %v487_v17 = vld [vmem:[%s675_s1 + $0x50] ss:$8 sps:$4 sm:$0xff]   ;;  %v50_v38 = vsub.s32 0, %v49_v37  ;;  %v54_v40 = vsub.s32 1, %v49_v37 }
   0x7   :  { %141 = vmatpush1.bf16.msra.mxu0 %v475_v4  ;;  %448 = vmatpush3.bf16.msra.mxu1 %v495_v12  ;;  %v499_v19 = vld [vmem:[%s676_s3 + $0x10] sm:$0xff]   ;;  %v500_v20 = vld [vmem:[%s676_s3 + $0x58] sm:$0xff]   ;;  %v490_v21 = vld [vmem:[%s675_s1 + $0x60] ss:$8 sps:$4 sm:$0xff]  }
   0x8   :  { %142 = vmatprep.subr.bf16.mxu0 %v476_v5  ;;  %449 = vmatprep.subr.bf16.mxu1 %v496_v14  ;;  %v491_v22 = vld [vmem:[%s675_s1 + $0x74] ss:$8 sps:$4 sm:$0xff]   ;;  %v502_v24 = vld [vmem:[%s676_s3 + $0x60] sm:$0xff]   ;;  %v493_v25 = vld [vmem:[%s675_s1 + $0x70] ss:$8 sps:$4 sm:$0xff]  }
   0x9   :  { %v501_v23 = vld [vmem:[%s676_s3 + $0x18] sm:$0xff]   ;;  %v27_v26 = vld [vmem:[%s677_s0] sm:$0xff]  ;;  %v28_v27 = vld [vmem:[%s677_s0 + $0x8] sm:$0xff] }
   0xa   :  { %v503_v28 = vld [vmem:[%s676_s3 + $0x20] sm:$0xff]   ;;  %v504_v29 = vld [vmem:[%s676_s3 + $0x68] sm:$0xff]   ;;  %v29_v30 = vpack.c.bf16 %v28_v27, %v27_v26  ;;  %v506_v32 = vld [vmem:[%s676_s3 + $0x70] sm:$0xff]  }
   0xb   :  { %143 = vmatpush1.bf16.msra.mxu0 %v478_v6  ;;  %450 = vmatpush3.bf16.msra.mxu1 %v497_v15  ;;  %v505_v31 = vld [vmem:[%s676_s3 + $0x28] sm:$0xff]   ;;  %v507_v33 = vld [vmem:[%s676_s3 + $0x30] sm:$0xff]   ;;  %v508_v34 = vld [vmem:[%s676_s3 + $0x78] sm:$0xff]  }
   0xc   :  { %144 = vmatprep.subr.bf16.mxu0 %v479_v7  ;;  %451 = vmatprep.subr.bf16.mxu1 %v498_v16  ;;  %v509_v35 = vld [vmem:[%s676_s3 + $0x38] sm:$0xff]   ;;  %v46_v39 = vld [vmem:[%s678_s2] sm:$0x3] }
   0xd   :  { %v51_v41 = vrot.slane %v46_v39, %v50_v38  ;;  %v55_v42 = vrot.slane %v46_v39, %v54_v40  ;;  %v428_v58 = vld [vmem:[%s679_s4] ss:$0 sm:$0xff] }
   0xf   :  { %145 = vmatpush1.bf16.msra.mxu0 %v481_v8  ;;  %452 = vmatpush3.bf16.msra.mxu1 %v499_v19  ;;  %v445_v19 = vld [vmem:[%s680_s5] ss:$0 sm:$0xff] }
  0x10   :  { %146 = vmatprep.subr.bf16.mxu0 %v482_v9  ;;  %453 = vmatprep.subr.bf16.mxu1 %v500_v20 }
  0x13   :  { %147 = vmatpush1.bf16.msra.mxu0 %v484_v11  ;;  %454 = vmatpush3.bf16.msra.mxu1 %v501_v23 }
  0x14   :  { %148 = vmatprep.subr.bf16.mxu0 %v485_v13  ;;  %455 = vmatprep.subr.bf16.mxu1 %v502_v24 }
  0x17   :  { %149 = vmatpush1.bf16.msra.mxu0 %v487_v17  ;;  %456 = vmatpush3.bf16.msra.mxu1 %v503_v28 }
  0x18   :  { %150 = vmatprep.subr.bf16.mxu0 %v488_v18  ;;  %457 = vmatprep.subr.bf16.mxu1 %v504_v29 }
  0x1b   :  { %151 = vmatpush1.bf16.msra.mxu0 %v490_v21  ;;  %458 = vmatpush3.bf16.msra.mxu1 %v505_v31  ;;  %v446_v21 = vld [vmem:[%s681_s6] ss:$0 sm:$0xff] }
  0x1c   :  { %152 = vmatprep.subr.bf16.mxu0 %v491_v22  ;;  %459 = vmatprep.subr.bf16.mxu1 %v506_v32 }
  0x1f   :  { %153 = vmatpush1.bf16.msra.mxu0 %v493_v25  ;;  %460 = vmatpush3.bf16.msra.mxu1 %v507_v33 }
  0x20   :  { %461 = vmatprep.subr.bf16.mxu1 %v508_v34 }
  0x22   :  { %171 = vmatmul.mubr.bf16.vlgmr.msra.gmra.mrb[0].mxu0 %v29_v30 }
  0x23   :  { %462 = vmatpush3.bf16.msra.mxu1 %v509_v35 }
  0xf5   :  { %v172_v43 = vpop.f32.mrb[0].mxu0 }
  0xf6   :  { %v173_v44 = vadd.f32 %v172_v43, %v51_v41  ;;  %v174_v45 = vpop.f32.mrb[1].mxu0 }
  0xf7   :  { %v175_v46 = vadd.f32 %v174_v45, %v55_v42  ;;  %v176_v47 = vpop.f32.mrb[2].mxu0 }
  0xf8   :  { %v177_v48 = vadd.f32 %v176_v47, %v51_v41  ;;  %v178_v49 = vpop.f32.mrb[3].mxu0  ;;  %v181_v51 = vmax.f32 %v173_v44, 0.0 }
  0xf9   :  { %v179_v50 = vadd.f32 %v178_v49, %v55_v42  ;;  %v182_v53 = vmax.f32 %v175_v46, 0.0 }
  0xfa   :  { %v183_v52 = vmax.f32 %v177_v48, 0.0 }
  0xfb   :  { %v184_v54 = vmax.f32 %v179_v50, 0.0 }
  0xfc   :  { %v185_v55 = vpack.c.bf16 %v183_v52, %v181_v51 }
  0xfd   :  { %v186_v56 = vpack.c.bf16 %v184_v54, %v182_v53 }
  0xff   :  { %354 = vmatprep.mubr.bf16.mxu1 %v186_v56 }
 0x100   :  { %355 = vmatmul.mubr.bf16.vlgmr.msra.gmra.mrb[0].mxu1 %v185_v55 }
 0x1d3   :  { %v463_v57 = vpop.f32.mrb[0].mxu1 }
 0x1d4   :  { %v464_v59 = vpop.f32.mrb[1].mxu1 }
 0x1d5   :  { %v465_v60 = vadd.f32 %v464_v59, %v463_v57  ;;  %v466_v61 = vpop.f32.mrb[2].mxu1 }
 0x1d6   :  { %v467_v62 = vpop.f32.mrb[3].mxu1 }
 0x1d7   :  { %v357_v63 = vadd.f32 %v465_v60, %v428_v58  ;;  %v468_v0 = vadd.f32 %v467_v62, %v466_v61 }
 0x1d9   :  { %v360_v1 = vadd.f32 %v468_v0, %v428_v58  ;;  %v363_v2 = vadd.f32 %v357_v63, %v27_v26 }
 0x1db   :  { %365 = vadd.xlane.f32.xlu0 %v363_v2  ;;  %v364_v3 = vadd.f32 %v360_v1, %v28_v27 }
 0x1df   :  { %367 = vadd.xlane.f32.xlu0 %v364_v3 }
 0x268   :  { %v366_v4 = vpop.xlane.xlu0 %365 }
 0x269   :  { %v370_v5 = vmul.f32 0.0078125, %v366_v4 }
 0x26b   :  { %v372_v6 = vsub.f32 %v363_v2, %v370_v5 }
 0x26c   :  { %v368_v7 = vpop.xlane.xlu0 %367 }
 0x26d   :  { %v371_v8 = vmul.f32 0.0078125, %v368_v7  ;;  %v374_v9 = vmul.f32 %v372_v6, %v372_v6 }
 0x26f   :  { %v373_v10 = vsub.f32 %v364_v3, %v371_v8  ;;  %376 = vadd.xlane.f32.xlu1 %v374_v9 }
 0x271   :  { %v375_v11 = vmul.f32 %v373_v10, %v373_v10 }
 0x273   :  { %378 = vadd.xlane.f32.xlu1 %v375_v11 }
 0x2fc   :  { %v377_v12 = vpop.xlane.xlu1 %376 }
 0x2fd   :  { %v380_v13 = vmul.f32 0.0078125, %v377_v12 }
 0x2ff   :  { %v382_v14 = vadd.f32 1e-05, %v380_v13 }
 0x300   :  { %v379_v15 = vpop.xlane.xlu1 %378 }
 0x301   :  { %510 = vrsqrt.f32 %v382_v14  ;;  %v381_v16 = vmul.f32 0.0078125, %v379_v15 }
 0x303   :  { %v383_v17 = vadd.f32 1e-05, %v381_v16 }
 0x305   :  { %512 = vrsqrt.f32 %v383_v17 }
 0x30b   :  { %v511_v18 = vpop.eup %510 }
 0x30c   :  { %v386_v20 = vmul.f32 %v511_v18, %v372_v6 }
 0x30e   :  { %v395_v22 = vmul.f32 %v445_v19, %v386_v20 }
 0x30f   :  { %v513_v23 = vpop.eup %512 }
 0x310   :  { %v404_v24 = vadd.f32 %v446_v21, %v395_v22  ;;  %v387_v25 = vmul.f32 %v513_v23, %v373_v10 }
 0x312   :  { %406 = vst [vmem:[%s682_s7] sm:$0xff] %v404_v24  ;;  %v396_v26 = vmul.f32 %v445_v19, %v387_v25 }
 0x314   :  { %v405_v27 = vadd.f32 %v446_v21, %v396_v26 }
 0x316   :  { %407 = vst [vmem:[%s682_s7 + $0x8] sm:$0xff] %v405_v27 }

// kernel: seq2seq_forward.22
= control target key start
LH: loop header
LB: loop body
LE: loop exit
PB: predicated region body
PF: predicated region fallthrough
CT: control target
= control target key end

     0   :  { %s2009_s21 = smov 0   ;;  %s2011_s22 = smov 0   ;;  %s2285_s0 = inlined_call_operand.vmem [shape: f32[2,8,128], index: 0, kind: input, shape index: {}, may-alias: {0,1}]   ;;  %s2286_s1 = inlined_call_operand.vmem [shape: f32[2,8,128], index: 1, kind: input, shape index: {}, may-alias: {0,1}]   ;;  %s2287_s2 = inlined_call_operand.vmem [shape: bf16[128,128], index: 2, kind: input, shape index: {}]   ;;  %s2288_s3 = inlined_call_operand.vmem [shape: f32[1,128], index: 3, kind: input, shape index: {}]   ;;  %s2289_s4 = inlined_call_operand.vmem [shape: bf16[128,256], index: 4, kind: input, shape index: {}]   ;;  %s2290_s5 = inlined_call_operand.vmem [shape: f32[1,256], index: 5, kind: input, shape index: {}]   ;;  %s2291_s6 = inlined_call_operand.vmem [shape: bf16[128,128], index: 6, kind: input, shape index: {}]   ;;  %s2292_s7 = inlined_call_operand.vmem [shape: f32[1,128], index: 7, kind: input, shape index: {}]   ;;  %s2293_s8 = inlined_call_operand.vmem [shape: f32[8,8], index: 8, kind: input, shape index: {}]   ;;  %s2294_s9 = inlined_call_operand.vmem [shape: f32[2,1,8], index: 9, kind: input, shape index: {}]   ;;  %s2295_s10 = inlined_call_operand.vmem [shape: f32[1,128], index: 10, kind: input, shape index: {}]   ;;  %s2296_s11 = inlined_call_operand.vmem [shape: f32[1,128], index: 11, kind: input, shape index: {}]   ;;  %s2297_s12 = inlined_call_operand.vmem [shape: f32[2,8,128], index: 12, kind: output, shape index: {}]  }
   0x1   :  { %s2013_s23 = smov 0  }
   0x2 LB: > { %s34_s24 = sadd.s32 1, %s1932_s22  ;;  %p1622_p0 = scmp.ge.s32.totalorder %s1936_s23, 1  ;;  %s1936_s23 = sphi %s2013_s23, %s22_s23   ;;  %s1932_s22 = sphi %s2011_s22, %s2299_s22   ;;  %s1928_s21 = sphi %s2009_s21, %s2298_s21  }
   0x3   : > { %p36_p1 = scmp.ge.s32.totalorder %s34_s24, 2  ;;  %p406_p2 = scmp.lt.s32.totalorder %s1936_s23, 3 }
   0x5   : > { %s2301_s24 = smov (%p36_p1, %s34_s24), 0  ;;  %p407_p3 = pnand %p1622_p0, %p406_p2 }
   0x6   : > { %v1856_v0 = vld [vmem:[%s2287_s2] sm:$0xff] (!%p407_p3)   ;;  %v1938_v1 = vmov (!%p407_p3), 0.0   ;;  %v1857_v2 = vld [vmem:[%s2287_s2 + $0x8] sm:$0xff] (!%p407_p3)   ;;  %vm1939_vm0 = vmmov (!%p407_p3), 0   ;;  %v1940_v3 = vmov (!%p407_p3), 0   ;;  %v1858_v4 = vld [vmem:[%s2287_s2 + $0x10] sm:$0xff] (!%p407_p3)   ;;  %v622_v30 = vlaneseq (!%p407_p3) }
   0x7   : > { %410 = sbr.rel (%p407_p3) target bundleno = 3013 (0xbc5), region = 68  ;;  %1718 = vmatprep.subr.bf16.mxu0 (!%p407_p3), %v1938_v1  ;;  %1734 = vmatprep.mubr.msk.bf16.mxu0 (!%p407_p3), %vm1939_vm0, %v1938_v1  ;;  %v1864_v5 = vld [vmem:[%s2289_s4 + $0x4] ss:$8 sps:$4 sm:$0xff] (!%p407_p3)   ;;  %v1866_v6 = vld [vmem:[%s2289_s4] ss:$8 sps:$4 sm:$0xff] (!%p407_p3)   ;;  %v1859_v7 = vld [vmem:[%s2287_s2 + $0x18] sm:$0xff] (!%p407_p3)  }
   0x8   : > { %1719 = vmatpush3.bf16.msra.mxu0 (!%p407_p3), %v1856_v0  ;;  %744 = vmatprep.mubr.bf16.mxu1 (!%p407_p3), %v1940_v3  ;;  %p463_p4 = scmp.lt.s32.totalorder (!%p407_p3), %s1928_s21, 1  ;;  %v1867_v8 = vld [vmem:[%s2289_s4 + $0x14] ss:$8 sps:$4 sm:$0xff] (!%p407_p3)   ;;  %v1869_v9 = vld [vmem:[%s2289_s4 + $0x10] ss:$8 sps:$4 sm:$0xff] (!%p407_p3)   ;;  %v1860_v11 = vld [vmem:[%s2287_s2 + $0x20] sm:$0xff] (!%p407_p3)  }
   0x9   : > { %1720 = vmatprep.subr.bf16.mxu0 (!%p407_p3), %v1938_v1  ;;  %712 = vmatprep.subr.bf16.mxu1 (!%p407_p3), %v1864_v5  ;;  %v1870_v10 = vld [vmem:[%s2289_s4 + $0x24] ss:$8 sps:$4 sm:$0xff] (!%p407_p3)   ;;  %v1872_v12 = vld [vmem:[%s2289_s4 + $0x20] ss:$8 sps:$4 sm:$0xff] (!%p407_p3)   ;;  %v1873_v13 = vld [vmem:[%s2289_s4 + $0x34] ss:$8 sps:$4 sm:$0xff] (!%p407_p3)  }
   0xa   : > { %713 = vmatpush1.bf16.msra.mxu1 (!%p407_p3), %v1866_v6  ;;  %v1861_v14 = vld [vmem:[%s2287_s2 + $0x28] sm:$0xff] (!%p407_p3)   ;;  %v1875_v15 = vld [vmem:[%s2289_s4 + $0x30] ss:$8 sps:$4 sm:$0xff] (!%p407_p3)   ;;  %v1879_v19 = vld [vmem:[%s2289_s4 + $0x54] ss:$8 sps:$4 sm:$0xff] (!%p407_p3)   ;;  %v623_v32 = vshrl.u32 (!%p407_p3), %v622_v30, 7 }
   0xb   : > { %714 = vmatprep.subr.bf16.mxu1 (!%p407_p3), %v1867_v8  ;;  %v1876_v16 = vld [vmem:[%s2289_s4 + $0x44] ss:$8 sps:$4 sm:$0xff] (!%p407_p3)   ;;  %v1862_v17 = vld [vmem:[%s2287_s2 + $0x30] sm:$0xff] (!%p407_p3)   ;;  %v1878_v18 = vld [vmem:[%s2289_s4 + $0x40] ss:$8 sps:$4 sm:$0xff] (!%p407_p3)   ;;  %s1941_s30 = smov (!%p407_p3), 96  }
   0xc   : > { %1721 = vmatpush3.bf16.msra.mxu0 (!%p407_p3), %v1857_v2  ;;  %v1863_v20 = vld [vmem:[%s2287_s2 + $0x38] sm:$0xff] (!%p407_p3)   ;;  %v1882_v23 = vld [vmem:[%s2289_s4 + $0x64] ss:$8 sps:$4 sm:$0xff] (!%p407_p3)   ;;  %v1884_v25 = vld [vmem:[%s2289_s4 + $0x60] ss:$8 sps:$4 sm:$0xff] (!%p407_p3)   ;;  %v628_v39 = vsub.s32 (!%p407_p3), 1, %v623_v32 }
   0xd   : > { %1722 = vmatprep.subr.bf16.mxu0 (!%p407_p3), %v1938_v1  ;;  %v1881_v22 = vld [vmem:[%s2289_s4 + $0x50] ss:$8 sps:$4 sm:$0xff] (!%p407_p3)   ;;  %v1885_v26 = vld [vmem:[%s2289_s4 + $0x74] ss:$8 sps:$4 sm:$0xff] (!%p407_p3)   ;;  %v1626_v31 = vld [vmem:[%s2288_s3] ss:$0 sm:$0xff] (!%p407_p3) }
   0xe   : > { %s2303_s21 = smov (!%p463_p4, %s1928_s21), 1  ;;  %715 = vmatpush1.bf16.msra.mxu1 %v1869_v9  ;;  %v1887_v27 = vld [vmem:[%s2289_s4 + $0x70] ss:$8 sps:$4 sm:$0xff]   ;;  %v620_v40 = vld [vmem:[%s2290_s5] sm:$0x3]  ;;  %vm881_vm1 = vcmask 1043456  }
   0xf   : > { %716 = vmatprep.subr.bf16.mxu1 %v1870_v10  ;;  %s2080_s19 = sshll.u32 %s2303_s21, 3  ;;  %v629_v42 = vrot.slane %v620_v40, %v628_v39  ;;  %v624_v50 = vsub.s32 0, %v623_v32  ;;  %vm821_vm2 = vcmask 261120   ;;  %s480_s15 = scalar_lea.vmem %s2294_s9, %s2303_s21  ;;  %v794_v3 = vld [vmem:[%s2293_s8] sm:$0xff]  ;;  %vm865_vm3 = vcmask 64512  }
  0x10   : > { %1723 = vmatpush3.bf16.msra.mxu0 %v1858_v4  ;;  %s469_s18 = scalar_lea.vmem %s2285_s0, %s2080_s19  ;;  %v1651_v4 = vld [vmem:[%s480_s15] ss:$0 sm:$0xff]  ;;  %s1942_s21 = smov 64  }
  0x11   : > { %1724 = vmatprep.subr.bf16.mxu0 %v1938_v1  ;;  %v2106_v21 = vld [vmem:[%s469_s18] sm:$0xff]  ;;  %s473_s18 = scalar_lea.vmem %s2286_s1, %s2080_s19  ;;  %v625_v51 = vrot.slane %v620_v40, %v624_v50  ;;  %v2169_v5 = vadd.f32 %v1651_v4, %v794_v3  ;;  %v1889_v40 = vld [vmem:[%s2291_s6 + $0x8] sm:$0xff]   ;;  %s1943_s13 = smov 32  }
  0x12   : > { %717 = vmatpush1.bf16.msra.mxu1 %v1872_v12  ;;  %v490_v24 = vpack.c.bf16 %v2106_v21, %v2106_v21  ;;  %v491_v28 = vld [vmem:[%s473_s18] sm:$0xff]  ;;  %s487_s16 = scalar_lea.vmem %s2297_s12, %s2080_s19 }
  0x13   : > { %718 = vmatprep.subr.bf16.mxu1 %v1873_v13  ;;  %v492_v29 = vpack.c.bf16 %v491_v28, %v491_v28 }
  0x14   : > { %1725 = vmatpush3.bf16.msra.mxu0 %v1859_v7 }
  0x15   : > { %1726 = vmatprep.subr.bf16.mxu0 %v1938_v1 }
  0x16   : > { %719 = vmatpush1.bf16.msra.mxu1 %v1875_v15 }
  0x17   : > { %720 = vmatprep.subr.bf16.mxu1 %v1876_v16 }
  0x18   : > { %1727 = vmatpush3.bf16.msra.mxu0 %v1860_v11 }
  0x19   : > { %1728 = vmatprep.subr.bf16.mxu0 %v1938_v1 }
  0x1a   : > { %721 = vmatpush1.bf16.msra.mxu1 %v1878_v18 }
  0x1b   : > { %722 = vmatprep.subr.bf16.mxu1 %v1879_v19 }
  0x1c   : > { %1729 = vmatpush3.bf16.msra.mxu0 %v1861_v14 }
  0x1d   : > { %1730 = vmatprep.subr.bf16.mxu0 %v1938_v1 }
  0x1e   : > { %723 = vmatpush1.bf16.msra.mxu1 %v1881_v22 }
  0x1f   : > { %724 = vmatprep.subr.bf16.mxu1 %v1882_v23 }
  0x20   : > { %1731 = vmatpush3.bf16.msra.mxu0 %v1862_v17 }
  0x21   : > { %1732 = vmatprep.subr.bf16.mxu0 %v1938_v1 }
  0x22   : > { %725 = vmatpush1.bf16.msra.mxu1 %v1884_v25 }
  0x23   : > { %726 = vmatprep.subr.bf16.mxu1 %v1885_v26 }
  0x24   : > { %1733 = vmatpush3.bf16.msra.mxu0 %v1863_v20 }
  0x25   : > { %1738 = vmatprep.subr.bf16.mxu0 %v1938_v1 }
  0x26   : > { %727 = vmatpush1.bf16.msra.mxu1 %v1887_v27 }
  0x27   : > { %1735 = vmatmul.mubr.bf16.vlgmr.msra.gmra.mrb[0].mxu0 %v490_v24  ;;  %1746 = vmatprep.subr.bf16.mxu1 %v1938_v1 }
  0x28   : > { %1742 = vmatprep.mubr.msk.bf16.mxu0 %vm1939_vm0, %v1938_v1 }
  0x29   : > { %745 = vmatmul.mubr.bf16.vlgmr.msra.gmra.mrb[0].mxu1 %v492_v29 }
  0x2a   : > { %1748 = vmatprep.mubr.msk.bf16.mxu1 %vm1939_vm0, %v1938_v1 }
  0xfa   : > { %v598_v33 = vpop.f32.mrb[0].mxu0 }
  0xfb   : > { %v599_v34 = vadd.f32 %v1626_v31, %v598_v33  ;;  %v1736_v35 = vpop.f32.mrb[1].mxu0 }
  0xfc   : > { %v601_v36 = vpop.f32.mrb[2].mxu0  ;;  %v746_v43 = vpop.f32.mrb[0].mxu1 }
  0xfd   : > { %v819_v37 = vmul.f32 0.17677669, %v599_v34  ;;  %v1737_v38 = vpop.f32.mrb[3].mxu0  ;;  %v748_v44 = vpop.f32.mrb[1].mxu1  ;;  %v747_v52 = vadd.f32 %v746_v43, %v625_v51  ;;  %v1891_v43 = vld [vmem:[%s2291_s6 + $0x18] sm:$0xff]  }
  0xfe   : > { %v749_v45 = vadd.f32 %v748_v44, %v629_v42  ;;  %v750_v46 = vpop.f32.mrb[2].mxu1  ;;  %v1888_v38 = vld [vmem:[%s2291_s6] sm:$0xff]   ;;  %v1890_v42 = vld [vmem:[%s2291_s6 + $0x10] sm:$0xff]  }
  0xff   : > { %v2142_v41 = vpack.c.bf16 %v819_v37, %v819_v37  ;;  %v751_v47 = vpop.f32.mrb[3].mxu1 }
 0x100   : > { %v2146_v48 = vpack.c.bf16 %v749_v45, %v749_v45 }
 0x101   : > { %927 = vrot.lane.b32.xlu0 %v2142_v41, %s1941_s30 }
 0x102   : > { %v883_v49 = vsel %vm881_vm1, %v2146_v48, 0 }
 0x103   : > { %1747 = vmatpush3.bf16.msra.mxu1 %v883_v49 }
 0x104   : > { %1760 = vmatprep.subr.bf16.mxu1 %v1938_v1 }
 0x11f   : > { %754 = vxpose.xlu0.b32.start.end [1/1] (short) %v747_v52, 128 }
 0x173   : > { %v928_v53 = vpop.permute.xlu0 %927 }
 0x19f   : > { %v770_v54 = vpop.trf.xlu0 }
 0x1a3   : > { %v771_v55 = vpop.trf.xlu0 }
 0x1a4   : > { %v786_v56 = vpack.c.bf16 %v771_v55, %v770_v54 }
 0x1a6   : > { %1739 = vmatpush3.bf16.msra.mxu0 %v786_v56 }
 0x1a7   : > { %v772_v57 = vpop.trf.xlu0  ;;  %1740 = vmatprep.subr.bf16.mxu0 %v1938_v1 }
 0x1ab   : > { %v773_v58 = vpop.trf.xlu0 }
 0x1ac   : > { %v787_v59 = vpack.c.bf16 %v773_v58, %v772_v57 }
 0x1ae   : > { %1741 = vmatpush3.bf16.msra.mxu0 %v787_v59 }
 0x1af   : > { %v774_v60 = vpop.trf.xlu0  ;;  %1752 = vmatprep.subr.bf16.mxu0 %v1938_v1 }
 0x1b1   : > { %1743 = vmatmul.mubr.msk.bf16.vlgmr.msra.gmra.mrb[4].mxu0 %vm821_vm2, %v2142_v41 }
 0x1b2   : > { %1756 = vmatprep.mubr.msk.bf16.mxu0 %vm1939_vm0, %v1938_v1 }
 0x1b3   : > { %v775_v61 = vpop.trf.xlu0 }
 0x1b4   : > { %v788_v62 = vpack.c.bf16 %v775_v61, %v774_v60 }
 0x1b6   : > { %1753 = vmatpush3.bf16.msra.mxu0 %v788_v62 }
 0x1b7   : > { %v776_v63 = vpop.trf.xlu0  ;;  %1754 = vmatprep.subr.bf16.mxu0 %v1938_v1 }
 0x1bb   : > { %v777_v0 = vpop.trf.xlu0 }
 0x1bc   : > { %v789_v2 = vpack.c.bf16 %v777_v0, %v776_v63 }
 0x1be   : > { %1755 = vmatpush3.bf16.msra.mxu0 %v789_v2 }
 0x1bf   : > { %1766 = vmatprep.subr.bf16.mxu0 %v1938_v1  ;;  %v778_v47 = vpop.trf.xlu0 }
 0x1c1   : > { %1757 = vmatmul.mubr.msk.bf16.vlgmr.msra.gmra.mrb[8].mxu0 %vm821_vm2, %v928_v53 }
 0x1c2   : > { %1770 = vmatprep.mubr.msk.bf16.mxu0 %vm1939_vm0, %v1938_v1  ;;  %1767 = vmatpush3.bf16.msra.mxu0 %v1890_v42 }
 0x1c3   : > { %1768 = vmatprep.subr.bf16.mxu0 %v1938_v1  ;;  %v779_v51 = vpop.trf.xlu0 }
 0x1c4   : > { %v790_v56 = vpack.c.bf16 %v779_v51, %v778_v47 }
 0x1c6   : > { %1769 = vmatpush3.bf16.msra.mxu0 %v1891_v43 }
 0x1c7   : > { %1782 = vmatprep.subr.bf16.mxu0 %v1938_v1  ;;  %v780_v52 = vpop.trf.xlu0 }
 0x1cb   : > { %v781_v58 = vpop.trf.xlu0 }
 0x1cc   : > { %v791_v60 = vpack.c.bf16 %v781_v58, %v780_v52 }
 0x1cf   : > { %v782_v62 = vpop.trf.xlu0 }
 0x1d3   : > { %v783_v63 = vpop.trf.xlu0 }
 0x1d4   : > { %v792_v0 = vpack.c.bf16 %v783_v63, %v782_v62 }
 0x284   : > { %v859_v6 = vpop.f32.mrb[4].mxu0 }
 0x285   : > { %v860_v7 = vadd.f32 %v859_v6, %v2169_v5  ;;  %v1744_v8 = vpop.f32.mrb[5].mxu0 }
 0x286   : > { %v862_v9 = vpop.f32.mrb[6].mxu0 }
 0x287   : > { %v1745_v10 = vpop.f32.mrb[7].mxu0  ;;  %v866_v11 = vsel %vm865_vm3, %v860_v7, -inf }
 0x288   : > { %867 = vmax.xlane.f32.xlu1 %v866_v11 }
 0x294   : > { %v966_v12 = vpop.f32.mrb[8].mxu0 }
 0x295   : > { %v967_v13 = vadd.f32 %v966_v12, %v2169_v5  ;;  %v1758_v14 = vpop.f32.mrb[9].mxu0 }
 0x296   : > { %v969_v15 = vpop.f32.mrb[10].mxu0 }
 0x297   : > { %v1759_v16 = vpop.f32.mrb[11].mxu0  ;;  %v972_v17 = vsel %vm865_vm3, %v967_v13, -inf }
 0x298   : > { %973 = vmax.xlane.f32.xlu1 %v972_v17 }
 0x315   : > { %v868_v18 = vpop.xlane.xlu1 %867 }
 0x316   : > { %v869_v19 = vsub.f32 %v860_v7, %v868_v18  ;;  %v784_v18 = vpop.trf.xlu0 }
 0x318   : > { %v870_v20 = vmul.f32 1.442695, %v869_v19 }
 0x31a   : > { %1896 = vpow2.f32 %v870_v20  ;;  %v785_v19 = vpop.trf.xlu0 }
 0x324   : > { %v1897_v22 = vpop.eup %1896 }
 0x325   : > { %v974_v23 = vpop.xlane.xlu1 %973  ;;  %v872_v24 = vsel %vm865_vm3, %v1897_v22, 0.0 }
 0x326   : > { %v975_v25 = vsub.f32 %v967_v13, %v974_v23  ;;  %873 = vadd.xlane.f32.xlu1 %v872_v24 }
 0x328   : > { %v976_v26 = vmul.f32 1.442695, %v975_v25 }
 0x32a   : > { %1898 = vpow2.f32 %v976_v26  ;;  %v1892_v26 = vld [vmem:[%s2291_s6 + $0x20] sm:$0xff]  }
 0x334   : > { %v1899_v27 = vpop.eup %1898 }
 0x335   : > { %v978_v28 = vsel %vm865_vm3, %v1899_v27, 0.0 }
 0x336   : > { %979 = vadd.xlane.f32.xlu1 %v978_v28 }
 0x347   : > { %985 = vrot.lane.b32.xlu1 %v2146_v48, %s1941_s30 }
 0x34b   : > { %1144 = vrot.lane.b32.xlu1 %v2142_v41, %s1942_s21 }
 0x3b3   : > { %v874_v29 = vpop.xlane.xlu1 %873 }
 0x3b4   : > { %1900 = vrcp.f32 %v874_v29 }
 0x3be   : > { %v1901_v30 = vpop.eup %1900 }
 0x3bf   : > { %v876_v31 = vmul.f32 %v1901_v30, %v1897_v22 }
 0x3c1   : > { %v877_v32 = vpack.c.bf16 %v876_v31, %v876_v31 }
 0x3c3   : > { %1749 = vmatmul.mubr.msk.bf16.vlgmr.msra.gmra.mrb[4].mxu1 %vm865_vm3, %v877_v32  ;;  %v980_v33 = vpop.xlane.xlu1 %979 }
 0x3c4   : > { %1902 = vrcp.f32 %v980_v33  ;;  %1762 = vmatprep.mubr.msk.bf16.mxu1 %vm1939_vm0, %v1938_v1 }
 0x3c7   : > { %v986_v34 = vpop.permute.xlu1 %985 }
 0x3c8   : > { %v991_v35 = vsel %vm881_vm1, %v986_v34, 0  ;;  %v1893_v34 = vld [vmem:[%s2291_s6 + $0x28] sm:$0xff]  }
 0x3c9   : > { %1761 = vmatpush3.bf16.msra.mxu1 %v991_v35 }
 0x3ca   : > { %1774 = vmatprep.subr.bf16.mxu1 %v1938_v1 }
 0x3cb   : > { %v1145_v61 = vpop.permute.xlu1 %1144 }
 0x3ce   : > { %v1903_v36 = vpop.eup %1902 }
 0x3cf   : > { %v982_v37 = vmul.f32 %v1903_v36, %v1899_v27 }
 0x3d1   : > { %v983_v39 = vpack.c.bf16 %v982_v37, %v982_v37 }
 0x3d3   : > { %1763 = vmatmul.mubr.msk.bf16.vlgmr.msra.gmra.mrb[8].mxu1 %vm865_vm3, %v983_v39 }
 0x3d4   : > { %1775 = vmatpush3.bf16.msra.mxu1 %v1888_v38  ;;  %1778 = vmatprep.mubr.msk.bf16.mxu1 %vm1939_vm0, %v1938_v1 }
 0x3d5   : > { %1776 = vmatprep.subr.bf16.mxu1 %v1938_v1 }
 0x3d8   : > { %1777 = vmatpush3.bf16.msra.mxu1 %v1889_v40 }
 0x3d9   : > { %1790 = vmatprep.subr.bf16.mxu1 %v1938_v1 }
 0x496   : > { %v919_v44 = vpop.f32.mrb[4].mxu1 }
 0x497   : > { %v925_v45 = vpack.c.bf16 %v919_v44, %v919_v44  ;;  %v1750_v46 = vpop.f32.mrb[5].mxu1 }
 0x498   : > { %v922_v49 = vpop.f32.mrb[6].mxu1 }
 0x499   : > { %v1751_v50 = vpop.f32.mrb[7].mxu1  ;;  %1779 = vmatmul.mubr.msk.bf16.vlgmr.msra.gmra.mrb[12].mxu1 %vm821_vm2, %v925_v45 }
 0x49a   : > { %1792 = vmatprep.mubr.msk.bf16.mxu1 %vm1939_vm0, %v1938_v1 }
 0x4a6   : > { %v1027_v53 = vpop.f32.mrb[8].mxu1 }
 0x4a7   : > { %v1033_v54 = vpack.c.bf16 %v1027_v53, %v1027_v53  ;;  %v1764_v55 = vpop.f32.mrb[9].mxu1 }
 0x4a8   : > { %v1030_v57 = vpop.f32.mrb[10].mxu1 }
 0x4a9   : > { %v1765_v59 = vpop.f32.mrb[11].mxu1  ;;  %1771 = vmatmul.mubr.msk.bf16.vlgmr.msra.gmra.mrb[12].mxu0 %vm821_vm2, %v1033_v54 }
 0x4aa   : > { %1783 = vmatpush3.bf16.msra.mxu0 %v790_v56  ;;  %1786 = vmatprep.mubr.msk.bf16.mxu0 %vm1939_vm0, %v1938_v1 }
 0x4ab   : > { %1784 = vmatprep.subr.bf16.mxu0 %v1938_v1 }
 0x4ae   : > { %1785 = vmatpush3.bf16.msra.mxu0 %v791_v60 }
 0x4af   : > { %1796 = vmatprep.subr.bf16.mxu0 %v1938_v1 }
 0x4b1   : > { %1787 = vmatmul.mubr.msk.bf16.vlgmr.msra.gmra.mrb[16].mxu0 %vm821_vm2, %v1145_v61 }
 0x4b2   : > { %1800 = vmatprep.mubr.msk.bf16.mxu0 %vm1939_vm0, %v1938_v1  ;;  %1797 = vmatpush3.bf16.msra.mxu0 %v1892_v26 }
 0x4b3   : > { %1798 = vmatprep.subr.bf16.mxu0 %v1938_v1 }
 0x4b6   : > { %1799 = vmatpush3.bf16.msra.mxu0 %v1893_v34 }
 0x4b7   : > { %1812 = vmatprep.subr.bf16.mxu0 %v1938_v1 }
 0x56c   : > { %v1138_v2 = vpop.f32.mrb[12].mxu1 }
 0x56d   : > { %v1780_v3 = vpop.f32.mrb[13].mxu1 }
 0x56e   : > { %v1141_v4 = vpop.f32.mrb[14].mxu1 }
 0x56f   : > { %v1781_v6 = vpop.f32.mrb[15].mxu1 }
 0x57c   : > { %v1083_v7 = vpop.f32.mrb[12].mxu0 }
 0x57d   : > { %v2216_v8 = vadd.f32 %v1138_v2, %v1083_v7  ;;  %v1772_v9 = vpop.f32.mrb[13].mxu0  ;;  %v1672_v7 = vld [vmem:[%s2292_s7] ss:$0 sm:$0xff] }
 0x57e   : > { %v1086_v10 = vpop.f32.mrb[14].mxu0 }
 0x57f   : > { %v1773_v11 = vpop.f32.mrb[15].mxu0 }
 0x584   : > { %v1183_v12 = vpop.f32.mrb[16].mxu0 }
 0x585   : > { %v1184_v13 = vadd.f32 %v1183_v12, %v2169_v5  ;;  %v1788_v14 = vpop.f32.mrb[17].mxu0 }
 0x586   : > { %v1186_v15 = vpop.f32.mrb[18].mxu0 }
 0x587   : > { %v1789_v16 = vpop.f32.mrb[19].mxu0  ;;  %v1189_v17 = vsel %vm865_vm3, %v1184_v13, -inf }
 0x588   : > { %1190 = vmax.xlane.f32.xlu0 %v1189_v17 }
 0x615   : > { %v1191_v20 = vpop.xlane.xlu0 %1190 }
 0x616   : > { %v1192_v22 = vsub.f32 %v1184_v13, %v1191_v20 }
 0x618   : > { %v1193_v23 = vmul.f32 1.442695, %v1192_v22 }
 0x61a   : > { %1904 = vpow2.f32 %v1193_v23  ;;  %v1673_v23 = vld [vmem:[%s2295_s10] ss:$0 sm:$0xff] }
 0x624   : > { %v1905_v24 = vpop.eup %1904 }
 0x625   : > { %v1195_v25 = vsel %vm865_vm3, %v1905_v24, 0.0 }
 0x626   : > { %1196 = vadd.xlane.f32.xlu1 %v1195_v25 }
 0x637   : > { %1201 = vrot.lane.b32.xlu1 %v2146_v48, %s1942_s21 }
 0x63b   : > { %1306 = vrot.lane.b32.xlu1 %v2142_v41, %s1943_s13  ;;  %v793_v41 = vpack.c.bf16 %v785_v19, %v784_v18 }
 0x6b3   : > { %v1197_v27 = vpop.xlane.xlu1 %1196 }
 0x6b4   : > { %1906 = vrcp.f32 %v1197_v27 }
 0x6b7   : > { %v1202_v28 = vpop.permute.xlu1 %1201 }
 0x6b8   : > { %v1207_v29 = vsel %vm881_vm1, %v1202_v28, 0 }
 0x6b9   : > { %1791 = vmatpush3.bf16.msra.mxu1 %v1207_v29 }
 0x6ba   : > { %1804 = vmatprep.subr.bf16.mxu1 %v1938_v1 }
 0x6bb   : > { %v1307_v33 = vpop.permute.xlu1 %1306 }
 0x6be   : > { %v1907_v30 = vpop.eup %1906 }
 0x6bf   : > { %v1199_v31 = vmul.f32 %v1907_v30, %v1905_v24 }
 0x6c1   : > { %v1200_v32 = vpack.c.bf16 %v1199_v31, %v1199_v31 }
 0x6c3   : > { %1793 = vmatmul.mubr.msk.bf16.vlgmr.msra.gmra.mrb[16].mxu1 %vm865_vm3, %v1200_v32 }
 0x6c4   : > { %1805 = vmatpush3.bf16.msra.mxu1 %v792_v0  ;;  %1808 = vmatprep.mubr.msk.bf16.mxu1 %vm1939_vm0, %v1938_v1 }
 0x6c5   : > { %1806 = vmatprep.subr.bf16.mxu1 %v1938_v1 }
 0x6c8   : > { %1807 = vmatpush3.bf16.msra.mxu1 %v793_v41 }
 0x6c9   : > { %1818 = vmatprep.subr.bf16.mxu1 %v1938_v1 }
 0x6cb   : > { %1809 = vmatmul.mubr.msk.bf16.vlgmr.msra.gmra.mrb[20].mxu1 %vm821_vm2, %v1307_v33 }
 0x6cc   : > { %1822 = vmatprep.mubr.msk.bf16.mxu1 %vm1939_vm0, %v1938_v1 }
 0x796   : > { %v1243_v35 = vpop.f32.mrb[16].mxu1 }
 0x797   : > { %v1249_v36 = vpack.c.bf16 %v1243_v35, %v1243_v35  ;;  %v1794_v37 = vpop.f32.mrb[17].mxu1 }
 0x798   : > { %v1246_v38 = vpop.f32.mrb[18].mxu1 }
 0x799   : > { %v1795_v39 = vpop.f32.mrb[19].mxu1  ;;  %1801 = vmatmul.mubr.msk.bf16.vlgmr.msra.gmra.mrb[20].mxu0 %vm821_vm2, %v1249_v36 }
 0x79a   : > { %1814 = vmatprep.mubr.msk.bf16.mxu0 %vm1939_vm0, %v1938_v1 }
 0x79e   : > { %v1345_v40 = vpop.f32.mrb[20].mxu1 }
 0x79f   : > { %v1346_v42 = vadd.f32 %v1345_v40, %v2169_v5  ;;  %v1810_v43 = vpop.f32.mrb[21].mxu1  ;;  %v1894_v5 = vld [vmem:[%s2291_s6 + $0x30] sm:$0xff]  }
 0x7a0   : > { %v1348_v44 = vpop.f32.mrb[22].mxu1  ;;  %1819 = vmatpush3.bf16.msra.mxu1 %v1894_v5 }
 0x7a1   : > { %v1811_v45 = vpop.f32.mrb[23].mxu1  ;;  %v1351_v46 = vsel %vm865_vm3, %v1346_v42, -inf  ;;  %1820 = vmatprep.subr.bf16.mxu1 %v1938_v1  ;;  %v1895_v1 = vld [vmem:[%s2291_s6 + $0x38] sm:$0xff]  }
 0x7a2   : > { %1352 = vmax.xlane.f32.xlu1 %v1351_v46 }
 0x7a4   : > { %1821 = vmatpush3.bf16.msra.mxu1 %v1895_v1 }
 0x82f   : > { %v1353_v47 = vpop.xlane.xlu1 %1352 }
 0x830   : > { %v1354_v49 = vsub.f32 %v1346_v42, %v1353_v47 }
 0x832   : > { %v1355_v50 = vmul.f32 1.442695, %v1354_v49 }
 0x834   : > { %1908 = vpow2.f32 %v1355_v50 }
 0x83e   : > { %v1909_v51 = vpop.eup %1908 }
 0x83f   : > { %v1357_v52 = vsel %vm865_vm3, %v1909_v51, 0.0 }
 0x840   : > { %1358 = vadd.xlane.f32.xlu1 %v1357_v52 }
 0x851   : > { %1363 = vrot.lane.b32.xlu1 %v2146_v48, %s1943_s13 }
 0x86c   : > { %v1299_v53 = vpop.f32.mrb[20].mxu0 }
 0x86d   : > { %v1305_v54 = vadd.f32 %v1299_v53, %v2216_v8  ;;  %v1802_v55 = vpop.f32.mrb[21].mxu0 }
 0x86e   : > { %v1302_v56 = vpop.f32.mrb[22].mxu0 }
 0x86f   : > { %v1803_v57 = vpop.f32.mrb[23].mxu0 }
 0x8cd   : > { %v1359_v58 = vpop.xlane.xlu1 %1358 }
 0x8ce   : > { %1910 = vrcp.f32 %v1359_v58 }
 0x8d1   : > { %v1364_v59 = vpop.permute.xlu1 %1363 }
 0x8d2   : > { %v1369_v60 = vsel %vm881_vm1, %v1364_v59, 0 }
 0x8d3   : > { %1813 = vmatpush3.bf16.msra.mxu0 %v1369_v60 }
 0x8d8   : > { %v1911_v48 = vpop.eup %1910 }
 0x8d9   : > { %v1361_v61 = vmul.f32 %v1911_v48, %v1909_v51 }
 0x8db   : > { %v1362_v62 = vpack.c.bf16 %v1361_v61, %v1361_v61 }
 0x8dd   : > { %1815 = vmatmul.mubr.msk.bf16.vlgmr.msra.gmra.mrb[24].mxu0 %vm865_vm3, %v1362_v62 }
 0x9b0   : > { %v1405_v63 = vpop.f32.mrb[24].mxu0 }
 0x9b1   : > { %v1411_v0 = vpack.c.bf16 %v1405_v63, %v1405_v63  ;;  %v1816_v2 = vpop.f32.mrb[25].mxu0 }
 0x9b2   : > { %v1408_v3 = vpop.f32.mrb[26].mxu0 }
 0x9b3   : > { %v1817_v4 = vpop.f32.mrb[27].mxu0  ;;  %1823 = vmatmul.mubr.msk.bf16.vlgmr.msra.gmra.mrb[24].mxu1 %vm821_vm2, %v1411_v0 }
 0xa86   : > { %v1461_v6 = vpop.f32.mrb[24].mxu1 }
 0xa87   : > { %v1467_v8 = vadd.f32 %v1461_v6, %v1305_v54  ;;  %v1824_v9 = vpop.f32.mrb[25].mxu1 }
 0xa88   : > { %v1464_v10 = vpop.f32.mrb[26].mxu1 }
 0xa89   : > { %v1475_v11 = vadd.f32 %v1672_v7, %v1467_v8  ;;  %v1825_v12 = vpop.f32.mrb[27].mxu1 }
 0xa8b   : > { %v1476_v13 = vadd.f32 %v1475_v11, %v2106_v21  ;;  %v1674_v21 = vld [vmem:[%s2296_s11] ss:$0 sm:$0xff] }
 0xa8d   : > { %1477 = vadd.xlane.f32.xlu0 %v1476_v13 }
 0xb1a   : > { %v1478_v14 = vpop.xlane.xlu0 %1477 }
 0xb1b   : > { %v1480_v15 = vmul.f32 0.0078125, %v1478_v14 }
 0xb1d   : > { %v1481_v16 = vsub.f32 %v1476_v13, %v1480_v15 }
 0xb1f   : > { %v1482_v17 = vmul.f32 %v1481_v16, %v1481_v16 }
 0xb21   : > { %1483 = vadd.xlane.f32.xlu0 %v1482_v17 }
 0xbae   : > { %v1484_v18 = vpop.xlane.xlu0 %1483 }
 0xbaf   : > { %v1485_v19 = vmul.f32 0.0078125, %v1484_v18 }
 0xbb1   : > { %v1486_v20 = vadd.f32 1e-05, %v1485_v19 }
 0xbb3   : > { %1912 = vrsqrt.f32 %v1486_v20 }
 0xbbd   : > { %v1913_v22 = vpop.eup %1912 }
 0xbbe   : > { %v1488_v24 = vmul.f32 %v1913_v22, %v1481_v16 }
 0xbc0   : > { %v1496_v25 = vmul.f32 %v1673_v23, %v1488_v24 }
 0xbc2   : > { %v1504_v26 = vadd.f32 %v1674_v21, %v1496_v25 }
 0xbc4   : > { %1505 = vst [vmem:[%s487_s16] sm:$0xff] %v1504_v26 }
 0xbc5 PF: > { %s22_s23 = sadd.s32 1, %s1936_s23   ;;  %s2298_s21 = smov %s1932_s22 }
 0xbc6   : > { %p19_p5 = scmp.ge.s32.totalorder %s22_s23, 4   ;;  %s2299_s22 = smov %s2301_s24 }
 0xbc8   :  { %21 = sbr.rel (!%p19_p5) target bundleno = 2 (0x2), region = 107 }

// kernel: seq2seq_forward.28
= control target key start
LH: loop header
LB: loop body
LE: loop exit
PB: predicated region body
PF: predicated region fallthrough
CT: control target
= control target key end

     0   :  { %s107_s0 = inlined_call_operand.vmem [shape: f32[16,128], index: 0, kind: input, shape index: {}]   ;;  %s108_s1 = inlined_call_operand.vmem [shape: f32[1,128], index: 1, kind: input, shape index: {}]   ;;  %s109_s2 = inlined_call_operand.vmem [shape: f32[1,128], index: 2, kind: input, shape index: {}]   ;;  %s110_s3 = inlined_call_operand.vmem [shape: f32[16,128], index: 3, kind: output, shape index: {}]  }
   0x1   :  { %v14_v0 = vld [vmem:[%s107_s0] sm:$0xff]  ;;  %v15_v1 = vld [vmem:[%s107_s0 + $0x8] sm:$0xff] }
   0x2   :  { %16 = vadd.xlane.f32.xlu0 %v14_v0  ;;  %v63_v17 = vld [vmem:[%s108_s1] ss:$0 sm:$0xff] }
   0x3   :  { %v64_v19 = vld [vmem:[%s109_s2] ss:$0 sm:$0xff] }
   0x6   :  { %18 = vadd.xlane.f32.xlu0 %v15_v1 }
  0x8f   :  { %v17_v2 = vpop.xlane.xlu0 %16 }
  0x90   :  { %v21_v3 = vmul.f32 0.0078125, %v17_v2 }
  0x92   :  { %v23_v4 = vsub.f32 %v14_v0, %v21_v3 }
  0x93   :  { %v19_v5 = vpop.xlane.xlu0 %18 }
  0x94   :  { %v22_v6 = vmul.f32 0.0078125, %v19_v5  ;;  %v25_v7 = vmul.f32 %v23_v4, %v23_v4 }
  0x96   :  { %v24_v8 = vsub.f32 %v15_v1, %v22_v6  ;;  %27 = vadd.xlane.f32.xlu1 %v25_v7 }
  0x98   :  { %v26_v9 = vmul.f32 %v24_v8, %v24_v8 }
  0x9a   :  { %29 = vadd.xlane.f32.xlu1 %v26_v9 }
 0x123   :  { %v28_v10 = vpop.xlane.xlu1 %27 }
 0x124   :  { %v31_v11 = vmul.f32 0.0078125, %v28_v10 }
 0x126   :  { %v33_v12 = vadd.f32 1e-05, %v31_v11 }
 0x127   :  { %v30_v13 = vpop.xlane.xlu1 %29 }
 0x128   :  { %65 = vrsqrt.f32 %v33_v12  ;;  %v32_v14 = vmul.f32 0.0078125, %v30_v13 }
 0x12a   :  { %v34_v15 = vadd.f32 1e-05, %v32_v14 }
 0x12c   :  { %67 = vrsqrt.f32 %v34_v15 }
 0x132   :  { %v66_v16 = vpop.eup %65 }
 0x133   :  { %v37_v18 = vmul.f32 %v66_v16, %v23_v4 }
 0x135   :  { %v46_v20 = vmul.f32 %v63_v17, %v37_v18 }
 0x136   :  { %v68_v21 = vpop.eup %67 }
 0x137   :  { %v55_v22 = vadd.f32 %v64_v19, %v46_v20  ;;  %v38_v23 = vmul.f32 %v68_v21, %v24_v8 }
 0x139   :  { %57 = vst [vmem:[%s110_s3] sm:$0xff] %v55_v22  ;;  %v47_v24 = vmul.f32 %v63_v17, %v38_v23 }
 0x13b   :  { %v56_v25 = vadd.f32 %v64_v19, %v47_v24 }
 0x13d   :  { %58 = vst [vmem:[%s110_s3 + $0x8] sm:$0xff] %v56_v25 }

// kernel: seq2seq_forward.23
= control target key start
LH: loop header
LB: loop body
LE: loop exit
PB: predicated region body
PF: predicated region fallthrough
CT: control target
= control target key end

     0   :  { %s2017_s21 = smov 0   ;;  %s2019_s22 = smov 0   ;;  %s2293_s0 = inlined_call_operand.vmem [shape: f32[2,8,128], index: 0, kind: input, shape index: {}]   ;;  %s2294_s1 = inlined_call_operand.vmem [shape: f32[2,10,128], index: 1, kind: input, shape index: {}]   ;;  %s2295_s2 = inlined_call_operand.vmem [shape: bf16[128,128], index: 2, kind: input, shape index: {}]   ;;  %s2296_s3 = inlined_call_operand.vmem [shape: f32[1,128], index: 3, kind: input, shape index: {}]   ;;  %s2297_s4 = inlined_call_operand.vmem [shape: bf16[128,256], index: 4, kind: input, shape index: {}]   ;;  %s2298_s5 = inlined_call_operand.vmem [shape: f32[1,256], index: 5, kind: input, shape index: {}]   ;;  %s2299_s6 = inlined_call_operand.vmem [shape: bf16[128,128], index: 6, kind: input, shape index: {}]   ;;  %s2300_s7 = inlined_call_operand.vmem [shape: f32[1,128], index: 7, kind: input, shape index: {}]   ;;  %s2301_s8 = inlined_call_operand.vmem [shape: f32[8,10], index: 8, kind: input, shape index: {}]   ;;  %s2302_s9 = inlined_call_operand.vmem [shape: f32[2,1,10], index: 9, kind: input, shape index: {}]   ;;  %s2303_s10 = inlined_call_operand.vmem [shape: f32[1,128], index: 10, kind: input, shape index: {}]   ;;  %s2304_s11 = inlined_call_operand.vmem [shape: f32[1,128], index: 11, kind: input, shape index: {}]   ;;  %s2305_s12 = inlined_call_operand.vmem [shape: f32[2,8,128], index: 12, kind: output, shape index: {}]  }
   0x1   :  { %s2021_s23 = smov 0  }
   0x2 LB: > { %s34_s24 = sadd.s32 1, %s1940_s22  ;;  %p1628_p0 = scmp.ge.s32.totalorder %s1944_s23, 1  ;;  %s1944_s23 = sphi %s2021_s23, %s22_s23   ;;  %s1940_s22 = sphi %s2019_s22, %s2307_s22   ;;  %s1936_s21 = sphi %s2017_s21, %s2306_s21  }
   0x3   : > { %p36_p1 = scmp.ge.s32.totalorder %s34_s24, 2  ;;  %p407_p2 = scmp.lt.s32.totalorder %s1944_s23, 3 }
   0x5   : > { %s2309_s24 = smov (%p36_p1, %s34_s24), 0  ;;  %p408_p3 = pnand %p1628_p0, %p407_p2 }
   0x6   : > { %v1864_v0 = vld [vmem:[%s2295_s2] sm:$0xff] (!%p408_p3)   ;;  %v1946_v1 = vmov (!%p408_p3), 0.0   ;;  %v1865_v2 = vld [vmem:[%s2295_s2 + $0x8] sm:$0xff] (!%p408_p3)   ;;  %vm1947_vm0 = vmmov (!%p408_p3), 0   ;;  %v1948_v3 = vmov (!%p408_p3), 0   ;;  %v1866_v4 = vld [vmem:[%s2295_s2 + $0x10] sm:$0xff] (!%p408_p3)   ;;  %v626_v31 = vlaneseq (!%p408_p3) }
   0x7   : > { %411 = sbr.rel (%p408_p3) target bundleno = 3013 (0xbc5), region = 68  ;;  %1726 = vmatprep.subr.bf16.mxu0 (!%p408_p3), %v1946_v1  ;;  %1742 = vmatprep.mubr.msk.bf16.mxu0 (!%p408_p3), %vm1947_vm0, %v1946_v1  ;;  %v1872_v5 = vld [vmem:[%s2297_s4 + $0x4] ss:$8 sps:$4 sm:$0xff] (!%p408_p3)   ;;  %v1874_v6 = vld [vmem:[%s2297_s4] ss:$8 sps:$4 sm:$0xff] (!%p408_p3)   ;;  %v1867_v7 = vld [vmem:[%s2295_s2 + $0x18] sm:$0xff] (!%p408_p3)  }
   0x8   : > { %1727 = vmatpush3.bf16.msra.mxu0 (!%p408_p3), %v1864_v0  ;;  %748 = vmatprep.mubr.bf16.mxu1 (!%p408_p3), %v1948_v3  ;;  %v1875_v8 = vld [vmem:[%s2297_s4 + $0x14] ss:$8 sps:$4 sm:$0xff] (!%p408_p3)   ;;  %p465_p4 = scmp.lt.s32.totalorder (!%p408_p3), %s1936_s21, 1  ;;  %v1877_v9 = vld [vmem:[%s2297_s4 + $0x10] ss:$8 sps:$4 sm:$0xff] (!%p408_p3)   ;;  %v1868_v11 = vld [vmem:[%s2295_s2 + $0x20] sm:$0xff] (!%p408_p3)  }
   0x9   : > { %1728 = vmatprep.subr.bf16.mxu0 (!%p408_p3), %v1946_v1  ;;  %716 = vmatprep.subr.bf16.mxu1 (!%p408_p3), %v1872_v5  ;;  %v1878_v10 = vld [vmem:[%s2297_s4 + $0x24] ss:$8 sps:$4 sm:$0xff] (!%p408_p3)   ;;  %v1880_v12 = vld [vmem:[%s2297_s4 + $0x20] ss:$8 sps:$4 sm:$0xff] (!%p408_p3)   ;;  %v1881_v13 = vld [vmem:[%s2297_s4 + $0x34] ss:$8 sps:$4 sm:$0xff] (!%p408_p3)  }
   0xa   : > { %717 = vmatpush1.bf16.msra.mxu1 (!%p408_p3), %v1874_v6  ;;  %v1869_v14 = vld [vmem:[%s2295_s2 + $0x28] sm:$0xff] (!%p408_p3)   ;;  %v1883_v15 = vld [vmem:[%s2297_s4 + $0x30] ss:$8 sps:$4 sm:$0xff] (!%p408_p3)   ;;  %v1887_v19 = vld [vmem:[%s2297_s4 + $0x54] ss:$8 sps:$4 sm:$0xff] (!%p408_p3)   ;;  %v627_v33 = vshrl.u32 (!%p408_p3), %v626_v31, 7 }
   0xb   : > { %718 = vmatprep.subr.bf16.mxu1 (!%p408_p3), %v1875_v8  ;;  %v1884_v16 = vld [vmem:[%s2297_s4 + $0x44] ss:$8 sps:$4 sm:$0xff] (!%p408_p3)   ;;  %v1870_v17 = vld [vmem:[%s2295_s2 + $0x30] sm:$0xff] (!%p408_p3)   ;;  %v1886_v18 = vld [vmem:[%s2297_s4 + $0x40] ss:$8 sps:$4 sm:$0xff] (!%p408_p3)   ;;  %s1949_s13 = smov (!%p408_p3), 96  }
   0xc   : > { %1729 = vmatpush3.bf16.msra.mxu0 (!%p408_p3), %v1865_v2  ;;  %v1871_v20 = vld [vmem:[%s2295_s2 + $0x38] sm:$0xff] (!%p408_p3)   ;;  %v1890_v23 = vld [vmem:[%s2297_s4 + $0x64] ss:$8 sps:$4 sm:$0xff] (!%p408_p3)   ;;  %v1892_v25 = vld [vmem:[%s2297_s4 + $0x60] ss:$8 sps:$4 sm:$0xff] (!%p408_p3)   ;;  %v632_v40 = vsub.s32 (!%p408_p3), 1, %v627_v33 }
   0xd   : > { %1730 = vmatprep.subr.bf16.mxu0 (!%p408_p3), %v1946_v1  ;;  %v1889_v22 = vld [vmem:[%s2297_s4 + $0x50] ss:$8 sps:$4 sm:$0xff] (!%p408_p3)   ;;  %v1893_v26 = vld [vmem:[%s2297_s4 + $0x74] ss:$8 sps:$4 sm:$0xff] (!%p408_p3)   ;;  %v1633_v32 = vld [vmem:[%s2296_s3] ss:$0 sm:$0xff] (!%p408_p3) }
   0xe   : > { %s2311_s21 = smov (!%p465_p4, %s1936_s21), 1  ;;  %719 = vmatpush1.bf16.msra.mxu1 %v1877_v9  ;;  %v1895_v27 = vld [vmem:[%s2297_s4 + $0x70] ss:$8 sps:$4 sm:$0xff]   ;;  %v624_v41 = vld [vmem:[%s2298_s5] sm:$0x3]  ;;  %vm887_vm1 = vcmask 1044480  }
   0xf   : > { %720 = vmatprep.subr.bf16.mxu1 %v1878_v10  ;;  %s1629_s19 = sshll.u32 %s2311_s21, 3  ;;  %s1684_s30 = sshll.u32 %s2311_s21, 4  ;;  %v633_v43 = vrot.slane %v624_v41, %v632_v40  ;;  %v628_v52 = vsub.s32 0, %v627_v33  ;;  %vm827_vm2 = vcmask 261120   ;;  %v800_v6 = vld [vmem:[%s2301_s8] sm:$0xff]  ;;  %vm871_vm3 = vcmask 80896  }
  0x10   : > { %1731 = vmatpush3.bf16.msra.mxu0 %v1866_v4  ;;  %s471_s18 = scalar_lea.vmem %s2293_s0, %s1629_s19  ;;  %s476_s20 = scalar_lea.vmem %s2294_s1, %s1684_s30 }
  0x11   : > { %1732 = vmatprep.subr.bf16.mxu0 %v1946_v1  ;;  %v2113_v21 = vld [vmem:[%s471_s18] sm:$0xff]  ;;  %v495_v29 = vld [vmem:[%s476_s20 + $0x8] sm:$0x3]  ;;  %v629_v53 = vrot.slane %v624_v41, %v628_v52  ;;  %s483_s16 = scalar_lea.vmem %s2302_s9, %s2311_s21  ;;  %s1951_s15 = smov 32  }
  0x12   : > { %721 = vmatpush1.bf16.msra.mxu1 %v1880_v12  ;;  %v493_v24 = vpack.c.bf16 %v2113_v21, %v2113_v21  ;;  %v494_v28 = vld [vmem:[%s476_s20] sm:$0xff]  ;;  %s1950_s20 = smov 64  }
  0x13   : > { %722 = vmatprep.subr.bf16.mxu1 %v1881_v13  ;;  %v496_v30 = vpack.c.bf16 %v495_v29, %v494_v28  ;;  %v1896_v41 = vld [vmem:[%s2299_s6] sm:$0xff]  }
  0x14   : > { %1733 = vmatpush3.bf16.msra.mxu0 %v1867_v7  ;;  %v1658_v7 = vld [vmem:[%s483_s16] ss:$0 sm:$0xff] }
  0x15   : > { %1734 = vmatprep.subr.bf16.mxu0 %v1946_v1  ;;  %v2176_v8 = vadd.f32 %v1658_v7, %v800_v6 }
  0x16   : > { %723 = vmatpush1.bf16.msra.mxu1 %v1883_v15 }
  0x17   : > { %724 = vmatprep.subr.bf16.mxu1 %v1884_v16 }
  0x18   : > { %1735 = vmatpush3.bf16.msra.mxu0 %v1868_v11 }
  0x19   : > { %1736 = vmatprep.subr.bf16.mxu0 %v1946_v1 }
  0x1a   : > { %725 = vmatpush1.bf16.msra.mxu1 %v1886_v18 }
  0x1b   : > { %726 = vmatprep.subr.bf16.mxu1 %v1887_v19 }
  0x1c   : > { %1737 = vmatpush3.bf16.msra.mxu0 %v1869_v14 }
  0x1d   : > { %1738 = vmatprep.subr.bf16.mxu0 %v1946_v1 }
  0x1e   : > { %727 = vmatpush1.bf16.msra.mxu1 %v1889_v22 }
  0x1f   : > { %728 = vmatprep.subr.bf16.mxu1 %v1890_v23 }
  0x20   : > { %1739 = vmatpush3.bf16.msra.mxu0 %v1870_v17 }
  0x21   : > { %1740 = vmatprep.subr.bf16.mxu0 %v1946_v1 }
  0x22   : > { %729 = vmatpush1.bf16.msra.mxu1 %v1892_v25 }
  0x23   : > { %730 = vmatprep.subr.bf16.mxu1 %v1893_v26 }
  0x24   : > { %1741 = vmatpush3.bf16.msra.mxu0 %v1871_v20 }
  0x25   : > { %1746 = vmatprep.subr.bf16.mxu0 %v1946_v1 }
  0x26   : > { %731 = vmatpush1.bf16.msra.mxu1 %v1895_v27 }
  0x27   : > { %1743 = vmatmul.mubr.bf16.vlgmr.msra.gmra.mrb[0].mxu0 %v493_v24  ;;  %1754 = vmatprep.subr.bf16.mxu1 %v1946_v1 }
  0x28   : > { %1750 = vmatprep.mubr.msk.bf16.mxu0 %vm1947_vm0, %v1946_v1 }
  0x29   : > { %749 = vmatmul.mubr.bf16.vlgmr.msra.gmra.mrb[0].mxu1 %v496_v30 }
  0x2a   : > { %1756 = vmatprep.mubr.msk.bf16.mxu1 %vm1947_vm0, %v1946_v1 }
  0xfa   : > { %v602_v34 = vpop.f32.mrb[0].mxu0 }
  0xfb   : > { %v603_v35 = vadd.f32 %v1633_v32, %v602_v34  ;;  %v1744_v36 = vpop.f32.mrb[1].mxu0 }
  0xfc   : > { %v605_v37 = vpop.f32.mrb[2].mxu0  ;;  %v750_v44 = vpop.f32.mrb[0].mxu1 }
  0xfd   : > { %v825_v38 = vmul.f32 0.17677669, %v603_v35  ;;  %v1745_v39 = vpop.f32.mrb[3].mxu0  ;;  %v752_v45 = vpop.f32.mrb[1].mxu1  ;;  %v751_v54 = vadd.f32 %v750_v44, %v629_v53  ;;  %v1897_v44 = vld [vmem:[%s2299_s6 + $0x8] sm:$0xff]  }
  0xfe   : > { %v753_v46 = vadd.f32 %v752_v45, %v633_v43  ;;  %v754_v47 = vpop.f32.mrb[2].mxu1  ;;  %v1898_v45 = vld [vmem:[%s2299_s6 + $0x10] sm:$0xff]  }
  0xff   : > { %v2149_v42 = vpack.c.bf16 %v825_v38, %v825_v38  ;;  %v756_v48 = vpop.f32.mrb[3].mxu1  ;;  %v755_v55 = vadd.f32 %v754_v47, %v629_v53 }
 0x100   : > { %v757_v49 = vadd.f32 %v756_v48, %v633_v43 }
 0x101   : > { %933 = vrot.lane.b32.xlu0 %v2149_v42, %s1949_s13 }
 0x102   : > { %v2153_v50 = vpack.c.bf16 %v757_v49, %v753_v46  ;;  %v1899_v46 = vld [vmem:[%s2299_s6 + $0x18] sm:$0xff]  }
 0x104   : > { %v889_v51 = vsel %vm887_vm1, %v2153_v50, 0 }
 0x105   : > { %1755 = vmatpush3.bf16.msra.mxu1 %v889_v51 }
 0x106   : > { %1768 = vmatprep.subr.bf16.mxu1 %v1946_v1 }
 0x11f   : > { %760 = vxpose.xlu0.b32.start [1/2] (short) %v751_v54, 128 }
 0x123   : > { %761 = vxpose.xlu0.b32.end [2/2] (short) %v755_v55, 128 }
 0x173   : > { %v934_v56 = vpop.permute.xlu0 %933 }
 0x19f   : > { %v776_v57 = vpop.trf.xlu0 }
 0x1a3   : > { %v777_v58 = vpop.trf.xlu0 }
 0x1a4   : > { %v792_v59 = vpack.c.bf16 %v777_v58, %v776_v57 }
 0x1a6   : > { %1747 = vmatpush3.bf16.msra.mxu0 %v792_v59 }
 0x1a7   : > { %v778_v60 = vpop.trf.xlu0  ;;  %1748 = vmatprep.subr.bf16.mxu0 %v1946_v1 }
 0x1ab   : > { %v779_v61 = vpop.trf.xlu0 }
 0x1ac   : > { %v793_v62 = vpack.c.bf16 %v779_v61, %v778_v60 }
 0x1ae   : > { %1749 = vmatpush3.bf16.msra.mxu0 %v793_v62 }
 0x1af   : > { %v780_v63 = vpop.trf.xlu0  ;;  %1760 = vmatprep.subr.bf16.mxu0 %v1946_v1 }
 0x1b1   : > { %1751 = vmatmul.mubr.msk.bf16.vlgmr.msra.gmra.mrb[4].mxu0 %vm827_vm2, %v2149_v42 }
 0x1b2   : > { %1764 = vmatprep.mubr.msk.bf16.mxu0 %vm1947_vm0, %v1946_v1 }
 0x1b3   : > { %v781_v0 = vpop.trf.xlu0 }
 0x1b4   : > { %v794_v2 = vpack.c.bf16 %v781_v0, %v780_v63 }
 0x1b6   : > { %1761 = vmatpush3.bf16.msra.mxu0 %v794_v2 }
 0x1b7   : > { %v782_v3 = vpop.trf.xlu0  ;;  %1762 = vmatprep.subr.bf16.mxu0 %v1946_v1 }
 0x1bb   : > { %v783_v4 = vpop.trf.xlu0 }
 0x1bc   : > { %v795_v5 = vpack.c.bf16 %v783_v4, %v782_v3 }
 0x1be   : > { %1763 = vmatpush3.bf16.msra.mxu0 %v795_v5 }
 0x1bf   : > { %1774 = vmatprep.subr.bf16.mxu0 %v1946_v1  ;;  %v784_v51 = vpop.trf.xlu0 }
 0x1c1   : > { %1765 = vmatmul.mubr.msk.bf16.vlgmr.msra.gmra.mrb[8].mxu0 %vm827_vm2, %v934_v56 }
 0x1c2   : > { %1778 = vmatprep.mubr.msk.bf16.mxu0 %vm1947_vm0, %v1946_v1  ;;  %1775 = vmatpush3.bf16.msra.mxu0 %v1898_v45 }
 0x1c3   : > { %1776 = vmatprep.subr.bf16.mxu0 %v1946_v1  ;;  %v785_v54 = vpop.trf.xlu0 }
 0x1c4   : > { %v796_v59 = vpack.c.bf16 %v785_v54, %v784_v51 }
 0x1c6   : > { %1777 = vmatpush3.bf16.msra.mxu0 %v1899_v46 }
 0x1c7   : > { %1790 = vmatprep.subr.bf16.mxu0 %v1946_v1  ;;  %v786_v55 = vpop.trf.xlu0 }
 0x1cb   : > { %v787_v61 = vpop.trf.xlu0 }
 0x1cc   : > { %v797_v63 = vpack.c.bf16 %v787_v61, %v786_v55 }
 0x284   : > { %v865_v9 = vpop.f32.mrb[4].mxu0 }
 0x285   : > { %v866_v10 = vadd.f32 %v865_v9, %v2176_v8  ;;  %v1752_v11 = vpop.f32.mrb[5].mxu0 }
 0x286   : > { %v868_v12 = vpop.f32.mrb[6].mxu0 }
 0x287   : > { %v1753_v13 = vpop.f32.mrb[7].mxu0  ;;  %v872_v14 = vsel %vm871_vm3, %v866_v10, -inf }
 0x288   : > { %873 = vmax.xlane.f32.xlu1 %v872_v14 }
 0x294   : > { %v972_v15 = vpop.f32.mrb[8].mxu0 }
 0x295   : > { %v973_v16 = vadd.f32 %v972_v15, %v2176_v8  ;;  %v1766_v17 = vpop.f32.mrb[9].mxu0 }
 0x296   : > { %v975_v18 = vpop.f32.mrb[10].mxu0 }
 0x297   : > { %v1767_v19 = vpop.f32.mrb[11].mxu0  ;;  %v978_v20 = vsel %vm871_vm3, %v973_v16, -inf }
 0x298   : > { %979 = vmax.xlane.f32.xlu1 %v978_v20 }
 0x315   : > { %v874_v22 = vpop.xlane.xlu1 %873 }
 0x316   : > { %v875_v23 = vsub.f32 %v866_v10, %v874_v22 }
 0x318   : > { %v876_v24 = vmul.f32 1.442695, %v875_v23 }
 0x31a   : > { %1904 = vpow2.f32 %v876_v24 }
 0x324   : > { %v1905_v25 = vpop.eup %1904 }
 0x325   : > { %v980_v26 = vpop.xlane.xlu1 %979  ;;  %v878_v27 = vsel %vm871_vm3, %v1905_v25, 0.0 }
 0x326   : > { %v981_v28 = vsub.f32 %v973_v16, %v980_v26  ;;  %879 = vadd.xlane.f32.xlu1 %v878_v27  ;;  %v1900_v26 = vld [vmem:[%s2299_s6 + $0x20] sm:$0xff]  }
 0x328   : > { %v982_v29 = vmul.f32 1.442695, %v981_v28 }
 0x32a   : > { %1906 = vpow2.f32 %v982_v29 }
 0x334   : > { %v1907_v30 = vpop.eup %1906 }
 0x335   : > { %v984_v31 = vsel %vm871_vm3, %v1907_v30, 0.0 }
 0x336   : > { %985 = vadd.xlane.f32.xlu1 %v984_v31 }
 0x347   : > { %991 = vrot.lane.b32.xlu1 %v2153_v50, %s1949_s13 }
 0x34b   : > { %1150 = vrot.lane.b32.xlu1 %v2149_v42, %s1950_s20 }
 0x3b3   : > { %v880_v32 = vpop.xlane.xlu1 %879 }
 0x3b4   : > { %1908 = vrcp.f32 %v880_v32 }
 0x3be   : > { %v1909_v33 = vpop.eup %1908 }
 0x3bf   : > { %v882_v34 = vmul.f32 %v1909_v33, %v1905_v25 }
 0x3c1   : > { %v883_v35 = vpack.c.bf16 %v882_v34, %v882_v34 }
 0x3c3   : > { %1757 = vmatmul.mubr.msk.bf16.vlgmr.msra.gmra.mrb[4].mxu1 %vm871_vm3, %v883_v35  ;;  %v986_v36 = vpop.xlane.xlu1 %985 }
 0x3c4   : > { %1910 = vrcp.f32 %v986_v36  ;;  %1770 = vmatprep.mubr.msk.bf16.mxu1 %vm1947_vm0, %v1946_v1 }
 0x3c7   : > { %v992_v37 = vpop.permute.xlu1 %991 }
 0x3c8   : > { %v997_v38 = vsel %vm887_vm1, %v992_v37, 0  ;;  %v1901_v37 = vld [vmem:[%s2299_s6 + $0x28] sm:$0xff]  }
 0x3c9   : > { %1769 = vmatpush3.bf16.msra.mxu1 %v997_v38 }
 0x3ca   : > { %1782 = vmatprep.subr.bf16.mxu1 %v1946_v1 }
 0x3cb   : > { %v1151_v0 = vpop.permute.xlu1 %1150 }
 0x3ce   : > { %v1911_v39 = vpop.eup %1910 }
 0x3cf   : > { %v988_v40 = vmul.f32 %v1911_v39, %v1907_v30 }
 0x3d1   : > { %v989_v43 = vpack.c.bf16 %v988_v40, %v988_v40 }
 0x3d3   : > { %1771 = vmatmul.mubr.msk.bf16.vlgmr.msra.gmra.mrb[8].mxu1 %vm871_vm3, %v989_v43 }
 0x3d4   : > { %1783 = vmatpush3.bf16.msra.mxu1 %v1896_v41  ;;  %1786 = vmatprep.mubr.msk.bf16.mxu1 %vm1947_vm0, %v1946_v1 }
 0x3d5   : > { %1784 = vmatprep.subr.bf16.mxu1 %v1946_v1 }
 0x3d8   : > { %1785 = vmatpush3.bf16.msra.mxu1 %v1897_v44 }
 0x3d9   : > { %1798 = vmatprep.subr.bf16.mxu1 %v1946_v1 }
 0x496   : > { %v925_v47 = vpop.f32.mrb[4].mxu1 }
 0x497   : > { %v931_v48 = vpack.c.bf16 %v925_v47, %v925_v47  ;;  %v1758_v49 = vpop.f32.mrb[5].mxu1 }
 0x498   : > { %v928_v52 = vpop.f32.mrb[6].mxu1 }
 0x499   : > { %v1759_v53 = vpop.f32.mrb[7].mxu1  ;;  %1787 = vmatmul.mubr.msk.bf16.vlgmr.msra.gmra.mrb[12].mxu1 %vm827_vm2, %v931_v48 }
 0x49a   : > { %1800 = vmatprep.mubr.msk.bf16.mxu1 %vm1947_vm0, %v1946_v1 }
 0x4a6   : > { %v1033_v56 = vpop.f32.mrb[8].mxu1 }
 0x4a7   : > { %v1039_v57 = vpack.c.bf16 %v1033_v56, %v1033_v56  ;;  %v1772_v58 = vpop.f32.mrb[9].mxu1 }
 0x4a8   : > { %v1036_v60 = vpop.f32.mrb[10].mxu1 }
 0x4a9   : > { %v1773_v62 = vpop.f32.mrb[11].mxu1  ;;  %1779 = vmatmul.mubr.msk.bf16.vlgmr.msra.gmra.mrb[12].mxu0 %vm827_vm2, %v1039_v57 }
 0x4aa   : > { %1791 = vmatpush3.bf16.msra.mxu0 %v796_v59  ;;  %1794 = vmatprep.mubr.msk.bf16.mxu0 %vm1947_vm0, %v1946_v1 }
 0x4ab   : > { %1792 = vmatprep.subr.bf16.mxu0 %v1946_v1 }
 0x4ae   : > { %1793 = vmatpush3.bf16.msra.mxu0 %v797_v63 }
 0x4af   : > { %1804 = vmatprep.subr.bf16.mxu0 %v1946_v1 }
 0x4b1   : > { %1795 = vmatmul.mubr.msk.bf16.vlgmr.msra.gmra.mrb[16].mxu0 %vm827_vm2, %v1151_v0 }
 0x4b2   : > { %1808 = vmatprep.mubr.msk.bf16.mxu0 %vm1947_vm0, %v1946_v1  ;;  %1805 = vmatpush3.bf16.msra.mxu0 %v1900_v26  ;;  %v1680_v26 = vld [vmem:[%s2303_s10] ss:$0 sm:$0xff] }
 0x4b3   : > { %1806 = vmatprep.subr.bf16.mxu0 %v1946_v1 }
 0x4b6   : > { %1807 = vmatpush3.bf16.msra.mxu0 %v1901_v37 }
 0x4b7   : > { %1820 = vmatprep.subr.bf16.mxu0 %v1946_v1 }
 0x56c   : > { %v1144_v2 = vpop.f32.mrb[12].mxu1 }
 0x56d   : > { %v1788_v3 = vpop.f32.mrb[13].mxu1 }
 0x56e   : > { %v1147_v4 = vpop.f32.mrb[14].mxu1 }
 0x56f   : > { %v1789_v5 = vpop.f32.mrb[15].mxu1 }
 0x57c   : > { %v1089_v6 = vpop.f32.mrb[12].mxu0 }
 0x57d   : > { %v2223_v7 = vadd.f32 %v1144_v2, %v1089_v6  ;;  %v1780_v9 = vpop.f32.mrb[13].mxu0 }
 0x57e   : > { %v1092_v10 = vpop.f32.mrb[14].mxu0 }
 0x57f   : > { %v1781_v11 = vpop.f32.mrb[15].mxu0  ;;  %v1679_v10 = vld [vmem:[%s2300_s7] ss:$0 sm:$0xff] }
 0x584   : > { %v1189_v12 = vpop.f32.mrb[16].mxu0 }
 0x585   : > { %v1190_v13 = vadd.f32 %v1189_v12, %v2176_v8  ;;  %v1796_v14 = vpop.f32.mrb[17].mxu0 }
 0x586   : > { %v1192_v15 = vpop.f32.mrb[18].mxu0 }
 0x587   : > { %v1797_v16 = vpop.f32.mrb[19].mxu0  ;;  %v1195_v17 = vsel %vm871_vm3, %v1190_v13, -inf }
 0x588   : > { %1196 = vmax.xlane.f32.xlu1 %v1195_v17 }
 0x599   : > { %1207 = vrot.lane.b32.xlu1 %v2153_v50, %s1950_s20  ;;  %s490_s20 = scalar_lea.vmem %s2305_s12, %s1629_s19 }
 0x59d   : > { %1312 = vrot.lane.b32.xlu1 %v2149_v42, %s1951_s15  ;;  %v788_v42 = vpop.trf.xlu0 }
 0x5a1   : > { %v789_v27 = vpop.trf.xlu0 }
 0x5a2   : > { %v798_v34 = vpack.c.bf16 %v789_v27, %v788_v42 }
 0x5a5   : > { %v790_v28 = vpop.trf.xlu0 }
 0x5a9   : > { %v791_v29 = vpop.trf.xlu0 }
 0x5aa   : > { %v799_v35 = vpack.c.bf16 %v791_v29, %v790_v28 }
 0x615   : > { %v1197_v18 = vpop.xlane.xlu1 %1196 }
 0x616   : > { %v1198_v19 = vsub.f32 %v1190_v13, %v1197_v18 }
 0x618   : > { %v1199_v20 = vmul.f32 1.442695, %v1198_v19 }
 0x619   : > { %v1208_v22 = vpop.permute.xlu1 %1207 }
 0x61a   : > { %1912 = vpow2.f32 %v1199_v20  ;;  %v1213_v23 = vsel %vm887_vm1, %v1208_v22, 0 }
 0x61b   : > { %1799 = vmatpush3.bf16.msra.mxu1 %v1213_v23 }
 0x61c   : > { %1812 = vmatprep.subr.bf16.mxu1 %v1946_v1 }
 0x61d   : > { %v1313_v36 = vpop.permute.xlu1 %1312 }
 0x624   : > { %v1913_v24 = vpop.eup %1912 }
 0x625   : > { %v1201_v25 = vsel %vm871_vm3, %v1913_v24, 0.0 }
 0x626   : > { %1202 = vadd.xlane.f32.xlu0 %v1201_v25 }
 0x6b3   : > { %v1203_v30 = vpop.xlane.xlu0 %1202 }
 0x6b4   : > { %1914 = vrcp.f32 %v1203_v30 }
 0x6be   : > { %v1915_v31 = vpop.eup %1914 }
 0x6bf   : > { %v1205_v32 = vmul.f32 %v1915_v31, %v1913_v24 }
 0x6c1   : > { %v1206_v33 = vpack.c.bf16 %v1205_v32, %v1205_v32 }
 0x6c3   : > { %1801 = vmatmul.mubr.msk.bf16.vlgmr.msra.gmra.mrb[16].mxu1 %vm871_vm3, %v1206_v33 }
 0x6c4   : > { %1813 = vmatpush3.bf16.msra.mxu1 %v798_v34  ;;  %1816 = vmatprep.mubr.msk.bf16.mxu1 %vm1947_vm0, %v1946_v1 }
 0x6c5   : > { %1814 = vmatprep.subr.bf16.mxu1 %v1946_v1 }
 0x6c8   : > { %1815 = vmatpush3.bf16.msra.mxu1 %v799_v35 }
 0x6c9   : > { %1826 = vmatprep.subr.bf16.mxu1 %v1946_v1 }
 0x6cb   : > { %1817 = vmatmul.mubr.msk.bf16.vlgmr.msra.gmra.mrb[20].mxu1 %vm827_vm2, %v1313_v36 }
 0x6cc   : > { %1830 = vmatprep.mubr.msk.bf16.mxu1 %vm1947_vm0, %v1946_v1 }
 0x796   : > { %v1249_v38 = vpop.f32.mrb[16].mxu1 }
 0x797   : > { %v1255_v39 = vpack.c.bf16 %v1249_v38, %v1249_v38  ;;  %v1802_v40 = vpop.f32.mrb[17].mxu1 }
 0x798   : > { %v1252_v41 = vpop.f32.mrb[18].mxu1 }
 0x799   : > { %v1803_v43 = vpop.f32.mrb[19].mxu1  ;;  %1809 = vmatmul.mubr.msk.bf16.vlgmr.msra.gmra.mrb[20].mxu0 %vm827_vm2, %v1255_v39 }
 0x79a   : > { %1822 = vmatprep.mubr.msk.bf16.mxu0 %vm1947_vm0, %v1946_v1 }
 0x79e   : > { %v1351_v44 = vpop.f32.mrb[20].mxu1 }
 0x79f   : > { %v1352_v45 = vadd.f32 %v1351_v44, %v2176_v8  ;;  %v1818_v46 = vpop.f32.mrb[21].mxu1  ;;  %v1902_v8 = vld [vmem:[%s2299_s6 + $0x30] sm:$0xff]  }
 0x7a0   : > { %v1354_v47 = vpop.f32.mrb[22].mxu1  ;;  %1827 = vmatpush3.bf16.msra.mxu1 %v1902_v8 }
 0x7a1   : > { %v1819_v48 = vpop.f32.mrb[23].mxu1  ;;  %v1357_v49 = vsel %vm871_vm3, %v1352_v45, -inf  ;;  %1828 = vmatprep.subr.bf16.mxu1 %v1946_v1  ;;  %v1903_v1 = vld [vmem:[%s2299_s6 + $0x38] sm:$0xff]  }
 0x7a2   : > { %1358 = vmax.xlane.f32.xlu1 %v1357_v49 }
 0x7a4   : > { %1829 = vmatpush3.bf16.msra.mxu1 %v1903_v1 }
 0x82f   : > { %v1359_v51 = vpop.xlane.xlu1 %1358 }
 0x830   : > { %v1360_v52 = vsub.f32 %v1352_v45, %v1359_v51 }
 0x832   : > { %v1361_v53 = vmul.f32 1.442695, %v1360_v52 }
 0x834   : > { %1916 = vpow2.f32 %v1361_v53 }
 0x83e   : > { %v1917_v54 = vpop.eup %1916 }
 0x83f   : > { %v1363_v55 = vsel %vm871_vm3, %v1917_v54, 0.0 }
 0x840   : > { %1364 = vadd.xlane.f32.xlu1 %v1363_v55 }
 0x851   : > { %1369 = vrot.lane.b32.xlu1 %v2153_v50, %s1951_s15 }
 0x86c   : > { %v1305_v56 = vpop.f32.mrb[20].mxu0 }
 0x86d   : > { %v1311_v57 = vadd.f32 %v1305_v56, %v2223_v7  ;;  %v1810_v58 = vpop.f32.mrb[21].mxu0 }
 0x86e   : > { %v1308_v59 = vpop.f32.mrb[22].mxu0 }
 0x86f   : > { %v1811_v60 = vpop.f32.mrb[23].mxu0 }
 0x8cd   : > { %v1365_v61 = vpop.xlane.xlu1 %1364 }
 0x8ce   : > { %1918 = vrcp.f32 %v1365_v61 }
 0x8d1   : > { %v1370_v62 = vpop.permute.xlu1 %1369 }
 0x8d2   : > { %v1375_v63 = vsel %vm887_vm1, %v1370_v62, 0 }
 0x8d3   : > { %1821 = vmatpush3.bf16.msra.mxu0 %v1375_v63 }
 0x8d8   : > { %v1919_v50 = vpop.eup %1918 }
 0x8d9   : > { %v1367_v0 = vmul.f32 %v1919_v50, %v1917_v54 }
 0x8db   : > { %v1368_v2 = vpack.c.bf16 %v1367_v0, %v1367_v0 }
 0x8dd   : > { %1823 = vmatmul.mubr.msk.bf16.vlgmr.msra.gmra.mrb[24].mxu0 %vm871_vm3, %v1368_v2 }
 0x9b0   : > { %v1411_v3 = vpop.f32.mrb[24].mxu0 }
 0x9b1   : > { %v1417_v4 = vpack.c.bf16 %v1411_v3, %v1411_v3  ;;  %v1824_v5 = vpop.f32.mrb[25].mxu0 }
 0x9b2   : > { %v1414_v6 = vpop.f32.mrb[26].mxu0 }
 0x9b3   : > { %v1825_v7 = vpop.f32.mrb[27].mxu0  ;;  %1831 = vmatmul.mubr.msk.bf16.vlgmr.msra.gmra.mrb[24].mxu1 %vm827_vm2, %v1417_v4 }
 0xa86   : > { %v1467_v9 = vpop.f32.mrb[24].mxu1 }
 0xa87   : > { %v1473_v11 = vadd.f32 %v1467_v9, %v1311_v57  ;;  %v1832_v12 = vpop.f32.mrb[25].mxu1 }
 0xa88   : > { %v1470_v13 = vpop.f32.mrb[26].mxu1 }
 0xa89   : > { %v1481_v14 = vadd.f32 %v1679_v10, %v1473_v11  ;;  %v1833_v15 = vpop.f32.mrb[27].mxu1 }
 0xa8b   : > { %v1482_v16 = vadd.f32 %v1481_v14, %v2113_v21  ;;  %v1681_v21 = vld [vmem:[%s2304_s11] ss:$0 sm:$0xff] }
 0xa8d   : > { %1483 = vadd.xlane.f32.xlu0 %v1482_v16 }
 0xb1a   : > { %v1484_v17 = vpop.xlane.xlu0 %1483 }
 0xb1b   : > { %v1486_v18 = vmul.f32 0.0078125, %v1484_v17 }
 0xb1d   : > { %v1487_v19 = vsub.f32 %v1482_v16, %v1486_v18 }
 0xb1f   : > { %v1488_v20 = vmul.f32 %v1487_v19, %v1487_v19 }
 0xb21   : > { %1489 = vadd.xlane.f32.xlu0 %v1488_v20 }
 0xbae   : > { %v1490_v22 = vpop.xlane.xlu0 %1489 }
 0xbaf   : > { %v1491_v23 = vmul.f32 0.0078125, %v1490_v22 }
 0xbb1   : > { %v1492_v24 = vadd.f32 1e-05, %v1491_v23 }
 0xbb3   : > { %1920 = vrsqrt.f32 %v1492_v24 }
 0xbbd   : > { %v1921_v25 = vpop.eup %1920 }
 0xbbe   : > { %v1494_v42 = vmul.f32 %v1921_v25, %v1487_v19 }
 0xbc0   : > { %v1502_v27 = vmul.f32 %v1680_v26, %v1494_v42 }
 0xbc2   : > { %v1510_v28 = vadd.f32 %v1681_v21, %v1502_v27 }
 0xbc4   : > { %1511 = vst [vmem:[%s490_s20] sm:$0xff] %v1510_v28 }
 0xbc5 PF: > { %s22_s23 = sadd.s32 1, %s1944_s23   ;;  %s2306_s21 = smov %s1940_s22 }
 0xbc6   : > { %p19_p5 = scmp.ge.s32.totalorder %s22_s23, 4   ;;  %s2307_s22 = smov %s2309_s24 }
 0xbc8   :  { %21 = sbr.rel (!%p19_p5) target bundleno = 2 (0x2), region = 107 }

// kernel: seq2seq_forward.29
= control target key start
LH: loop header
LB: loop body
LE: loop exit
PB: predicated region body
PF: predicated region fallthrough
CT: control target
= control target key end

     0   :  { %v249_v1 = vmov 0   ;;  %v186_v20 = vlaneseq  ;;  %s339_s1 = inlined_call_operand.vmem [shape: bf16[128,256], index: 1, kind: input, shape index: {}]   ;;  %s340_s0 = inlined_call_operand.vmem [shape: f32[16,128], index: 0, kind: input, shape index: {}]   ;;  %s341_s2 = inlined_call_operand.vmem [shape: f32[1,256], index: 2, kind: input, shape index: {}]   ;;  %s342_s3 = inlined_call_operand.vmem [shape: f32[16,256], index: 3, kind: output, shape index: {}]  }
   0x1   :  { %v225_v0 = vld [vmem:[%s339_s1 + $0x4] ss:$8 sps:$4 sm:$0xff]   ;;  %158 = vmatprep.mubr.bf16.mxu0 %v249_v1  ;;  %v227_v2 = vld [vmem:[%s339_s1] ss:$8 sps:$4 sm:$0xff]   ;;  %v228_v3 = vld [vmem:[%s339_s1 + $0x14] ss:$8 sps:$4 sm:$0xff]  }
   0x2   :  { %126 = vmatprep.subr.bf16.mxu0 %v225_v0  ;;  %v230_v4 = vld [vmem:[%s339_s1 + $0x10] ss:$8 sps:$4 sm:$0xff]   ;;  %v231_v5 = vld [vmem:[%s339_s1 + $0x24] ss:$8 sps:$4 sm:$0xff]   ;;  %v233_v6 = vld [vmem:[%s339_s1 + $0x20] ss:$8 sps:$4 sm:$0xff]  }
   0x3   :  { %127 = vmatpush1.bf16.msra.mxu0 %v227_v2  ;;  %v234_v7 = vld [vmem:[%s339_s1 + $0x34] ss:$8 sps:$4 sm:$0xff]   ;;  %v236_v8 = vld [vmem:[%s339_s1 + $0x30] ss:$8 sps:$4 sm:$0xff]   ;;  %v237_v9 = vld [vmem:[%s339_s1 + $0x44] ss:$8 sps:$4 sm:$0xff]  }
   0x4   :  { %128 = vmatprep.subr.bf16.mxu0 %v228_v3  ;;  %v239_v10 = vld [vmem:[%s339_s1 + $0x40] ss:$8 sps:$4 sm:$0xff]   ;;  %v240_v11 = vld [vmem:[%s339_s1 + $0x54] ss:$8 sps:$4 sm:$0xff]   ;;  %v242_v12 = vld [vmem:[%s339_s1 + $0x50] ss:$8 sps:$4 sm:$0xff]  }
   0x5   :  { %v243_v13 = vld [vmem:[%s339_s1 + $0x64] ss:$8 sps:$4 sm:$0xff]   ;;  %v245_v14 = vld [vmem:[%s339_s1 + $0x60] ss:$8 sps:$4 sm:$0xff]   ;;  %v246_v15 = vld [vmem:[%s339_s1 + $0x74] ss:$8 sps:$4 sm:$0xff]  }
   0x6   :  { %v248_v16 = vld [vmem:[%s339_s1 + $0x70] ss:$8 sps:$4 sm:$0xff]   ;;  %v27_v17 = vld [vmem:[%s340_s0] sm:$0xff]  ;;  %v28_v18 = vld [vmem:[%s340_s0 + $0x8] sm:$0xff]  ;;  %v187_v21 = vshrl.u32 %v186_v20, 7 }
   0x7   :  { %129 = vmatpush1.bf16.msra.mxu0 %v230_v4  ;;  %v29_v19 = vpack.c.bf16 %v28_v18, %v27_v17  ;;  %v184_v23 = vld [vmem:[%s341_s2] sm:$0x3] }
   0x8   :  { %130 = vmatprep.subr.bf16.mxu0 %v231_v5  ;;  %v188_v22 = vsub.s32 0, %v187_v21  ;;  %v192_v24 = vsub.s32 1, %v187_v21 }
   0xa   :  { %v189_v25 = vrot.slane %v184_v23, %v188_v22  ;;  %v193_v26 = vrot.slane %v184_v23, %v192_v24 }
   0xb   :  { %131 = vmatpush1.bf16.msra.mxu0 %v233_v6 }
   0xc   :  { %132 = vmatprep.subr.bf16.mxu0 %v234_v7 }
   0xf   :  { %133 = vmatpush1.bf16.msra.mxu0 %v236_v8 }
  0x10   :  { %134 = vmatprep.subr.bf16.mxu0 %v237_v9 }
  0x13   :  { %135 = vmatpush1.bf16.msra.mxu0 %v239_v10 }
  0x14   :  { %136 = vmatprep.subr.bf16.mxu0 %v240_v11 }
  0x17   :  { %137 = vmatpush1.bf16.msra.mxu0 %v242_v12 }
  0x18   :  { %138 = vmatprep.subr.bf16.mxu0 %v243_v13 }
  0x1b   :  { %139 = vmatpush1.bf16.msra.mxu0 %v245_v14 }
  0x1c   :  { %140 = vmatprep.subr.bf16.mxu0 %v246_v15 }
  0x1f   :  { %141 = vmatpush1.bf16.msra.mxu0 %v248_v16 }
  0x22   :  { %159 = vmatmul.mubr.bf16.vlgmr.msra.gmra.mrb[0].mxu0 %v29_v19 }
  0xf5   :  { %v160_v27 = vpop.f32.mrb[0].mxu0 }
  0xf6   :  { %v196_v28 = vadd.f32 %v189_v25, %v160_v27  ;;  %v162_v29 = vpop.f32.mrb[1].mxu0 }
  0xf7   :  { %v197_v30 = vadd.f32 %v193_v26, %v162_v29  ;;  %v164_v31 = vpop.f32.mrb[2].mxu0 }
  0xf8   :  { %200 = vst [vmem:[%s342_s3] sm:$0xff] %v196_v28  ;;  %v198_v32 = vadd.f32 %v189_v25, %v164_v31  ;;  %v166_v33 = vpop.f32.mrb[3].mxu0 }
  0xf9   :  { %201 = vst [vmem:[%s342_s3 + $0x8] sm:$0xff] %v197_v30  ;;  %v199_v34 = vadd.f32 %v193_v26, %v166_v33 }
  0xfa   :  { %202 = vst [vmem:[%s342_s3 + $0x10] sm:$0xff] %v198_v32 }
  0xfb   :  { %203 = vst [vmem:[%s342_s3 + $0x18] sm:$0xff] %v199_v34 }

</bundles_post_ra>
